<compile_context>
chip_gen: v7x
topology: tpu7x:2x2x1
jax: 0.10.0
libtpu: 0.0.40
codegen_flags: <defaults>
</compile_context>

<pallas_src>
import functools

import jax
import jax.numpy as jnp
import numpy as np
from jax.experimental import pallas as pl
from jax.experimental.pallas import tpu as pltpu


# ---------------------------------------------------------------------------
# Host-side (one-time) parameter preprocessing.
# ---------------------------------------------------------------------------
def make_banded_weight(w_hwio, out_w):
    """Lower a stride-1 'same'-padded conv to a single banded-matmul weight.

    w_hwio: (kh, kw, cin, cout). Returns Wb of shape
    (kh * (out_w + kw - 1) * cin, out_w * cout) such that with patches
        P[n*H + y, dy*wp*cin + wx*cin + ci] = x_pad[n, y + dy, wx, ci]
    the product P @ Wb equals the convolution, with output lane layout
    x*cout + co (lane-dense, 256 lanes for this model).
    """
    w_hwio = np.asarray(w_hwio)
    kh, kw, cin, cout = w_hwio.shape
    wp = out_w + kw - 1
    wb = np.zeros((kh, wp, cin, out_w, cout), w_hwio.dtype)
    for x in range(out_w):
        wb[:, x:x + kw, :, x, :] = w_hwio  # Wb[dy, x+dx, ci, x, co] = w[dy, dx, ci, co]
    return jnp.asarray(wb.reshape(kh * wp * cin, out_w * cout))


def prepare_kernel_params(params, *, h=16, w=16, out_1=16, out_2=32):
    """Reshape / permute torch-layout params into the kernel's layouts."""
    w1, b1, w2, b2, fw, fb = params
    wb1 = make_banded_weight(w1, w)            # (5*20*1, 16*16)  = (100, 256)
    wb2 = make_banded_weight(w2, w // 2)       # (5*12*16, 8*32)  = (960, 256)
    # Bias tiled to the x*cout+c lane layout of the conv outputs.
    b1t = jnp.tile(jnp.asarray(b1).reshape(1, -1), (1, w))        # (1, 256)
    b2t = jnp.tile(jnp.asarray(b2).reshape(1, -1), (1, w // 2))   # (1, 256)
    # Permute FC weight rows so the kernel's NHWC flatten (y, x, c) matches
    # torch's x.view(N, -1) order (c, y, x).
    h4, w4 = h // 4, w // 4
    idx = np.arange(out_2 * h4 * w4)
    yy = idx // (w4 * out_2)
    xx = (idx // out_2) % w4
    cc = idx % out_2
    perm = cc * (h4 * w4) + yy * w4 + xx
    fw = np.asarray(fw)
    assert fw.shape[0] == out_2 * h4 * w4
    fwp = jnp.asarray(fw[perm, :])                                 # (512, 10)
    fbr = jnp.asarray(fb).reshape(1, -1)                           # (1, 10)
    return wb1, b1t, wb2, b2t, fwp, fbr


# ---------------------------------------------------------------------------
# The fused kernel: one batch tile per grid step.
#   x_ref  : (bn, 1, H, W)       NCHW input tile
#   wb1_ref: (5*(W+4), W*out_1)  banded conv1 weight
#   b1t_ref: (1, W*out_1)        conv1 bias tiled over x
#   wb2_ref: (5*(W/2+4)*out_1, (W/2)*out_2)
#   b2t_ref: (1, (W/2)*out_2)
#   fw_ref : (out_2*H/4*W/4, num_classes)   row-permuted FC weight
#   fb_ref : (1, num_classes)
#   o_ref  : (bn, num_classes)
#   xp1_ref: VMEM scratch (bn, H+4, W+4)            zero-padded conv1 input
#   xp2_ref: VMEM scratch (bn, H/2+4, (W/2+4)*out_1) zero-padded conv2 input
# ---------------------------------------------------------------------------
def cnn_fused_kernel(x_ref, wb1_ref, b1t_ref, wb2_ref, b2t_ref, fw_ref, fb_ref,
                     o_ref, xp1_ref, xp2_ref, *, out_1, out_2, ksize):
    n = x_ref.shape[0]
    h, w = x_ref.shape[2], x_ref.shape[3]
    pad = ksize // 2
    h2, w2 = h // 2, w // 2          # spatial after pool1
    h4, w4 = h2 // 2, w2 // 2        # spatial after pool2
    wp1 = w + 2 * pad                # padded width for conv1
    wp2 = w2 + 2 * pad               # padded width for conv2

    # ---- conv1 input: zero-pad into VMEM scratch (Cin=1 squeezed, W on lanes).
    xp1_ref[...] = jnp.zeros_like(xp1_ref)
    xp1_ref[:, pad:pad + h, pad:pad + w] = x_ref[:, 0, :, :]

    # ---- conv1 (5x5, pad=2) as ONE banded matmul:
    #      (n*h, 5*wp1) @ (5*wp1, w*out_1)  ->  rows=(n,y), lanes=x*out_1+c
    lhs1 = jnp.concatenate(
        [xp1_ref[:, dy:dy + h, :].reshape(n * h, wp1) for dy in range(ksize)],
        axis=1)
    a1 = jnp.dot(lhs1, wb1_ref[...], preferred_element_type=jnp.float32)
    a1 = jnp.maximum(a1 + b1t_ref[...], 0.0)            # ReLU
    a1 = a1.reshape(n, h, w * out_1)

    # ---- maxpool 2x2, writing the zero-padded conv2 input directly into VMEM
    #      scratch with layout (n, y_pad, x_pad*out_1).
    xp2_ref[...] = jnp.zeros_like(xp2_ref)
    for yo in range(h2):
        row = jnp.maximum(a1[:, 2 * yo, :], a1[:, 2 * yo + 1, :])   # pool y
        pooled = jnp.concatenate(
            [jnp.maximum(row[:, (2 * xo) * out_1:(2 * xo + 1) * out_1],
                         row[:, (2 * xo + 1) * out_1:(2 * xo + 2) * out_1])
             for xo in range(w2)],
            axis=1)                                                  # pool x
        xp2_ref[:, pad + yo, pad * out_1:(pad + w2) * out_1] = pooled

    # ---- conv2 (5x5, pad=2) as ONE banded matmul:
    #      (n*h2, 5*wp2*out_1) @ (5*wp2*out_1, w2*out_2)
    lhs2 = jnp.concatenate(
        [xp2_ref[:, dy:dy + h2, :].reshape(n * h2, wp2 * out_1)
         for dy in range(ksize)],
        axis=1)
    a2 = jnp.dot(lhs2, wb2_ref[...], preferred_element_type=jnp.float32)
    a2 = jnp.maximum(a2 + b2t_ref[...], 0.0)            # ReLU
    a2 = a2.reshape(n, h2, w2 * out_2)                  # lanes = x*out_2 + c

    # ---- maxpool 2x2 + NHWC flatten (FC weight rows are pre-permuted so this
    #      matches torch's NCHW view order), then the FC matmul.
    pieces = []
    for yo in range(h4):
        row = jnp.maximum(a2[:, 2 * yo, :], a2[:, 2 * yo + 1, :])   # pool y
        for xo in range(w4):
            pieces.append(
                jnp.maximum(row[:, (2 * xo) * out_2:(2 * xo + 1) * out_2],
                            row[:, (2 * xo + 1) * out_2:(2 * xo + 2) * out_2]))
    feat = jnp.concatenate(pieces, axis=1)              # (n, h4*w4*out_2)

    logits = jnp.dot(feat, fw_ref[...], preferred_element_type=jnp.float32)
    o_ref[...] = (logits + fb_ref[...]).astype(o_ref.dtype)


# ---------------------------------------------------------------------------
# Wrapper: single pallas_call, batch-tiled grid (whole batch for N<=16).
# ---------------------------------------------------------------------------
def cnn_forward_pallas(x_nchw, kparams, *, out_1=16, out_2=32,
                       num_classes=10, ksize=5, max_batch_block=16):
    wb1, b1t, wb2, b2t, fwp, fb = kparams
    n, cin, h, w = x_nchw.shape
    assert cin == 1 and h % 4 == 0 and w % 4 == 0
    pad = ksize // 2
    h2, w2 = h // 2, w // 2

    bn = n if n <= max_batch_block else max_batch_block
    n_pad = (-n) % bn
    if n_pad:
        x_nchw = jnp.concatenate(
            [x_nchw, jnp.zeros((n_pad, cin, h, w), x_nchw.dtype)], axis=0)
    nb = (n + n_pad) // bn

    kernel = functools.partial(cnn_fused_kernel,
                               out_1=out_1, out_2=out_2, ksize=ksize)
    out = pl.pallas_call(
        kernel,
        out_shape=jax.ShapeDtypeStruct((n + n_pad, num_classes), jnp.float32),
        grid=(nb,),
        in_specs=[
            pl.BlockSpec((bn, 1, h, w), lambda i: (i, 0, 0, 0)),
            pl.BlockSpec(wb1.shape, lambda i: (0, 0)),
            pl.BlockSpec(b1t.shape, lambda i: (0, 0)),
            pl.BlockSpec(wb2.shape, lambda i: (0, 0)),
            pl.BlockSpec(b2t.shape, lambda i: (0, 0)),
            pl.BlockSpec(fwp.shape, lambda i: (0, 0)),
            pl.BlockSpec(fb.shape, lambda i: (0, 0)),
        ],
        out_specs=pl.BlockSpec((bn, num_classes), lambda i: (i, 0)),
        scratch_shapes=[
            pltpu.VMEM((bn, h + 2 * pad, w + 2 * pad), jnp.float32),
            pltpu.VMEM((bn, h2 + 2 * pad, (w2 + 2 * pad) * out_1), jnp.float32),
        ],
        compiler_params=pltpu.CompilerParams(
            dimension_semantics=("parallel",)),
    )(x_nchw, wb1, b1t, wb2, b2t, fwp, fb)
    return out[:n] if n_pad else out


cnn_forward = jax.jit(cnn_forward_pallas)


# ---------------------------------------------------------------------------
# Pure-JAX reference (for correctness check of the Pallas kernel).
# ---------------------------------------------------------------------------
def cnn_reference(x_nchw, params):
    w1, b1, w2, b2, fw, fb = params

    def conv(x, wgt, b):
        w_oihw = jnp.transpose(wgt, (3, 2, 0, 1))
        y = jax.lax.conv_general_dilated(
            x, w_oihw, (1, 1), ((2, 2), (2, 2)),
            dimension_numbers=("NCHW", "OIHW", "NCHW"))
        return y + b.reshape(1, -1, 1, 1)

    def pool(x):
        return jax.lax.reduce_window(
            x, -jnp.inf, jax.lax.max, (1, 1, 2, 2), (1, 1, 2, 2), "VALID")

    h = pool(jnp.maximum(conv(x_nchw, w1, b1), 0.0))
    h = pool(jnp.maximum(conv(h, w2, b2), 0.0))
    h = h.reshape(h.shape[0], -1)                 # torch's (C, H, W) flatten
    return h @ fw + fb.reshape(1, -1)


def init_params(key, out_1=16, out_2=32, num_classes=10):
    k1, k2, k3, k4, k5, k6 = jax.random.split(key, 6)
    # Conv weights as (kh, kw, Cin, Cout); fc weight as (in, out) in torch
    # flatten order; fc bias (1, out).
    w1 = jax.random.normal(k1, (5, 5, 1, out_1), jnp.float32) * 0.1
    b1 = jax.random.normal(k2, (1, out_1), jnp.float32) * 0.1
    w2 = jax.random.normal(k3, (5, 5, out_1, out_2), jnp.float32) * 0.05
    b2 = jax.random.normal(k4, (1, out_2), jnp.float32) * 0.05
    fw = jax.random.normal(k5, (out_2 * 4 * 4, num_classes), jnp.float32) * 0.02
    fb = jax.random.normal(k6, (1, num_classes), jnp.float32) * 0.02
    return (w1, b1, w2, b2, fw, fb)


if __name__ == "__main__":
    key = jax.random.PRNGKey(0)
    kx, kp = jax.random.split(key)

    # Input consistent with the module: fc expects out_2*4*4 features, so the
    # spatial size is 16x16 with 1 input channel (NCHW, like PyTorch).
    x = jax.random.normal(kx, (2, 1, 16, 16), jnp.float32)
    params = init_params(kp)
    kparams = prepare_kernel_params(params)

    out = jax.block_until_ready(cnn_forward(x, kparams))
    ref = jax.block_until_ready(cnn_reference(x, params))
    np.testing.assert_allclose(np.asarray(out), np.asarray(ref),
                               rtol=1e-3, atol=1e-3)

    assert out.shape == (2, 10) and out.dtype == jnp.float32
    print("KERNEL_OK")
</pallas_src>

<mosaic_0001>
module attributes {stable_mosaic.version = 11 : i64} {
  func.func @cnn_fused_kernel(%arg0: i32, %arg1: memref<2x1x16x16xf32, #tpu.memory_space<vmem>>, %arg2: memref<100x256xf32, #tpu.memory_space<vmem>>, %arg3: memref<1x256xf32, #tpu.memory_space<vmem>>, %arg4: memref<960x256xf32, #tpu.memory_space<vmem>>, %arg5: memref<1x256xf32, #tpu.memory_space<vmem>>, %arg6: memref<512x10xf32, #tpu.memory_space<vmem>>, %arg7: memref<1x10xf32, #tpu.memory_space<vmem>>, %arg8: memref<2x10xf32, #tpu.memory_space<vmem>>, %arg9: memref<2x20x20xf32, #tpu.memory_space<vmem>>, %arg10: memref<2x12x192xf32, #tpu.memory_space<vmem>>) attributes {dimension_semantics = [#tpu.dimension_semantics<parallel>], iteration_bounds = array<i64: 1>, scalar_prefetch = 0 : i64, scratch_operands = 2 : i64, tpu.core_type = #tpu.core_type<tc>, window_params = [{transform_indices = @transform_0, window_bounds = array<i64: 2, 1, 16, 16>}, {pipeline_mode = #tpu.pipeline_mode<synchronous>, transform_indices = @transform_1, window_bounds = array<i64: 100, 256>}, {pipeline_mode = #tpu.pipeline_mode<synchronous>, transform_indices = @transform_2, window_bounds = array<i64: 1, 256>}, {pipeline_mode = #tpu.pipeline_mode<synchronous>, transform_indices = @transform_3, window_bounds = array<i64: 960, 256>}, {pipeline_mode = #tpu.pipeline_mode<synchronous>, transform_indices = @transform_4, window_bounds = array<i64: 1, 256>}, {pipeline_mode = #tpu.pipeline_mode<synchronous>, transform_indices = @transform_5, window_bounds = array<i64: 512, 10>}, {pipeline_mode = #tpu.pipeline_mode<synchronous>, transform_indices = @transform_6, window_bounds = array<i64: 1, 10>}, {transform_indices = @transform_7, window_bounds = array<i64: 2, 10>}]} {
    %cst = arith.constant 0.000000e+00 : f32
    %0 = vector.broadcast %cst : f32 to vector<2x20x20xf32>
    %c0 = arith.constant 0 : index
    %c0_0 = arith.constant 0 : index
    %c0_1 = arith.constant 0 : index
    %1 = vector.load %arg9[%c0, %c0_0, %c0_1] : memref<2x20x20xf32, #tpu.memory_space<vmem>>, vector<2x20x20xf32>
    tpu.vector_store %arg9[%c0, %c0_0, %c0_1], %0 {strides = array<i32>} : memref<2x20x20xf32, #tpu.memory_space<vmem>>, vector<2x20x20xf32>,
    %c0_2 = arith.constant 0 : index
    %c0_3 = arith.constant 0 : index
    %c0_4 = arith.constant 0 : index
    %c0_5 = arith.constant 0 : index
    %2 = vector.load %arg1[%c0_2, %c0_3, %c0_4, %c0_5] : memref<2x1x16x16xf32, #tpu.memory_space<vmem>>, vector<2x1x16x16xf32>
    %3 = vector.shape_cast %2 : vector<2x1x16x16xf32> to vector<2x16x16xf32>
    %c0_6 = arith.constant 0 : index
    %c2 = arith.constant 2 : index
    %c2_7 = arith.constant 2 : index
    %4 = vector.load %arg9[%c0_6, %c2, %c2_7] : memref<2x20x20xf32, #tpu.memory_space<vmem>>, vector<2x16x16xf32>
    tpu.vector_store %arg9[%c0_6, %c2, %c2_7], %3 {strides = array<i32>} : memref<2x20x20xf32, #tpu.memory_space<vmem>>, vector<2x16x16xf32>,
    %c0_8 = arith.constant 0 : index
    %c0_9 = arith.constant 0 : index
    %c0_10 = arith.constant 0 : index
    %5 = vector.load %arg9[%c0_8, %c0_9, %c0_10] : memref<2x20x20xf32, #tpu.memory_space<vmem>>, vector<2x16x20xf32>
    %6 = vector.shape_cast %5 : vector<2x16x20xf32> to vector<32x20xf32>
    %c0_11 = arith.constant 0 : index
    %c1 = arith.constant 1 : index
    %c0_12 = arith.constant 0 : index
    %7 = vector.load %arg9[%c0_11, %c1, %c0_12] : memref<2x20x20xf32, #tpu.memory_space<vmem>>, vector<2x16x20xf32>
    %8 = vector.shape_cast %7 : vector<2x16x20xf32> to vector<32x20xf32>
    %c0_13 = arith.constant 0 : index
    %c2_14 = arith.constant 2 : index
    %c0_15 = arith.constant 0 : index
    %9 = vector.load %arg9[%c0_13, %c2_14, %c0_15] : memref<2x20x20xf32, #tpu.memory_space<vmem>>, vector<2x16x20xf32>
    %10 = vector.shape_cast %9 : vector<2x16x20xf32> to vector<32x20xf32>
    %c0_16 = arith.constant 0 : index
    %c3 = arith.constant 3 : index
    %c0_17 = arith.constant 0 : index
    %11 = vector.load %arg9[%c0_16, %c3, %c0_17] : memref<2x20x20xf32, #tpu.memory_space<vmem>>, vector<2x16x20xf32>
    %12 = vector.shape_cast %11 : vector<2x16x20xf32> to vector<32x20xf32>
    %c0_18 = arith.constant 0 : index
    %c4 = arith.constant 4 : index
    %c0_19 = arith.constant 0 : index
    %13 = vector.load %arg9[%c0_18, %c4, %c0_19] : memref<2x20x20xf32, #tpu.memory_space<vmem>>, vector<2x16x20xf32>
    %14 = vector.shape_cast %13 : vector<2x16x20xf32> to vector<32x20xf32>
    %15 = tpu.concatenate %6, %8, %10, %12, %14 in 1 : vector<32x20xf32>, vector<32x20xf32>, vector<32x20xf32>, vector<32x20xf32>, vector<32x20xf32> -> vector<32x100xf32>
    %c0_20 = arith.constant 0 : index
    %c0_21 = arith.constant 0 : index
    %16 = vector.load %arg2[%c0_20, %c0_21] : memref<100x256xf32, #tpu.memory_space<vmem>>, vector<100x256xf32>
    %cst_22 = arith.constant dense<0.000000e+00> : vector<32x256xf32>
    %17 = tpu.matmul %15, %16, %cst_22 {dimension_numbers = #tpu.dot_dimension_numbers<[1], [0], [0], [1], [0, 0, 1, 1], [], []>} : vector<32x100xf32>, vector<100x256xf32>, vector<32x256xf32> -> vector<32x256xf32>
    %c0_23 = arith.constant 0 : index
    %c0_24 = arith.constant 0 : index
    %18 = vector.load %arg3[%c0_23, %c0_24] : memref<1x256xf32, #tpu.memory_space<vmem>>, vector<1x256xf32>
    %19 = vector.broadcast %18 : vector<1x256xf32> to vector<32x256xf32>
    %20 = arith.addf %17, %19 : vector<32x256xf32>
    %cst_25 = arith.constant 0.000000e+00 : f32
    %21 = vector.broadcast %cst_25 : f32 to vector<32x256xf32>
    %22 = arith.maximumf %20, %21 : vector<32x256xf32>
    %23 = vector.shape_cast %22 : vector<32x256xf32> to vector<2x16x256xf32>
    %cst_26 = arith.constant 0.000000e+00 : f32
    %24 = vector.broadcast %cst_26 : f32 to vector<2x12x192xf32>
    %c0_27 = arith.constant 0 : index
    %c0_28 = arith.constant 0 : index
    %c0_29 = arith.constant 0 : index
    %25 = vector.load %arg10[%c0_27, %c0_28, %c0_29] : memref<2x12x192xf32, #tpu.memory_space<vmem>>, vector<2x12x192xf32>
    tpu.vector_store %arg10[%c0_27, %c0_28, %c0_29], %24 {strides = array<i32>} : memref<2x12x192xf32, #tpu.memory_space<vmem>>, vector<2x12x192xf32>,
    %26 = vector.extract_strided_slice %23 {offsets = [0, 0, 0], sizes = [2, 1, 256], strides = [1, 1, 1]} : vector<2x16x256xf32> to vector<2x1x256xf32>
    %27 = vector.shape_cast %26 : vector<2x1x256xf32> to vector<2x256xf32>
    %28 = vector.extract_strided_slice %23 {offsets = [0, 1, 0], sizes = [2, 1, 256], strides = [1, 1, 1]} : vector<2x16x256xf32> to vector<2x1x256xf32>
    %29 = vector.shape_cast %28 : vector<2x1x256xf32> to vector<2x256xf32>
    %30 = arith.maximumf %27, %29 : vector<2x256xf32>
    %31 = vector.extract_strided_slice %30 {offsets = [0, 0], sizes = [2, 16], strides = [1, 1]} : vector<2x256xf32> to vector<2x16xf32>
    %32 = vector.extract_strided_slice %30 {offsets = [0, 16], sizes = [2, 16], strides = [1, 1]} : vector<2x256xf32> to vector<2x16xf32>
    %33 = arith.maximumf %31, %32 : vector<2x16xf32>
    %34 = vector.extract_strided_slice %30 {offsets = [0, 32], sizes = [2, 16], strides = [1, 1]} : vector<2x256xf32> to vector<2x16xf32>
    %35 = vector.extract_strided_slice %30 {offsets = [0, 48], sizes = [2, 16], strides = [1, 1]} : vector<2x256xf32> to vector<2x16xf32>
    %36 = arith.maximumf %34, %35 : vector<2x16xf32>
    %37 = vector.extract_strided_slice %30 {offsets = [0, 64], sizes = [2, 16], strides = [1, 1]} : vector<2x256xf32> to vector<2x16xf32>
    %38 = vector.extract_strided_slice %30 {offsets = [0, 80], sizes = [2, 16], strides = [1, 1]} : vector<2x256xf32> to vector<2x16xf32>
    %39 = arith.maximumf %37, %38 : vector<2x16xf32>
    %40 = vector.extract_strided_slice %30 {offsets = [0, 96], sizes = [2, 16], strides = [1, 1]} : vector<2x256xf32> to vector<2x16xf32>
    %41 = vector.extract_strided_slice %30 {offsets = [0, 112], sizes = [2, 16], strides = [1, 1]} : vector<2x256xf32> to vector<2x16xf32>
    %42 = arith.maximumf %40, %41 : vector<2x16xf32>
    %43 = vector.extract_strided_slice %30 {offsets = [0, 128], sizes = [2, 16], strides = [1, 1]} : vector<2x256xf32> to vector<2x16xf32>
    %44 = vector.extract_strided_slice %30 {offsets = [0, 144], sizes = [2, 16], strides = [1, 1]} : vector<2x256xf32> to vector<2x16xf32>
    %45 = arith.maximumf %43, %44 : vector<2x16xf32>
    %46 = vector.extract_strided_slice %30 {offsets = [0, 160], sizes = [2, 16], strides = [1, 1]} : vector<2x256xf32> to vector<2x16xf32>
    %47 = vector.extract_strided_slice %30 {offsets = [0, 176], sizes = [2, 16], strides = [1, 1]} : vector<2x256xf32> to vector<2x16xf32>
    %48 = arith.maximumf %46, %47 : vector<2x16xf32>
    %49 = vector.extract_strided_slice %30 {offsets = [0, 192], sizes = [2, 16], strides = [1, 1]} : vector<2x256xf32> to vector<2x16xf32>
    %50 = vector.extract_strided_slice %30 {offsets = [0, 208], sizes = [2, 16], strides = [1, 1]} : vector<2x256xf32> to vector<2x16xf32>
    %51 = arith.maximumf %49, %50 : vector<2x16xf32>
    %52 = vector.extract_strided_slice %30 {offsets = [0, 224], sizes = [2, 16], strides = [1, 1]} : vector<2x256xf32> to vector<2x16xf32>
    %53 = vector.extract_strided_slice %30 {offsets = [0, 240], sizes = [2, 16], strides = [1, 1]} : vector<2x256xf32> to vector<2x16xf32>
    %54 = arith.maximumf %52, %53 : vector<2x16xf32>
    %55 = tpu.concatenate %33, %36, %39, %42, %45, %48, %51, %54 in 1 : vector<2x16xf32>, vector<2x16xf32>, vector<2x16xf32>, vector<2x16xf32>, vector<2x16xf32>, vector<2x16xf32>, vector<2x16xf32>, vector<2x16xf32> -> vector<2x128xf32>
    %c0_30 = arith.constant 0 : index
    %c2_31 = arith.constant 2 : index
    %c32 = arith.constant 32 : index
    %56 = vector.load %arg10[%c0_30, %c2_31, %c32] : memref<2x12x192xf32, #tpu.memory_space<vmem>>, vector<2x1x128xf32>
    %57 = vector.shape_cast %56 : vector<2x1x128xf32> to vector<2x128xf32>
    %58 = vector.shape_cast %55 : vector<2x128xf32> to vector<2x1x128xf32>
    tpu.vector_store %arg10[%c0_30, %c2_31, %c32], %58 {strides = array<i32>} : memref<2x12x192xf32, #tpu.memory_space<vmem>>, vector<2x1x128xf32>,
    %59 = vector.extract_strided_slice %23 {offsets = [0, 2, 0], sizes = [2, 1, 256], strides = [1, 1, 1]} : vector<2x16x256xf32> to vector<2x1x256xf32>
    %60 = vector.shape_cast %59 : vector<2x1x256xf32> to vector<2x256xf32>
    %61 = vector.extract_strided_slice %23 {offsets = [0, 3, 0], sizes = [2, 1, 256], strides = [1, 1, 1]} : vector<2x16x256xf32> to vector<2x1x256xf32>
    %62 = vector.shape_cast %61 : vector<2x1x256xf32> to vector<2x256xf32>
    %63 = arith.maximumf %60, %62 : vector<2x256xf32>
    %64 = vector.extract_strided_slice %63 {offsets = [0, 0], sizes = [2, 16], strides = [1, 1]} : vector<2x256xf32> to vector<2x16xf32>
    %65 = vector.extract_strided_slice %63 {offsets = [0, 16], sizes = [2, 16], strides = [1, 1]} : vector<2x256xf32> to vector<2x16xf32>
    %66 = arith.maximumf %64, %65 : vector<2x16xf32>
    %67 = vector.extract_strided_slice %63 {offsets = [0, 32], sizes = [2, 16], strides = [1, 1]} : vector<2x256xf32> to vector<2x16xf32>
    %68 = vector.extract_strided_slice %63 {offsets = [0, 48], sizes = [2, 16], strides = [1, 1]} : vector<2x256xf32> to vector<2x16xf32>
    %69 = arith.maximumf %67, %68 : vector<2x16xf32>
    %70 = vector.extract_strided_slice %63 {offsets = [0, 64], sizes = [2, 16], strides = [1, 1]} : vector<2x256xf32> to vector<2x16xf32>
    %71 = vector.extract_strided_slice %63 {offsets = [0, 80], sizes = [2, 16], strides = [1, 1]} : vector<2x256xf32> to vector<2x16xf32>
    %72 = arith.maximumf %70, %71 : vector<2x16xf32>
    %73 = vector.extract_strided_slice %63 {offsets = [0, 96], sizes = [2, 16], strides = [1, 1]} : vector<2x256xf32> to vector<2x16xf32>
    %74 = vector.extract_strided_slice %63 {offsets = [0, 112], sizes = [2, 16], strides = [1, 1]} : vector<2x256xf32> to vector<2x16xf32>
    %75 = arith.maximumf %73, %74 : vector<2x16xf32>
    %76 = vector.extract_strided_slice %63 {offsets = [0, 128], sizes = [2, 16], strides = [1, 1]} : vector<2x256xf32> to vector<2x16xf32>
    %77 = vector.extract_strided_slice %63 {offsets = [0, 144], sizes = [2, 16], strides = [1, 1]} : vector<2x256xf32> to vector<2x16xf32>
    %78 = arith.maximumf %76, %77 : vector<2x16xf32>
    %79 = vector.extract_strided_slice %63 {offsets = [0, 160], sizes = [2, 16], strides = [1, 1]} : vector<2x256xf32> to vector<2x16xf32>
    %80 = vector.extract_strided_slice %63 {offsets = [0, 176], sizes = [2, 16], strides = [1, 1]} : vector<2x256xf32> to vector<2x16xf32>
    %81 = arith.maximumf %79, %80 : vector<2x16xf32>
    %82 = vector.extract_strided_slice %63 {offsets = [0, 192], sizes = [2, 16], strides = [1, 1]} : vector<2x256xf32> to vector<2x16xf32>
    %83 = vector.extract_strided_slice %63 {offsets = [0, 208], sizes = [2, 16], strides = [1, 1]} : vector<2x256xf32> to vector<2x16xf32>
    %84 = arith.maximumf %82, %83 : vector<2x16xf32>
    %85 = vector.extract_strided_slice %63 {offsets = [0, 224], sizes = [2, 16], strides = [1, 1]} : vector<2x256xf32> to vector<2x16xf32>
    %86 = vector.extract_strided_slice %63 {offsets = [0, 240], sizes = [2, 16], strides = [1, 1]} : vector<2x256xf32> to vector<2x16xf32>
    %87 = arith.maximumf %85, %86 : vector<2x16xf32>
    %88 = tpu.concatenate %66, %69, %72, %75, %78, %81, %84, %87 in 1 : vector<2x16xf32>, vector<2x16xf32>, vector<2x16xf32>, vector<2x16xf32>, vector<2x16xf32>, vector<2x16xf32>, vector<2x16xf32>, vector<2x16xf32> -> vector<2x128xf32>
    %c0_32 = arith.constant 0 : index
    %c3_33 = arith.constant 3 : index
    %c32_34 = arith.constant 32 : index
    %89 = vector.load %arg10[%c0_32, %c3_33, %c32_34] : memref<2x12x192xf32, #tpu.memory_space<vmem>>, vector<2x1x128xf32>
    %90 = vector.shape_cast %89 : vector<2x1x128xf32> to vector<2x128xf32>
    %91 = vector.shape_cast %88 : vector<2x128xf32> to vector<2x1x128xf32>
    tpu.vector_store %arg10[%c0_32, %c3_33, %c32_34], %91 {strides = array<i32>} : memref<2x12x192xf32, #tpu.memory_space<vmem>>, vector<2x1x128xf32>,
    %92 = vector.extract_strided_slice %23 {offsets = [0, 4, 0], sizes = [2, 1, 256], strides = [1, 1, 1]} : vector<2x16x256xf32> to vector<2x1x256xf32>
    %93 = vector.shape_cast %92 : vector<2x1x256xf32> to vector<2x256xf32>
    %94 = vector.extract_strided_slice %23 {offsets = [0, 5, 0], sizes = [2, 1, 256], strides = [1, 1, 1]} : vector<2x16x256xf32> to vector<2x1x256xf32>
    %95 = vector.shape_cast %94 : vector<2x1x256xf32> to vector<2x256xf32>
    %96 = arith.maximumf %93, %95 : vector<2x256xf32>
    %97 = vector.extract_strided_slice %96 {offsets = [0, 0], sizes = [2, 16], strides = [1, 1]} : vector<2x256xf32> to vector<2x16xf32>
    %98 = vector.extract_strided_slice %96 {offsets = [0, 16], sizes = [2, 16], strides = [1, 1]} : vector<2x256xf32> to vector<2x16xf32>
    %99 = arith.maximumf %97, %98 : vector<2x16xf32>
    %100 = vector.extract_strided_slice %96 {offsets = [0, 32], sizes = [2, 16], strides = [1, 1]} : vector<2x256xf32> to vector<2x16xf32>
    %101 = vector.extract_strided_slice %96 {offsets = [0, 48], sizes = [2, 16], strides = [1, 1]} : vector<2x256xf32> to vector<2x16xf32>
    %102 = arith.maximumf %100, %101 : vector<2x16xf32>
    %103 = vector.extract_strided_slice %96 {offsets = [0, 64], sizes = [2, 16], strides = [1, 1]} : vector<2x256xf32> to vector<2x16xf32>
    %104 = vector.extract_strided_slice %96 {offsets = [0, 80], sizes = [2, 16], strides = [1, 1]} : vector<2x256xf32> to vector<2x16xf32>
    %105 = arith.maximumf %103, %104 : vector<2x16xf32>
    %106 = vector.extract_strided_slice %96 {offsets = [0, 96], sizes = [2, 16], strides = [1, 1]} : vector<2x256xf32> to vector<2x16xf32>
    %107 = vector.extract_strided_slice %96 {offsets = [0, 112], sizes = [2, 16], strides = [1, 1]} : vector<2x256xf32> to vector<2x16xf32>
    %108 = arith.maximumf %106, %107 : vector<2x16xf32>
    %109 = vector.extract_strided_slice %96 {offsets = [0, 128], sizes = [2, 16], strides = [1, 1]} : vector<2x256xf32> to vector<2x16xf32>
    %110 = vector.extract_strided_slice %96 {offsets = [0, 144], sizes = [2, 16], strides = [1, 1]} : vector<2x256xf32> to vector<2x16xf32>
    %111 = arith.maximumf %109, %110 : vector<2x16xf32>
    %112 = vector.extract_strided_slice %96 {offsets = [0, 160], sizes = [2, 16], strides = [1, 1]} : vector<2x256xf32> to vector<2x16xf32>
    %113 = vector.extract_strided_slice %96 {offsets = [0, 176], sizes = [2, 16], strides = [1, 1]} : vector<2x256xf32> to vector<2x16xf32>
    %114 = arith.maximumf %112, %113 : vector<2x16xf32>
    %115 = vector.extract_strided_slice %96 {offsets = [0, 192], sizes = [2, 16], strides = [1, 1]} : vector<2x256xf32> to vector<2x16xf32>
    %116 = vector.extract_strided_slice %96 {offsets = [0, 208], sizes = [2, 16], strides = [1, 1]} : vector<2x256xf32> to vector<2x16xf32>
    %117 = arith.maximumf %115, %116 : vector<2x16xf32>
    %118 = vector.extract_strided_slice %96 {offsets = [0, 224], sizes = [2, 16], strides = [1, 1]} : vector<2x256xf32> to vector<2x16xf32>
    %119 = vector.extract_strided_slice %96 {offsets = [0, 240], sizes = [2, 16], strides = [1, 1]} : vector<2x256xf32> to vector<2x16xf32>
    %120 = arith.maximumf %118, %119 : vector<2x16xf32>
    %121 = tpu.concatenate %99, %102, %105, %108, %111, %114, %117, %120 in 1 : vector<2x16xf32>, vector<2x16xf32>, vector<2x16xf32>, vector<2x16xf32>, vector<2x16xf32>, vector<2x16xf32>, vector<2x16xf32>, vector<2x16xf32> -> vector<2x128xf32>
    %c0_35 = arith.constant 0 : index
    %c4_36 = arith.constant 4 : index
    %c32_37 = arith.constant 32 : index
    %122 = vector.load %arg10[%c0_35, %c4_36, %c32_37] : memref<2x12x192xf32, #tpu.memory_space<vmem>>, vector<2x1x128xf32>
    %123 = vector.shape_cast %122 : vector<2x1x128xf32> to vector<2x128xf32>
    %124 = vector.shape_cast %121 : vector<2x128xf32> to vector<2x1x128xf32>
    tpu.vector_store %arg10[%c0_35, %c4_36, %c32_37], %124 {strides = array<i32>} : memref<2x12x192xf32, #tpu.memory_space<vmem>>, vector<2x1x128xf32>,
    %125 = vector.extract_strided_slice %23 {offsets = [0, 6, 0], sizes = [2, 1, 256], strides = [1, 1, 1]} : vector<2x16x256xf32> to vector<2x1x256xf32>
    %126 = vector.shape_cast %125 : vector<2x1x256xf32> to vector<2x256xf32>
    %127 = vector.extract_strided_slice %23 {offsets = [0, 7, 0], sizes = [2, 1, 256], strides = [1, 1, 1]} : vector<2x16x256xf32> to vector<2x1x256xf32>
    %128 = vector.shape_cast %127 : vector<2x1x256xf32> to vector<2x256xf32>
    %129 = arith.maximumf %126, %128 : vector<2x256xf32>
    %130 = vector.extract_strided_slice %129 {offsets = [0, 0], sizes = [2, 16], strides = [1, 1]} : vector<2x256xf32> to vector<2x16xf32>
    %131 = vector.extract_strided_slice %129 {offsets = [0, 16], sizes = [2, 16], strides = [1, 1]} : vector<2x256xf32> to vector<2x16xf32>
    %132 = arith.maximumf %130, %131 : vector<2x16xf32>
    %133 = vector.extract_strided_slice %129 {offsets = [0, 32], sizes = [2, 16], strides = [1, 1]} : vector<2x256xf32> to vector<2x16xf32>
    %134 = vector.extract_strided_slice %129 {offsets = [0, 48], sizes = [2, 16], strides = [1, 1]} : vector<2x256xf32> to vector<2x16xf32>
    %135 = arith.maximumf %133, %134 : vector<2x16xf32>
    %136 = vector.extract_strided_slice %129 {offsets = [0, 64], sizes = [2, 16], strides = [1, 1]} : vector<2x256xf32> to vector<2x16xf32>
    %137 = vector.extract_strided_slice %129 {offsets = [0, 80], sizes = [2, 16], strides = [1, 1]} : vector<2x256xf32> to vector<2x16xf32>
    %138 = arith.maximumf %136, %137 : vector<2x16xf32>
    %139 = vector.extract_strided_slice %129 {offsets = [0, 96], sizes = [2, 16], strides = [1, 1]} : vector<2x256xf32> to vector<2x16xf32>
    %140 = vector.extract_strided_slice %129 {offsets = [0, 112], sizes = [2, 16], strides = [1, 1]} : vector<2x256xf32> to vector<2x16xf32>
    %141 = arith.maximumf %139, %140 : vector<2x16xf32>
    %142 = vector.extract_strided_slice %129 {offsets = [0, 128], sizes = [2, 16], strides = [1, 1]} : vector<2x256xf32> to vector<2x16xf32>
    %143 = vector.extract_strided_slice %129 {offsets = [0, 144], sizes = [2, 16], strides = [1, 1]} : vector<2x256xf32> to vector<2x16xf32>
    %144 = arith.maximumf %142, %143 : vector<2x16xf32>
    %145 = vector.extract_strided_slice %129 {offsets = [0, 160], sizes = [2, 16], strides = [1, 1]} : vector<2x256xf32> to vector<2x16xf32>
    %146 = vector.extract_strided_slice %129 {offsets = [0, 176], sizes = [2, 16], strides = [1, 1]} : vector<2x256xf32> to vector<2x16xf32>
    %147 = arith.maximumf %145, %146 : vector<2x16xf32>
    %148 = vector.extract_strided_slice %129 {offsets = [0, 192], sizes = [2, 16], strides = [1, 1]} : vector<2x256xf32> to vector<2x16xf32>
    %149 = vector.extract_strided_slice %129 {offsets = [0, 208], sizes = [2, 16], strides = [1, 1]} : vector<2x256xf32> to vector<2x16xf32>
    %150 = arith.maximumf %148, %149 : vector<2x16xf32>
    %151 = vector.extract_strided_slice %129 {offsets = [0, 224], sizes = [2, 16], strides = [1, 1]} : vector<2x256xf32> to vector<2x16xf32>
    %152 = vector.extract_strided_slice %129 {offsets = [0, 240], sizes = [2, 16], strides = [1, 1]} : vector<2x256xf32> to vector<2x16xf32>
    %153 = arith.maximumf %151, %152 : vector<2x16xf32>
    %154 = tpu.concatenate %132, %135, %138, %141, %144, %147, %150, %153 in 1 : vector<2x16xf32>, vector<2x16xf32>, vector<2x16xf32>, vector<2x16xf32>, vector<2x16xf32>, vector<2x16xf32>, vector<2x16xf32>, vector<2x16xf32> -> vector<2x128xf32>
    %c0_38 = arith.constant 0 : index
    %c5 = arith.constant 5 : index
    %c32_39 = arith.constant 32 : index
    %155 = vector.load %arg10[%c0_38, %c5, %c32_39] : memref<2x12x192xf32, #tpu.memory_space<vmem>>, vector<2x1x128xf32>
    %156 = vector.shape_cast %155 : vector<2x1x128xf32> to vector<2x128xf32>
    %157 = vector.shape_cast %154 : vector<2x128xf32> to vector<2x1x128xf32>
    tpu.vector_store %arg10[%c0_38, %c5, %c32_39], %157 {strides = array<i32>} : memref<2x12x192xf32, #tpu.memory_space<vmem>>, vector<2x1x128xf32>,
    %158 = vector.extract_strided_slice %23 {offsets = [0, 8, 0], sizes = [2, 1, 256], strides = [1, 1, 1]} : vector<2x16x256xf32> to vector<2x1x256xf32>
    %159 = vector.shape_cast %158 : vector<2x1x256xf32> to vector<2x256xf32>
    %160 = vector.extract_strided_slice %23 {offsets = [0, 9, 0], sizes = [2, 1, 256], strides = [1, 1, 1]} : vector<2x16x256xf32> to vector<2x1x256xf32>
    %161 = vector.shape_cast %160 : vector<2x1x256xf32> to vector<2x256xf32>
    %162 = arith.maximumf %159, %161 : vector<2x256xf32>
    %163 = vector.extract_strided_slice %162 {offsets = [0, 0], sizes = [2, 16], strides = [1, 1]} : vector<2x256xf32> to vector<2x16xf32>
    %164 = vector.extract_strided_slice %162 {offsets = [0, 16], sizes = [2, 16], strides = [1, 1]} : vector<2x256xf32> to vector<2x16xf32>
    %165 = arith.maximumf %163, %164 : vector<2x16xf32>
    %166 = vector.extract_strided_slice %162 {offsets = [0, 32], sizes = [2, 16], strides = [1, 1]} : vector<2x256xf32> to vector<2x16xf32>
    %167 = vector.extract_strided_slice %162 {offsets = [0, 48], sizes = [2, 16], strides = [1, 1]} : vector<2x256xf32> to vector<2x16xf32>
    %168 = arith.maximumf %166, %167 : vector<2x16xf32>
    %169 = vector.extract_strided_slice %162 {offsets = [0, 64], sizes = [2, 16], strides = [1, 1]} : vector<2x256xf32> to vector<2x16xf32>
    %170 = vector.extract_strided_slice %162 {offsets = [0, 80], sizes = [2, 16], strides = [1, 1]} : vector<2x256xf32> to vector<2x16xf32>
    %171 = arith.maximumf %169, %170 : vector<2x16xf32>
    %172 = vector.extract_strided_slice %162 {offsets = [0, 96], sizes = [2, 16], strides = [1, 1]} : vector<2x256xf32> to vector<2x16xf32>
    %173 = vector.extract_strided_slice %162 {offsets = [0, 112], sizes = [2, 16], strides = [1, 1]} : vector<2x256xf32> to vector<2x16xf32>
    %174 = arith.maximumf %172, %173 : vector<2x16xf32>
    %175 = vector.extract_strided_slice %162 {offsets = [0, 128], sizes = [2, 16], strides = [1, 1]} : vector<2x256xf32> to vector<2x16xf32>
    %176 = vector.extract_strided_slice %162 {offsets = [0, 144], sizes = [2, 16], strides = [1, 1]} : vector<2x256xf32> to vector<2x16xf32>
    %177 = arith.maximumf %175, %176 : vector<2x16xf32>
    %178 = vector.extract_strided_slice %162 {offsets = [0, 160], sizes = [2, 16], strides = [1, 1]} : vector<2x256xf32> to vector<2x16xf32>
    %179 = vector.extract_strided_slice %162 {offsets = [0, 176], sizes = [2, 16], strides = [1, 1]} : vector<2x256xf32> to vector<2x16xf32>
    %180 = arith.maximumf %178, %179 : vector<2x16xf32>
    %181 = vector.extract_strided_slice %162 {offsets = [0, 192], sizes = [2, 16], strides = [1, 1]} : vector<2x256xf32> to vector<2x16xf32>
    %182 = vector.extract_strided_slice %162 {offsets = [0, 208], sizes = [2, 16], strides = [1, 1]} : vector<2x256xf32> to vector<2x16xf32>
    %183 = arith.maximumf %181, %182 : vector<2x16xf32>
    %184 = vector.extract_strided_slice %162 {offsets = [0, 224], sizes = [2, 16], strides = [1, 1]} : vector<2x256xf32> to vector<2x16xf32>
    %185 = vector.extract_strided_slice %162 {offsets = [0, 240], sizes = [2, 16], strides = [1, 1]} : vector<2x256xf32> to vector<2x16xf32>
    %186 = arith.maximumf %184, %185 : vector<2x16xf32>
    %187 = tpu.concatenate %165, %168, %171, %174, %177, %180, %183, %186 in 1 : vector<2x16xf32>, vector<2x16xf32>, vector<2x16xf32>, vector<2x16xf32>, vector<2x16xf32>, vector<2x16xf32>, vector<2x16xf32>, vector<2x16xf32> -> vector<2x128xf32>
    %c0_40 = arith.constant 0 : index
    %c6 = arith.constant 6 : index
    %c32_41 = arith.constant 32 : index
    %188 = vector.load %arg10[%c0_40, %c6, %c32_41] : memref<2x12x192xf32, #tpu.memory_space<vmem>>, vector<2x1x128xf32>
    %189 = vector.shape_cast %188 : vector<2x1x128xf32> to vector<2x128xf32>
    %190 = vector.shape_cast %187 : vector<2x128xf32> to vector<2x1x128xf32>
    tpu.vector_store %arg10[%c0_40, %c6, %c32_41], %190 {strides = array<i32>} : memref<2x12x192xf32, #tpu.memory_space<vmem>>, vector<2x1x128xf32>,
    %191 = vector.extract_strided_slice %23 {offsets = [0, 10, 0], sizes = [2, 1, 256], strides = [1, 1, 1]} : vector<2x16x256xf32> to vector<2x1x256xf32>
    %192 = vector.shape_cast %191 : vector<2x1x256xf32> to vector<2x256xf32>
    %193 = vector.extract_strided_slice %23 {offsets = [0, 11, 0], sizes = [2, 1, 256], strides = [1, 1, 1]} : vector<2x16x256xf32> to vector<2x1x256xf32>
    %194 = vector.shape_cast %193 : vector<2x1x256xf32> to vector<2x256xf32>
    %195 = arith.maximumf %192, %194 : vector<2x256xf32>
    %196 = vector.extract_strided_slice %195 {offsets = [0, 0], sizes = [2, 16], strides = [1, 1]} : vector<2x256xf32> to vector<2x16xf32>
    %197 = vector.extract_strided_slice %195 {offsets = [0, 16], sizes = [2, 16], strides = [1, 1]} : vector<2x256xf32> to vector<2x16xf32>
    %198 = arith.maximumf %196, %197 : vector<2x16xf32>
    %199 = vector.extract_strided_slice %195 {offsets = [0, 32], sizes = [2, 16], strides = [1, 1]} : vector<2x256xf32> to vector<2x16xf32>
    %200 = vector.extract_strided_slice %195 {offsets = [0, 48], sizes = [2, 16], strides = [1, 1]} : vector<2x256xf32> to vector<2x16xf32>
    %201 = arith.maximumf %199, %200 : vector<2x16xf32>
    %202 = vector.extract_strided_slice %195 {offsets = [0, 64], sizes = [2, 16], strides = [1, 1]} : vector<2x256xf32> to vector<2x16xf32>
    %203 = vector.extract_strided_slice %195 {offsets = [0, 80], sizes = [2, 16], strides = [1, 1]} : vector<2x256xf32> to vector<2x16xf32>
    %204 = arith.maximumf %202, %203 : vector<2x16xf32>
    %205 = vector.extract_strided_slice %195 {offsets = [0, 96], sizes = [2, 16], strides = [1, 1]} : vector<2x256xf32> to vector<2x16xf32>
    %206 = vector.extract_strided_slice %195 {offsets = [0, 112], sizes = [2, 16], strides = [1, 1]} : vector<2x256xf32> to vector<2x16xf32>
    %207 = arith.maximumf %205, %206 : vector<2x16xf32>
    %208 = vector.extract_strided_slice %195 {offsets = [0, 128], sizes = [2, 16], strides = [1, 1]} : vector<2x256xf32> to vector<2x16xf32>
    %209 = vector.extract_strided_slice %195 {offsets = [0, 144], sizes = [2, 16], strides = [1, 1]} : vector<2x256xf32> to vector<2x16xf32>
    %210 = arith.maximumf %208, %209 : vector<2x16xf32>
    %211 = vector.extract_strided_slice %195 {offsets = [0, 160], sizes = [2, 16], strides = [1, 1]} : vector<2x256xf32> to vector<2x16xf32>
    %212 = vector.extract_strided_slice %195 {offsets = [0, 176], sizes = [2, 16], strides = [1, 1]} : vector<2x256xf32> to vector<2x16xf32>
    %213 = arith.maximumf %211, %212 : vector<2x16xf32>
    %214 = vector.extract_strided_slice %195 {offsets = [0, 192], sizes = [2, 16], strides = [1, 1]} : vector<2x256xf32> to vector<2x16xf32>
    %215 = vector.extract_strided_slice %195 {offsets = [0, 208], sizes = [2, 16], strides = [1, 1]} : vector<2x256xf32> to vector<2x16xf32>
    %216 = arith.maximumf %214, %215 : vector<2x16xf32>
    %217 = vector.extract_strided_slice %195 {offsets = [0, 224], sizes = [2, 16], strides = [1, 1]} : vector<2x256xf32> to vector<2x16xf32>
    %218 = vector.extract_strided_slice %195 {offsets = [0, 240], sizes = [2, 16], strides = [1, 1]} : vector<2x256xf32> to vector<2x16xf32>
    %219 = arith.maximumf %217, %218 : vector<2x16xf32>
    %220 = tpu.concatenate %198, %201, %204, %207, %210, %213, %216, %219 in 1 : vector<2x16xf32>, vector<2x16xf32>, vector<2x16xf32>, vector<2x16xf32>, vector<2x16xf32>, vector<2x16xf32>, vector<2x16xf32>, vector<2x16xf32> -> vector<2x128xf32>
    %c0_42 = arith.constant 0 : index
    %c7 = arith.constant 7 : index
    %c32_43 = arith.constant 32 : index
    %221 = vector.load %arg10[%c0_42, %c7, %c32_43] : memref<2x12x192xf32, #tpu.memory_space<vmem>>, vector<2x1x128xf32>
    %222 = vector.shape_cast %221 : vector<2x1x128xf32> to vector<2x128xf32>
    %223 = vector.shape_cast %220 : vector<2x128xf32> to vector<2x1x128xf32>
    tpu.vector_store %arg10[%c0_42, %c7, %c32_43], %223 {strides = array<i32>} : memref<2x12x192xf32, #tpu.memory_space<vmem>>, vector<2x1x128xf32>,
    %224 = vector.extract_strided_slice %23 {offsets = [0, 12, 0], sizes = [2, 1, 256], strides = [1, 1, 1]} : vector<2x16x256xf32> to vector<2x1x256xf32>
    %225 = vector.shape_cast %224 : vector<2x1x256xf32> to vector<2x256xf32>
    %226 = vector.extract_strided_slice %23 {offsets = [0, 13, 0], sizes = [2, 1, 256], strides = [1, 1, 1]} : vector<2x16x256xf32> to vector<2x1x256xf32>
    %227 = vector.shape_cast %226 : vector<2x1x256xf32> to vector<2x256xf32>
    %228 = arith.maximumf %225, %227 : vector<2x256xf32>
    %229 = vector.extract_strided_slice %228 {offsets = [0, 0], sizes = [2, 16], strides = [1, 1]} : vector<2x256xf32> to vector<2x16xf32>
    %230 = vector.extract_strided_slice %228 {offsets = [0, 16], sizes = [2, 16], strides = [1, 1]} : vector<2x256xf32> to vector<2x16xf32>
    %231 = arith.maximumf %229, %230 : vector<2x16xf32>
    %232 = vector.extract_strided_slice %228 {offsets = [0, 32], sizes = [2, 16], strides = [1, 1]} : vector<2x256xf32> to vector<2x16xf32>
    %233 = vector.extract_strided_slice %228 {offsets = [0, 48], sizes = [2, 16], strides = [1, 1]} : vector<2x256xf32> to vector<2x16xf32>
    %234 = arith.maximumf %232, %233 : vector<2x16xf32>
    %235 = vector.extract_strided_slice %228 {offsets = [0, 64], sizes = [2, 16], strides = [1, 1]} : vector<2x256xf32> to vector<2x16xf32>
    %236 = vector.extract_strided_slice %228 {offsets = [0, 80], sizes = [2, 16], strides = [1, 1]} : vector<2x256xf32> to vector<2x16xf32>
    %237 = arith.maximumf %235, %236 : vector<2x16xf32>
    %238 = vector.extract_strided_slice %228 {offsets = [0, 96], sizes = [2, 16], strides = [1, 1]} : vector<2x256xf32> to vector<2x16xf32>
    %239 = vector.extract_strided_slice %228 {offsets = [0, 112], sizes = [2, 16], strides = [1, 1]} : vector<2x256xf32> to vector<2x16xf32>
    %240 = arith.maximumf %238, %239 : vector<2x16xf32>
    %241 = vector.extract_strided_slice %228 {offsets = [0, 128], sizes = [2, 16], strides = [1, 1]} : vector<2x256xf32> to vector<2x16xf32>
    %242 = vector.extract_strided_slice %228 {offsets = [0, 144], sizes = [2, 16], strides = [1, 1]} : vector<2x256xf32> to vector<2x16xf32>
    %243 = arith.maximumf %241, %242 : vector<2x16xf32>
    %244 = vector.extract_strided_slice %228 {offsets = [0, 160], sizes = [2, 16], strides = [1, 1]} : vector<2x256xf32> to vector<2x16xf32>
    %245 = vector.extract_strided_slice %228 {offsets = [0, 176], sizes = [2, 16], strides = [1, 1]} : vector<2x256xf32> to vector<2x16xf32>
    %246 = arith.maximumf %244, %245 : vector<2x16xf32>
    %247 = vector.extract_strided_slice %228 {offsets = [0, 192], sizes = [2, 16], strides = [1, 1]} : vector<2x256xf32> to vector<2x16xf32>
    %248 = vector.extract_strided_slice %228 {offsets = [0, 208], sizes = [2, 16], strides = [1, 1]} : vector<2x256xf32> to vector<2x16xf32>
    %249 = arith.maximumf %247, %248 : vector<2x16xf32>
    %250 = vector.extract_strided_slice %228 {offsets = [0, 224], sizes = [2, 16], strides = [1, 1]} : vector<2x256xf32> to vector<2x16xf32>
    %251 = vector.extract_strided_slice %228 {offsets = [0, 240], sizes = [2, 16], strides = [1, 1]} : vector<2x256xf32> to vector<2x16xf32>
    %252 = arith.maximumf %250, %251 : vector<2x16xf32>
    %253 = tpu.concatenate %231, %234, %237, %240, %243, %246, %249, %252 in 1 : vector<2x16xf32>, vector<2x16xf32>, vector<2x16xf32>, vector<2x16xf32>, vector<2x16xf32>, vector<2x16xf32>, vector<2x16xf32>, vector<2x16xf32> -> vector<2x128xf32>
    %c0_44 = arith.constant 0 : index
    %c8 = arith.constant 8 : index
    %c32_45 = arith.constant 32 : index
    %254 = vector.load %arg10[%c0_44, %c8, %c32_45] : memref<2x12x192xf32, #tpu.memory_space<vmem>>, vector<2x1x128xf32>
    %255 = vector.shape_cast %254 : vector<2x1x128xf32> to vector<2x128xf32>
    %256 = vector.shape_cast %253 : vector<2x128xf32> to vector<2x1x128xf32>
    tpu.vector_store %arg10[%c0_44, %c8, %c32_45], %256 {strides = array<i32>} : memref<2x12x192xf32, #tpu.memory_space<vmem>>, vector<2x1x128xf32>,
    %257 = vector.extract_strided_slice %23 {offsets = [0, 14, 0], sizes = [2, 1, 256], strides = [1, 1, 1]} : vector<2x16x256xf32> to vector<2x1x256xf32>
    %258 = vector.shape_cast %257 : vector<2x1x256xf32> to vector<2x256xf32>
    %259 = vector.extract_strided_slice %23 {offsets = [0, 15, 0], sizes = [2, 1, 256], strides = [1, 1, 1]} : vector<2x16x256xf32> to vector<2x1x256xf32>
    %260 = vector.shape_cast %259 : vector<2x1x256xf32> to vector<2x256xf32>
    %261 = arith.maximumf %258, %260 : vector<2x256xf32>
    %262 = vector.extract_strided_slice %261 {offsets = [0, 0], sizes = [2, 16], strides = [1, 1]} : vector<2x256xf32> to vector<2x16xf32>
    %263 = vector.extract_strided_slice %261 {offsets = [0, 16], sizes = [2, 16], strides = [1, 1]} : vector<2x256xf32> to vector<2x16xf32>
    %264 = arith.maximumf %262, %263 : vector<2x16xf32>
    %265 = vector.extract_strided_slice %261 {offsets = [0, 32], sizes = [2, 16], strides = [1, 1]} : vector<2x256xf32> to vector<2x16xf32>
    %266 = vector.extract_strided_slice %261 {offsets = [0, 48], sizes = [2, 16], strides = [1, 1]} : vector<2x256xf32> to vector<2x16xf32>
    %267 = arith.maximumf %265, %266 : vector<2x16xf32>
    %268 = vector.extract_strided_slice %261 {offsets = [0, 64], sizes = [2, 16], strides = [1, 1]} : vector<2x256xf32> to vector<2x16xf32>
    %269 = vector.extract_strided_slice %261 {offsets = [0, 80], sizes = [2, 16], strides = [1, 1]} : vector<2x256xf32> to vector<2x16xf32>
    %270 = arith.maximumf %268, %269 : vector<2x16xf32>
    %271 = vector.extract_strided_slice %261 {offsets = [0, 96], sizes = [2, 16], strides = [1, 1]} : vector<2x256xf32> to vector<2x16xf32>
    %272 = vector.extract_strided_slice %261 {offsets = [0, 112], sizes = [2, 16], strides = [1, 1]} : vector<2x256xf32> to vector<2x16xf32>
    %273 = arith.maximumf %271, %272 : vector<2x16xf32>
    %274 = vector.extract_strided_slice %261 {offsets = [0, 128], sizes = [2, 16], strides = [1, 1]} : vector<2x256xf32> to vector<2x16xf32>
    %275 = vector.extract_strided_slice %261 {offsets = [0, 144], sizes = [2, 16], strides = [1, 1]} : vector<2x256xf32> to vector<2x16xf32>
    %276 = arith.maximumf %274, %275 : vector<2x16xf32>
    %277 = vector.extract_strided_slice %261 {offsets = [0, 160], sizes = [2, 16], strides = [1, 1]} : vector<2x256xf32> to vector<2x16xf32>
    %278 = vector.extract_strided_slice %261 {offsets = [0, 176], sizes = [2, 16], strides = [1, 1]} : vector<2x256xf32> to vector<2x16xf32>
    %279 = arith.maximumf %277, %278 : vector<2x16xf32>
    %280 = vector.extract_strided_slice %261 {offsets = [0, 192], sizes = [2, 16], strides = [1, 1]} : vector<2x256xf32> to vector<2x16xf32>
    %281 = vector.extract_strided_slice %261 {offsets = [0, 208], sizes = [2, 16], strides = [1, 1]} : vector<2x256xf32> to vector<2x16xf32>
    %282 = arith.maximumf %280, %281 : vector<2x16xf32>
    %283 = vector.extract_strided_slice %261 {offsets = [0, 224], sizes = [2, 16], strides = [1, 1]} : vector<2x256xf32> to vector<2x16xf32>
    %284 = vector.extract_strided_slice %261 {offsets = [0, 240], sizes = [2, 16], strides = [1, 1]} : vector<2x256xf32> to vector<2x16xf32>
    %285 = arith.maximumf %283, %284 : vector<2x16xf32>
    %286 = tpu.concatenate %264, %267, %270, %273, %276, %279, %282, %285 in 1 : vector<2x16xf32>, vector<2x16xf32>, vector<2x16xf32>, vector<2x16xf32>, vector<2x16xf32>, vector<2x16xf32>, vector<2x16xf32>, vector<2x16xf32> -> vector<2x128xf32>
    %c0_46 = arith.constant 0 : index
    %c9 = arith.constant 9 : index
    %c32_47 = arith.constant 32 : index
    %287 = vector.load %arg10[%c0_46, %c9, %c32_47] : memref<2x12x192xf32, #tpu.memory_space<vmem>>, vector<2x1x128xf32>
    %288 = vector.shape_cast %287 : vector<2x1x128xf32> to vector<2x128xf32>
    %289 = vector.shape_cast %286 : vector<2x128xf32> to vector<2x1x128xf32>
    tpu.vector_store %arg10[%c0_46, %c9, %c32_47], %289 {strides = array<i32>} : memref<2x12x192xf32, #tpu.memory_space<vmem>>, vector<2x1x128xf32>,
    %c0_48 = arith.constant 0 : index
    %c0_49 = arith.constant 0 : index
    %c0_50 = arith.constant 0 : index
    %290 = vector.load %arg10[%c0_48, %c0_49, %c0_50] : memref<2x12x192xf32, #tpu.memory_space<vmem>>, vector<2x8x192xf32>
    %291 = vector.shape_cast %290 : vector<2x8x192xf32> to vector<16x192xf32>
    %c0_51 = arith.constant 0 : index
    %c1_52 = arith.constant 1 : index
    %c0_53 = arith.constant 0 : index
    %292 = vector.load %arg10[%c0_51, %c1_52, %c0_53] : memref<2x12x192xf32, #tpu.memory_space<vmem>>, vector<2x8x192xf32>
    %293 = vector.shape_cast %292 : vector<2x8x192xf32> to vector<16x192xf32>
    %c0_54 = arith.constant 0 : index
    %c2_55 = arith.constant 2 : index
    %c0_56 = arith.constant 0 : index
    %294 = vector.load %arg10[%c0_54, %c2_55, %c0_56] : memref<2x12x192xf32, #tpu.memory_space<vmem>>, vector<2x8x192xf32>
    %295 = vector.shape_cast %294 : vector<2x8x192xf32> to vector<16x192xf32>
    %c0_57 = arith.constant 0 : index
    %c3_58 = arith.constant 3 : index
    %c0_59 = arith.constant 0 : index
    %296 = vector.load %arg10[%c0_57, %c3_58, %c0_59] : memref<2x12x192xf32, #tpu.memory_space<vmem>>, vector<2x8x192xf32>
    %297 = vector.shape_cast %296 : vector<2x8x192xf32> to vector<16x192xf32>
    %c0_60 = arith.constant 0 : index
    %c4_61 = arith.constant 4 : index
    %c0_62 = arith.constant 0 : index
    %298 = vector.load %arg10[%c0_60, %c4_61, %c0_62] : memref<2x12x192xf32, #tpu.memory_space<vmem>>, vector<2x8x192xf32>
    %299 = vector.shape_cast %298 : vector<2x8x192xf32> to vector<16x192xf32>
    %300 = tpu.concatenate %291, %293, %295, %297, %299 in 1 : vector<16x192xf32>, vector<16x192xf32>, vector<16x192xf32>, vector<16x192xf32>, vector<16x192xf32> -> vector<16x960xf32>
    %c0_63 = arith.constant 0 : index
    %c0_64 = arith.constant 0 : index
    %301 = vector.load %arg4[%c0_63, %c0_64] : memref<960x256xf32, #tpu.memory_space<vmem>>, vector<960x256xf32>
    %cst_65 = arith.constant dense<0.000000e+00> : vector<16x256xf32>
    %302 = tpu.matmul %300, %301, %cst_65 {dimension_numbers = #tpu.dot_dimension_numbers<[1], [0], [0], [1], [0, 0, 1, 1], [], []>} : vector<16x960xf32>, vector<960x256xf32>, vector<16x256xf32> -> vector<16x256xf32>
    %c0_66 = arith.constant 0 : index
    %c0_67 = arith.constant 0 : index
    %303 = vector.load %arg5[%c0_66, %c0_67] : memref<1x256xf32, #tpu.memory_space<vmem>>, vector<1x256xf32>
    %304 = vector.broadcast %303 : vector<1x256xf32> to vector<16x256xf32>
    %305 = arith.addf %302, %304 : vector<16x256xf32>
    %cst_68 = arith.constant 0.000000e+00 : f32
    %306 = vector.broadcast %cst_68 : f32 to vector<16x256xf32>
    %307 = arith.maximumf %305, %306 : vector<16x256xf32>
    %308 = vector.shape_cast %307 : vector<16x256xf32> to vector<2x8x256xf32>
    %309 = vector.extract_strided_slice %308 {offsets = [0, 0, 0], sizes = [2, 1, 256], strides = [1, 1, 1]} : vector<2x8x256xf32> to vector<2x1x256xf32>
    %310 = vector.shape_cast %309 : vector<2x1x256xf32> to vector<2x256xf32>
    %311 = vector.extract_strided_slice %308 {offsets = [0, 1, 0], sizes = [2, 1, 256], strides = [1, 1, 1]} : vector<2x8x256xf32> to vector<2x1x256xf32>
    %312 = vector.shape_cast %311 : vector<2x1x256xf32> to vector<2x256xf32>
    %313 = arith.maximumf %310, %312 : vector<2x256xf32>
    %314 = vector.extract_strided_slice %313 {offsets = [0, 0], sizes = [2, 32], strides = [1, 1]} : vector<2x256xf32> to vector<2x32xf32>
    %315 = vector.extract_strided_slice %313 {offsets = [0, 32], sizes = [2, 32], strides = [1, 1]} : vector<2x256xf32> to vector<2x32xf32>
    %316 = arith.maximumf %314, %315 : vector<2x32xf32>
    %317 = vector.extract_strided_slice %313 {offsets = [0, 64], sizes = [2, 32], strides = [1, 1]} : vector<2x256xf32> to vector<2x32xf32>
    %318 = vector.extract_strided_slice %313 {offsets = [0, 96], sizes = [2, 32], strides = [1, 1]} : vector<2x256xf32> to vector<2x32xf32>
    %319 = arith.maximumf %317, %318 : vector<2x32xf32>
    %320 = vector.extract_strided_slice %313 {offsets = [0, 128], sizes = [2, 32], strides = [1, 1]} : vector<2x256xf32> to vector<2x32xf32>
    %321 = vector.extract_strided_slice %313 {offsets = [0, 160], sizes = [2, 32], strides = [1, 1]} : vector<2x256xf32> to vector<2x32xf32>
    %322 = arith.maximumf %320, %321 : vector<2x32xf32>
    %323 = vector.extract_strided_slice %313 {offsets = [0, 192], sizes = [2, 32], strides = [1, 1]} : vector<2x256xf32> to vector<2x32xf32>
    %324 = vector.extract_strided_slice %313 {offsets = [0, 224], sizes = [2, 32], strides = [1, 1]} : vector<2x256xf32> to vector<2x32xf32>
    %325 = arith.maximumf %323, %324 : vector<2x32xf32>
    %326 = vector.extract_strided_slice %308 {offsets = [0, 2, 0], sizes = [2, 1, 256], strides = [1, 1, 1]} : vector<2x8x256xf32> to vector<2x1x256xf32>
    %327 = vector.shape_cast %326 : vector<2x1x256xf32> to vector<2x256xf32>
    %328 = vector.extract_strided_slice %308 {offsets = [0, 3, 0], sizes = [2, 1, 256], strides = [1, 1, 1]} : vector<2x8x256xf32> to vector<2x1x256xf32>
    %329 = vector.shape_cast %328 : vector<2x1x256xf32> to vector<2x256xf32>
    %330 = arith.maximumf %327, %329 : vector<2x256xf32>
    %331 = vector.extract_strided_slice %330 {offsets = [0, 0], sizes = [2, 32], strides = [1, 1]} : vector<2x256xf32> to vector<2x32xf32>
    %332 = vector.extract_strided_slice %330 {offsets = [0, 32], sizes = [2, 32], strides = [1, 1]} : vector<2x256xf32> to vector<2x32xf32>
    %333 = arith.maximumf %331, %332 : vector<2x32xf32>
    %334 = vector.extract_strided_slice %330 {offsets = [0, 64], sizes = [2, 32], strides = [1, 1]} : vector<2x256xf32> to vector<2x32xf32>
    %335 = vector.extract_strided_slice %330 {offsets = [0, 96], sizes = [2, 32], strides = [1, 1]} : vector<2x256xf32> to vector<2x32xf32>
    %336 = arith.maximumf %334, %335 : vector<2x32xf32>
    %337 = vector.extract_strided_slice %330 {offsets = [0, 128], sizes = [2, 32], strides = [1, 1]} : vector<2x256xf32> to vector<2x32xf32>
    %338 = vector.extract_strided_slice %330 {offsets = [0, 160], sizes = [2, 32], strides = [1, 1]} : vector<2x256xf32> to vector<2x32xf32>
    %339 = arith.maximumf %337, %338 : vector<2x32xf32>
    %340 = vector.extract_strided_slice %330 {offsets = [0, 192], sizes = [2, 32], strides = [1, 1]} : vector<2x256xf32> to vector<2x32xf32>
    %341 = vector.extract_strided_slice %330 {offsets = [0, 224], sizes = [2, 32], strides = [1, 1]} : vector<2x256xf32> to vector<2x32xf32>
    %342 = arith.maximumf %340, %341 : vector<2x32xf32>
    %343 = vector.extract_strided_slice %308 {offsets = [0, 4, 0], sizes = [2, 1, 256], strides = [1, 1, 1]} : vector<2x8x256xf32> to vector<2x1x256xf32>
    %344 = vector.shape_cast %343 : vector<2x1x256xf32> to vector<2x256xf32>
    %345 = vector.extract_strided_slice %308 {offsets = [0, 5, 0], sizes = [2, 1, 256], strides = [1, 1, 1]} : vector<2x8x256xf32> to vector<2x1x256xf32>
    %346 = vector.shape_cast %345 : vector<2x1x256xf32> to vector<2x256xf32>
    %347 = arith.maximumf %344, %346 : vector<2x256xf32>
    %348 = vector.extract_strided_slice %347 {offsets = [0, 0], sizes = [2, 32], strides = [1, 1]} : vector<2x256xf32> to vector<2x32xf32>
    %349 = vector.extract_strided_slice %347 {offsets = [0, 32], sizes = [2, 32], strides = [1, 1]} : vector<2x256xf32> to vector<2x32xf32>
    %350 = arith.maximumf %348, %349 : vector<2x32xf32>
    %351 = vector.extract_strided_slice %347 {offsets = [0, 64], sizes = [2, 32], strides = [1, 1]} : vector<2x256xf32> to vector<2x32xf32>
    %352 = vector.extract_strided_slice %347 {offsets = [0, 96], sizes = [2, 32], strides = [1, 1]} : vector<2x256xf32> to vector<2x32xf32>
    %353 = arith.maximumf %351, %352 : vector<2x32xf32>
    %354 = vector.extract_strided_slice %347 {offsets = [0, 128], sizes = [2, 32], strides = [1, 1]} : vector<2x256xf32> to vector<2x32xf32>
    %355 = vector.extract_strided_slice %347 {offsets = [0, 160], sizes = [2, 32], strides = [1, 1]} : vector<2x256xf32> to vector<2x32xf32>
    %356 = arith.maximumf %354, %355 : vector<2x32xf32>
    %357 = vector.extract_strided_slice %347 {offsets = [0, 192], sizes = [2, 32], strides = [1, 1]} : vector<2x256xf32> to vector<2x32xf32>
    %358 = vector.extract_strided_slice %347 {offsets = [0, 224], sizes = [2, 32], strides = [1, 1]} : vector<2x256xf32> to vector<2x32xf32>
    %359 = arith.maximumf %357, %358 : vector<2x32xf32>
    %360 = vector.extract_strided_slice %308 {offsets = [0, 6, 0], sizes = [2, 1, 256], strides = [1, 1, 1]} : vector<2x8x256xf32> to vector<2x1x256xf32>
    %361 = vector.shape_cast %360 : vector<2x1x256xf32> to vector<2x256xf32>
    %362 = vector.extract_strided_slice %308 {offsets = [0, 7, 0], sizes = [2, 1, 256], strides = [1, 1, 1]} : vector<2x8x256xf32> to vector<2x1x256xf32>
    %363 = vector.shape_cast %362 : vector<2x1x256xf32> to vector<2x256xf32>
    %364 = arith.maximumf %361, %363 : vector<2x256xf32>
    %365 = vector.extract_strided_slice %364 {offsets = [0, 0], sizes = [2, 32], strides = [1, 1]} : vector<2x256xf32> to vector<2x32xf32>
    %366 = vector.extract_strided_slice %364 {offsets = [0, 32], sizes = [2, 32], strides = [1, 1]} : vector<2x256xf32> to vector<2x32xf32>
    %367 = arith.maximumf %365, %366 : vector<2x32xf32>
    %368 = vector.extract_strided_slice %364 {offsets = [0, 64], sizes = [2, 32], strides = [1, 1]} : vector<2x256xf32> to vector<2x32xf32>
    %369 = vector.extract_strided_slice %364 {offsets = [0, 96], sizes = [2, 32], strides = [1, 1]} : vector<2x256xf32> to vector<2x32xf32>
    %370 = arith.maximumf %368, %369 : vector<2x32xf32>
    %371 = vector.extract_strided_slice %364 {offsets = [0, 128], sizes = [2, 32], strides = [1, 1]} : vector<2x256xf32> to vector<2x32xf32>
    %372 = vector.extract_strided_slice %364 {offsets = [0, 160], sizes = [2, 32], strides = [1, 1]} : vector<2x256xf32> to vector<2x32xf32>
    %373 = arith.maximumf %371, %372 : vector<2x32xf32>
    %374 = vector.extract_strided_slice %364 {offsets = [0, 192], sizes = [2, 32], strides = [1, 1]} : vector<2x256xf32> to vector<2x32xf32>
    %375 = vector.extract_strided_slice %364 {offsets = [0, 224], sizes = [2, 32], strides = [1, 1]} : vector<2x256xf32> to vector<2x32xf32>
    %376 = arith.maximumf %374, %375 : vector<2x32xf32>
    %377 = tpu.concatenate %316, %319, %322, %325, %333, %336, %339, %342, %350, %353, %356, %359, %367, %370, %373, %376 in 1 : vector<2x32xf32>, vector<2x32xf32>, vector<2x32xf32>, vector<2x32xf32>, vector<2x32xf32>, vector<2x32xf32>, vector<2x32xf32>, vector<2x32xf32>, vector<2x32xf32>, vector<2x32xf32>, vector<2x32xf32>, vector<2x32xf32>, vector<2x32xf32>, vector<2x32xf32>, vector<2x32xf32>, vector<2x32xf32> -> vector<2x512xf32>
    %c0_69 = arith.constant 0 : index
    %c0_70 = arith.constant 0 : index
    %378 = vector.load %arg6[%c0_69, %c0_70] : memref<512x10xf32, #tpu.memory_space<vmem>>, vector<512x10xf32>
    %cst_71 = arith.constant dense<0.000000e+00> : vector<2x10xf32>
    %379 = tpu.matmul %377, %378, %cst_71 {dimension_numbers = #tpu.dot_dimension_numbers<[1], [0], [0], [1], [0, 0, 1, 1], [], []>} : vector<2x512xf32>, vector<512x10xf32>, vector<2x10xf32> -> vector<2x10xf32>
    %c0_72 = arith.constant 0 : index
    %c0_73 = arith.constant 0 : index
    %380 = vector.load %arg7[%c0_72, %c0_73] : memref<1x10xf32, #tpu.memory_space<vmem>>, vector<1x10xf32>
    %381 = vector.broadcast %380 : vector<1x10xf32> to vector<2x10xf32>
    %382 = arith.addf %379, %381 : vector<2x10xf32>
    %c0_74 = arith.constant 0 : index
    %c0_75 = arith.constant 0 : index
    %383 = vector.load %arg8[%c0_74, %c0_75] : memref<2x10xf32, #tpu.memory_space<vmem>>, vector<2x10xf32>
    tpu.vector_store %arg8[%c0_74, %c0_75], %382 {strides = array<i32>} : memref<2x10xf32, #tpu.memory_space<vmem>>, vector<2x10xf32>,
    return
  }
  func.func @transform_0(%arg0: i32) -> (i32, i32, i32, i32) {
    %c0_i32 = arith.constant 0 : i32
    %c0_i32_0 = arith.constant 0 : i32
    %c0_i32_1 = arith.constant 0 : i32
    %c0_i32_2 = arith.constant 0 : i32
    return %arg0, %c0_i32, %c0_i32_0, %c0_i32_1 : i32, i32, i32, i32
  }
  func.func @transform_1(%arg0: i32) -> (i32, i32) {
    %c0_i32 = arith.constant 0 : i32
    %c0_i32_0 = arith.constant 0 : i32
    %c0_i32_1 = arith.constant 0 : i32
    return %c0_i32, %c0_i32_0 : i32, i32
  }
  func.func @transform_2(%arg0: i32) -> (i32, i32) {
    %c0_i32 = arith.constant 0 : i32
    %c0_i32_0 = arith.constant 0 : i32
    %c0_i32_1 = arith.constant 0 : i32
    return %c0_i32, %c0_i32_0 : i32, i32
  }
  func.func @transform_3(%arg0: i32) -> (i32, i32) {
    %c0_i32 = arith.constant 0 : i32
    %c0_i32_0 = arith.constant 0 : i32
    %c0_i32_1 = arith.constant 0 : i32
    return %c0_i32, %c0_i32_0 : i32, i32
  }
  func.func @transform_4(%arg0: i32) -> (i32, i32) {
    %c0_i32 = arith.constant 0 : i32
    %c0_i32_0 = arith.constant 0 : i32
    %c0_i32_1 = arith.constant 0 : i32
    return %c0_i32, %c0_i32_0 : i32, i32
  }
  func.func @transform_5(%arg0: i32) -> (i32, i32) {
    %c0_i32 = arith.constant 0 : i32
    %c0_i32_0 = arith.constant 0 : i32
    %c0_i32_1 = arith.constant 0 : i32
    return %c0_i32, %c0_i32_0 : i32, i32
  }
  func.func @transform_6(%arg0: i32) -> (i32, i32) {
    %c0_i32 = arith.constant 0 : i32
    %c0_i32_0 = arith.constant 0 : i32
    %c0_i32_1 = arith.constant 0 : i32
    return %c0_i32, %c0_i32_0 : i32, i32
  }
  func.func @transform_7(%arg0: i32) -> (i32, i32) {
    %c0_i32 = arith.constant 0 : i32
    %c0_i32_0 = arith.constant 0 : i32
    return %arg0, %c0_i32 : i32, i32
  }
}

</mosaic_0001>

<bundles_post_ra>
// kernel: cnn_forward_pallas.1
= control target key start
LH: loop header
LB: loop body
LE: loop exit
PB: predicated region body
PF: predicated region fallthrough
CT: control target
= control target key end

     0   :  { %12 = vsyncpa [#allocation5], 0  ;;  %s3483_s0 = inlined_call_operand.vmem [shape: f32[2,1,16,16], index: 0, kind: input, shape index: {}]   ;;  %s3484_s1 = inlined_call_operand.vmem [shape: f32[100,256], index: 1, kind: input, shape index: {}]   ;;  %s3485_s2 = inlined_call_operand.vmem [shape: f32[1,256], index: 2, kind: input, shape index: {}]   ;;  %s3486_s3 = inlined_call_operand.hbm [shape: f32[960,256], index: 3, kind: input, shape index: {}]   ;;  %s3487_s4 = inlined_call_operand.vmem [shape: f32[1,256], index: 4, kind: input, shape index: {}]   ;;  %s3488_s5 = inlined_call_operand.vmem [shape: f32[512,10], index: 5, kind: input, shape index: {}]   ;;  %s3489_s6 = inlined_call_operand.vmem [shape: f32[1,10], index: 6, kind: input, shape index: {}]   ;;  %s3490_s7 = inlined_call_operand.hbm [shape: f32[2,10], index: 7, kind: output, shape index: {}]  }
   0x1   :  { %13 = vsyncpa [#allocation6], 0  ;;  %s2639_s24 = smov [#allocation4]   ;;  %s2591_s28 = scalar_lea.hbm %s3486_s3, 30720 }
   0x2   :  { %s25_s25 = sshll.u32 %s2639_s24, 4  ;;  %p2592_p0 = scmp.ne.s32.totalorder %s3486_s3, %s2591_s28  ;;  %s26_s25 = int_to_ptr.vmem [resolvable:$true] %s25_s25 }
   0x3   :  { %p2595_p1 = scmp.lt.u32.totalorder %s2591_s28, %s3486_s3 }
   0x5   :  { %p2597_p2 = pnand %p2595_p1, %p2592_p0 }
   0x7   :  { %2600 = shalt.err (!%p2597_p2)
}
   0x8   :  { %s2601_s10 = scalar_lea.vmem %s26_s25, 30720  ;;  %p2606_p4 = scmp.lt.s32.totalorder %s26_s25, %s26_s25 }
   0x9   :  { %p2602_p3 = scmp.ne.s32.totalorder %s26_s25, %s2601_s10  ;;  %p2607_p5 = scmp.lt.s32.totalorder %s2601_s10, %s2601_s10 }
   0xb   :  { %p2608_p6 = por %p2607_p5, %p2606_p4 }
   0xd   :  { %p2609_p7 = pnand %p2608_p6, %p2602_p3 }
   0xf   :  { %2612 = shalt.err (!%p2609_p7)
}
  0x10   :  { %s2640_s11 = smov 256   ;;  %s2641_s12 = smov 16  }
  0x11   :  { %31 = dma.hbm_to_vmem [thread:$0]  %s3486_s3, 30720, %s26_s25, [#allocation5], %s2640_s11, %s2640_s11, %s2641_s12  }
  0x12   :  { %2635 = dma.done.wait [#allocation5], 30720  }
  0x13   :  { %2636 = vsyncadd [#allocation5], 4294936576  ;;  %vm41_vm0 = vcmask 162816   ;;  %v2642_v0 = vmov 0.0   ;;  %vm44_vm1 = vcmask 158720   ;;  %v49_v1 = vld [vmem:[%s3483_s0] sm:$0xff] }
  0x14   :  { %42 = vst.msk [vmem:[#allocation2] sm:$0xff] %vm41_vm0, %v2642_v0  ;;  %43 = vst.msk [vmem:[#allocation2 + $0x8] sm:$0xff] %vm41_vm0, %v2642_v0  ;;  %299 = vmatprep.mubr.f32.mxu0 %v2642_v0  ;;  %v51_v2 = vld [vmem:[%s3483_s0 + $0x10] sm:$0xff]  ;;  %s2643_s18 = smov 2   ;;  %v50_v3 = vld [vmem:[%s3483_s0 + $0x8] sm:$0xff]  ;;  %vm69_vm2 = vcmask 146448  }
  0x15   :  { %46 = vst.msk [vmem:[#allocation2 + $0x18] sm:$0xff] %vm41_vm0, %v2642_v0  ;;  %47 = vst.msk [vmem:[#allocation2 + $0x20] sm:$0xff] %vm41_vm0, %v2642_v0  ;;  %57 = vrot.lane.b32.xlu0 %v49_v1, %s2643_s18  ;;  %61 = vrot.lane.b32.xlu1 %v51_v2, %s2643_s18  ;;  %v52_v4 = vld [vmem:[%s3483_s0 + $0x18] sm:$0xff]  ;;  %v178_v5 = vld [vmem:[%s3484_s1 + $0x8] sm:$0xff]  ;;  %vm228_vm3 = vcmask 1043456   ;;  %s2644_s27 = smov 40  }
  0x16   :  { %332 = vst [vmem:[#allocation3] sm:$0xff] %v2642_v0  ;;  %335 = vst [vmem:[#allocation3 + $0x10] sm:$0xf] %v2642_v0  ;;  %v180_v6 = vld [vmem:[%s3484_s1 + $0x18] sm:$0xff]  ;;  %v177_v7 = vld [vmem:[%s3484_s1] sm:$0xff]  ;;  %s2645_s28 = smov 20  }
  0x17   :  { %338 = vst [vmem:[#allocation3 + $0x20] sm:$0xff] %v2642_v0  ;;  %340 = vst [vmem:[#allocation3 + $0x30] sm:$0xf] %v2642_v0  ;;  %v2171_v8 = vpack.c.bf16 %v180_v6, %v178_v5  ;;  %v179_v9 = vld [vmem:[%s3484_s1 + $0x10] sm:$0xff]  ;;  %v182_v10 = vld [vmem:[%s3484_s1 + $0x28] sm:$0xff]  ;;  %s2646_s29 = smov 80  }
  0x18   :  { %45 = vst.msk [vmem:[#allocation2 + $0x10] sm:$0xf] %vm44_vm1, %v2642_v0  ;;  %48 = vst.msk [vmem:[#allocation2 + $0x28] sm:$0xf] %vm44_vm1, %v2642_v0  ;;  %v184_v11 = vld [vmem:[%s3484_s1 + $0x38] sm:$0xff]  ;;  %v2173_v12 = vpack.c.bf16 %v179_v9, %v177_v7  ;;  %v181_v14 = vld [vmem:[%s3484_s1 + $0x20] sm:$0xff] }
  0x19   :  { %59 = vrot.lane.b32.xlu0 %v50_v3, %s2643_s18  ;;  %63 = vrot.lane.b32.xlu1 %v52_v4, %s2643_s18  ;;  %v2175_v13 = vpack.c.bf16 %v184_v11, %v182_v10  ;;  %v183_v15 = vld [vmem:[%s3484_s1 + $0x30] sm:$0xff]  ;;  %v186_v16 = vld [vmem:[%s3484_s1 + $0x48] sm:$0xff]  ;;  %vm162_vm4 = vcmask 326656   ;;  %vm167_vm5 = vcmask 490496   ;;  %vm172_vm6 = vcmask 654336   ;;  %s2649_s8 = smov 96  }
  0x1a   :  { %2172 = vmatprep.subr.bf16.mxu0 %v2171_v8  ;;  %v188_v17 = vld [vmem:[%s3484_s1 + $0x58] sm:$0xff]  ;;  %v2177_v18 = vpack.c.bf16 %v183_v15, %v181_v14  ;;  %v185_v20 = vld [vmem:[%s3484_s1 + $0x40] sm:$0xff]  ;;  %v187_v21 = vld [vmem:[%s3484_s1 + $0x50] sm:$0xff]  ;;  %vm215_vm7 = vcmask 818176   ;;  %vm613_vm8 = vcmask 1047559   ;;  %vm539_vm9 = vcmask 1045509  }
  0x1b   :  { %2174 = vmatpush1.bf16.msra.mxu0 %v2173_v12  ;;  %v2179_v19 = vpack.c.bf16 %v188_v17, %v186_v16  ;;  %v190_v22 = vld [vmem:[%s3484_s1 + $0x68] sm:$0xff]  ;;  %v192_v23 = vld [vmem:[%s3484_s1 + $0x78] sm:$0xff]  ;;  %v2181_v24 = vpack.c.bf16 %v187_v21, %v185_v20  ;;  %v189_v26 = vld [vmem:[%s3484_s1 + $0x60] sm:$0xff]  ;;  %vm464_vm10 = vcmask 1043459   ;;  %vm333_vm11 = vcmask 523264   ;;  %s2650_s9 = smov 64  }
  0x1c   :  { %2176 = vmatprep.subr.bf16.mxu0 %v2175_v13  ;;  %v2183_v25 = vpack.c.bf16 %v192_v23, %v190_v22  ;;  %v191_v27 = vld [vmem:[%s3484_s1 + $0x70] sm:$0xff]  ;;  %v194_v28 = vld [vmem:[%s3484_s1 + $0x88] sm:$0xff]  ;;  %v196_v29 = vld [vmem:[%s3484_s1 + $0x98] sm:$0xff]  ;;  %334 = vst.msk [vmem:[#allocation3 + $0x8] sm:$0xff] %vm333_vm11, %v2642_v0  ;;  %vm381_vm12 = vcmask 1041409   ;;  %s2651_s10 = smov 48  }
  0x1d   :  { %v2185_v30 = vpack.c.bf16 %v191_v27, %v189_v26  ;;  %v2187_v31 = vpack.c.bf16 %v196_v29, %v194_v28  ;;  %v193_v32 = vld [vmem:[%s3484_s1 + $0x80] sm:$0xff]  ;;  %v195_v33 = vld [vmem:[%s3484_s1 + $0x90] sm:$0xff]  ;;  %v198_v35 = vld [vmem:[%s3484_s1 + $0xa8] sm:$0xff]  ;;  %339 = vst.msk [vmem:[#allocation3 + $0x28] sm:$0xff] %vm333_vm11, %v2642_v0  ;;  %s2652_s11 = smov 32   ;;  %vm409_vm13 = vcmask 130048  }
  0x1e   :  { %v2189_v34 = vpack.c.bf16 %v195_v33, %v193_v32  ;;  %v200_v36 = vld [vmem:[%s3484_s1 + $0xb8] sm:$0xff]  ;;  %v197_v38 = vld [vmem:[%s3484_s1 + $0xa0] sm:$0xff]  ;;  %v199_v39 = vld [vmem:[%s3484_s1 + $0xb0] sm:$0xff]  ;;  %vm411_vm14 = vcmask 261120   ;;  %vm413_vm15 = vcmask 392192   ;;  %vm419_vm1 = vcmask 916480  }
  0x1f   :  { %2178 = vmatpush1.bf16.msra.mxu0 %v2177_v18  ;;  %v2191_v37 = vpack.c.bf16 %v200_v36, %v198_v35  ;;  %v2193_v40 = vpack.c.bf16 %v199_v39, %v197_v38  ;;  %v202_v43 = vld [vmem:[%s3484_s1 + $0xc8] sm:$0xf]  ;;  %v201_v44 = vld [vmem:[%s3484_s1 + $0xc0] sm:$0xf]  ;;  %s2647_s1 = smov 60   ;;  %v205_v36 = vlaneseq }
  0x20   :  { %2180 = vmatprep.subr.bf16.mxu0 %v2179_v19  ;;  %v203_v39 = vld [vmem:[%s3485_s2] sm:$0x3]  ;;  %s2648_s2 = smov 112  }
  0x23   :  { %2182 = vmatpush1.bf16.msra.mxu0 %v2181_v24 }
  0x24   :  { %2184 = vmatprep.subr.bf16.mxu0 %v2183_v25 }
  0x27   :  { %2186 = vmatpush1.bf16.msra.mxu0 %v2185_v30 }
  0x28   :  { %2188 = vmatprep.subr.bf16.mxu0 %v2187_v31 }
  0x2b   :  { %2190 = vmatpush1.bf16.msra.mxu0 %v2189_v34 }
  0x2c   :  { %2192 = vmatprep.subr.bf16.mxu0 %v2191_v37  ;;  %v2842_v37 = vshrl.u32 %v205_v36, 7 }
  0x2e   :  { %v2845_v38 = vsub.s32 0, %v2842_v37 }
  0x2f   :  { %2194 = vmatpush1.bf16.msra.mxu0 %v2193_v40  ;;  %v211_v40 = vsub.s32 1, %v2842_v37 }
  0x30   :  { %2092 = vmatprep.subr.msk.mxu0 %vm228_vm3, %v202_v43 }
  0x33   :  { %2093 = vmatpush1.msk.msra.mxu0 %vm228_vm3, %v201_v44 }
  0x87   :  { %v58_v41 = vpop.permute.xlu0 %57  ;;  %v62_v42 = vpop.permute.xlu1 %61 }
  0x88   :  { %70 = vst.msk [vmem:[#allocation2 + $0x2] sm:$0xff] %vm69_vm2, %v58_v41  ;;  %72 = vst.msk [vmem:[#allocation2 + $0x1a] sm:$0xff] %vm69_vm2, %v62_v42  ;;  %v208_v41 = vrot.slane %v203_v39, %v2845_v38  ;;  %v212_v42 = vrot.slane %v203_v39, %v211_v40 }
  0x8b   :  { %v60_v45 = vpop.permute.xlu0 %59  ;;  %v64_v46 = vpop.permute.xlu1 %63 }
  0x8c   :  { %71 = vst.msk [vmem:[#allocation2 + $0xa] sm:$0xff] %vm69_vm2, %v60_v45  ;;  %73 = vst.msk [vmem:[#allocation2 + $0x22] sm:$0xff] %vm69_vm2, %v64_v46  ;;  %vm336_vm2 = vcmask 519168  }
  0x8d   :  { %337 = vst.msk [vmem:[#allocation3 + $0x18] sm:$0xf] %vm336_vm2, %v2642_v0  ;;  %341 = vst.msk [vmem:[#allocation3 + $0x38] sm:$0xf] %vm336_vm2, %v2642_v0 }
  0x8f   :  { %v82_v47 = vld [vmem:[#allocation2 + $0x2] sm:$0xff]  ;;  %v84_v55 = vld [vmem:[#allocation2 + $0x1a] sm:$0xff] }
  0x90   :  { %v78_v48 = vld [vmem:[#allocation2 + $0x1] sm:$0xff]  ;;  %114 = vrot.lane.b32.xlu1 %v82_v47, %s2644_s27  ;;  %v80_v56 = vld [vmem:[#allocation2 + $0x19] sm:$0xff] }
  0x91   :  { %98 = vrot.lane.b32.xlu0 %v78_v48, %s2645_s28  ;;  %v74_v2 = vld [vmem:[#allocation2] sm:$0xff]  ;;  %v76_v19 = vld [vmem:[#allocation2 + $0x18] sm:$0xff] }
  0x93   :  { %v90_v49 = vld [vmem:[#allocation2 + $0x4] sm:$0xff]  ;;  %v91_v53 = vld [vmem:[#allocation2 + $0xc] sm:$0xff]  ;;  %v92_v57 = vld [vmem:[#allocation2 + $0x1c] sm:$0xff] }
  0x94   :  { %v86_v50 = vld [vmem:[#allocation2 + $0x3] sm:$0xff]  ;;  %146 = vrot.lane.b32.xlu1 %v90_v49, %s2646_s29  ;;  %v87_v54 = vld [vmem:[#allocation2 + $0xb] sm:$0xff]  ;;  %v88_v58 = vld [vmem:[#allocation2 + $0x1b] sm:$0xff] }
  0x95   :  { %130 = vrot.lane.b32.xlu0 %v86_v50, %s2647_s1  ;;  %v83_v51 = vld [vmem:[#allocation2 + $0xa] sm:$0xff]  ;;  %v85_v59 = vld [vmem:[#allocation2 + $0x22] sm:$0xff] }
  0x96   :  { %v79_v52 = vld [vmem:[#allocation2 + $0x9] sm:$0xff]  ;;  %v81_v60 = vld [vmem:[#allocation2 + $0x21] sm:$0xff] }
  0x97   :  { %v93_v61 = vld [vmem:[#allocation2 + $0x24] sm:$0xff] }
  0x98   :  { %116 = vrot.lane.b32.xlu1 %v83_v51, %s2644_s27  ;;  %v89_v62 = vld [vmem:[#allocation2 + $0x23] sm:$0xff] }
  0x99   :  { %100 = vrot.lane.b32.xlu0 %v79_v52, %s2645_s28  ;;  %v75_v11 = vld [vmem:[#allocation2 + $0x8] sm:$0xff]  ;;  %v77_v28 = vld [vmem:[#allocation2 + $0x20] sm:$0xff] }
  0x9c   :  { %148 = vrot.lane.b32.xlu1 %v91_v53, %s2646_s29 }
  0x9d   :  { %132 = vrot.lane.b32.xlu0 %v87_v54, %s2647_s1 }
  0xa0   :  { %118 = vrot.lane.b32.xlu1 %v84_v55, %s2644_s27 }
  0xa1   :  { %102 = vrot.lane.b32.xlu0 %v80_v56, %s2645_s28 }
  0xa4   :  { %150 = vrot.lane.b32.xlu1 %v92_v57, %s2646_s29 }
  0xa5   :  { %134 = vrot.lane.b32.xlu0 %v88_v58, %s2647_s1 }
  0xa8   :  { %120 = vrot.lane.b32.xlu1 %v85_v59, %s2644_s27 }
  0xa9   :  { %104 = vrot.lane.b32.xlu0 %v81_v60, %s2645_s28 }
  0xac   :  { %152 = vrot.lane.b32.xlu1 %v93_v61, %s2646_s29 }
  0xad   :  { %136 = vrot.lane.b32.xlu0 %v89_v62, %s2647_s1 }
 0x102   :  { %v115_v63 = vpop.permute.xlu1 %114 }
 0x103   :  { %v99_v1 = vpop.permute.xlu0 %98 }
 0x104   :  { %v158_v3 = vsel %vm41_vm0, %v74_v2, %v99_v1 }
 0x105   :  { %v163_v6 = vsel %vm162_vm4, %v158_v3, %v115_v63 }
 0x106   :  { %v147_v4 = vpop.permute.xlu1 %146 }
 0x107   :  { %v131_v5 = vpop.permute.xlu0 %130 }
 0x108   :  { %v168_v7 = vsel %vm167_vm5, %v163_v6, %v131_v5 }
 0x109   :  { %v173_v8 = vsel %vm172_vm6, %v168_v7, %v147_v4 }
 0x10a   :  { %2094 = vmatmul.mubr.msk.f32.vlgmr.msra.gmra.mrb[0].mxu0 %vm215_vm7, %v173_v8  ;;  %v117_v9 = vpop.permute.xlu1 %116 }
 0x10b   :  { %v101_v10 = vpop.permute.xlu0 %100  ;;  %305 = vmatprep.mubr.f32.mxu0 %v2642_v0 }
 0x10c   :  { %v159_v12 = vsel %vm41_vm0, %v75_v11, %v101_v10 }
 0x10d   :  { %v164_v15 = vsel %vm162_vm4, %v159_v12, %v117_v9 }
 0x10e   :  { %v149_v13 = vpop.permute.xlu1 %148 }
 0x10f   :  { %v133_v14 = vpop.permute.xlu0 %132 }
 0x110   :  { %v169_v16 = vsel %vm167_vm5, %v164_v15, %v133_v14 }
 0x111   :  { %v174_v17 = vsel %vm172_vm6, %v169_v16, %v149_v13 }
 0x112   :  { %2095 = vmatmul.mubr.msk.f32.gmra.mrb[2].mxu0 %vm215_vm7, %v174_v17  ;;  %v119_v18 = vpop.permute.xlu1 %118 }
 0x113   :  { %v103_v20 = vpop.permute.xlu0 %102  ;;  %311 = vmatprep.mubr.f32.mxu0 %v2642_v0 }
 0x114   :  { %v160_v21 = vsel %vm41_vm0, %v76_v19, %v103_v20 }
 0x115   :  { %v165_v23 = vsel %vm162_vm4, %v160_v21, %v119_v18 }
 0x116   :  { %v151_v22 = vpop.permute.xlu1 %150 }
 0x117   :  { %v135_v24 = vpop.permute.xlu0 %134 }
 0x118   :  { %v170_v25 = vsel %vm167_vm5, %v165_v23, %v135_v24 }
 0x119   :  { %v175_v26 = vsel %vm172_vm6, %v170_v25, %v151_v22 }
 0x11a   :  { %2096 = vmatmul.mubr.msk.f32.gmra.mrb[4].mxu0 %vm215_vm7, %v175_v26  ;;  %v121_v27 = vpop.permute.xlu1 %120 }
 0x11b   :  { %v105_v29 = vpop.permute.xlu0 %104  ;;  %317 = vmatprep.mubr.f32.mxu0 %v2642_v0 }
 0x11c   :  { %v161_v30 = vsel %vm41_vm0, %v77_v28, %v105_v29  ;;  %vm417_vm0 = vcmask 785408  }
 0x11d   :  { %v166_v32 = vsel %vm162_vm4, %v161_v30, %v121_v27  ;;  %vm458_vm4 = vcmask 1040640  }
 0x11e   :  { %v153_v31 = vpop.permute.xlu1 %152 }
 0x11f   :  { %v137_v33 = vpop.permute.xlu0 %136 }
 0x120   :  { %v171_v34 = vsel %vm167_vm5, %v166_v32, %v137_v33  ;;  %vm460_vm5 = vcmask 253952  }
 0x121   :  { %v176_v35 = vsel %vm172_vm6, %v171_v34, %v153_v31 }
 0x122   :  { %2097 = vmatmul.mubr.msk.f32.gmra.mrb[6].mxu0 %vm215_vm7, %v176_v35  ;;  %vm1074_vm7 = vcmask 1045504  }
 0x1dd   :  { %v301_v43 = vpop.f32.mrb[0].mxu0 }
 0x1de   :  { %v302_v44 = vadd.f32 %v301_v43, %v208_v41  ;;  %v303_v45 = vpop.f32.mrb[1].mxu0 }
 0x1df   :  { %v304_v46 = vadd.f32 %v303_v45, %v212_v42 }
 0x1e0   :  { %v324_v47 = vmax.f32 %v302_v44, 0.0 }
 0x1e1   :  { %v325_v48 = vmax.f32 %v304_v46, 0.0 }
 0x1e2   :  { %v346_v49 = vrot.slane %v324_v47, 1 }
 0x1e3   :  { %v347_v51 = vrot.slane %v325_v48, 1 }
 0x1e4   :  { %v354_v50 = vmax.f32 %v324_v47, %v346_v49 }
 0x1e5   :  { %v307_v52 = vpop.f32.mrb[2].mxu0  ;;  %v2855_v56 = vmax.f32 %v325_v48, %v347_v51 }
 0x1e6   :  { %v308_v53 = vadd.f32 %v307_v52, %v208_v41  ;;  %v309_v54 = vpop.f32.mrb[3].mxu0  ;;  %360 = vrot.lane.b32.xlu1 %v354_v50, %s2648_s2 }
 0x1e7   :  { %v310_v55 = vadd.f32 %v309_v54, %v212_v42 }
 0x1e8   :  { %v326_v57 = vmax.f32 %v308_v53, 0.0 }
 0x1e9   :  { %v327_v58 = vmax.f32 %v310_v55, 0.0 }
 0x1ea   :  { %v693_v59 = vrot.slane %v326_v57, 1  ;;  %370 = vrot.lane.b32.xlu1 %v2855_v56, %s2648_s2 }
 0x1eb   :  { %v694_v60 = vrot.slane %v327_v58, 1 }
 0x1ec   :  { %v2859_v61 = vmax.f32 %v326_v57, %v693_v59 }
 0x1ed   :  { %v2861_v62 = vmax.f32 %v327_v58, %v694_v60  ;;  %v313_v63 = vpop.f32.mrb[4].mxu0 }
 0x1ee   :  { %v314_v1 = vadd.f32 %v313_v63, %v208_v41  ;;  %v315_v2 = vpop.f32.mrb[5].mxu0  ;;  %707 = vrot.lane.b32.xlu0 %v2859_v61, %s2648_s2 }
 0x1ef   :  { %v316_v3 = vadd.f32 %v315_v2, %v212_v42  ;;  %717 = vrot.lane.b32.xlu1 %v2861_v62, %s2648_s2 }
 0x1f0   :  { %v328_v4 = vmax.f32 %v314_v1, 0.0 }
 0x1f1   :  { %v329_v5 = vmax.f32 %v316_v3, 0.0 }
 0x1f2   :  { %v348_v6 = vrot.slane %v328_v4, 1 }
 0x1f3   :  { %v349_v7 = vrot.slane %v329_v5, 1 }
 0x1f4   :  { %v356_v8 = vmax.f32 %v328_v4, %v348_v6 }
 0x1f5   :  { %v357_v9 = vmax.f32 %v329_v5, %v349_v7  ;;  %v319_v10 = vpop.f32.mrb[6].mxu0 }
 0x1f6   :  { %v320_v11 = vadd.f32 %v319_v10, %v208_v41  ;;  %v321_v12 = vpop.f32.mrb[7].mxu0  ;;  %362 = vrot.lane.b32.xlu0 %v356_v8, %s2648_s2 }
 0x1f7   :  { %v322_v13 = vadd.f32 %v321_v12, %v212_v42  ;;  %372 = vrot.lane.b32.xlu1 %v357_v9, %s2648_s2 }
 0x1f8   :  { %v330_v14 = vmax.f32 %v320_v11, 0.0 }
 0x1f9   :  { %v331_v15 = vmax.f32 %v322_v13, 0.0 }
 0x1fa   :  { %v695_v16 = vrot.slane %v330_v14, 1 }
 0x1fb   :  { %v696_v18 = vrot.slane %v331_v15, 1 }
 0x1fc   :  { %v703_v17 = vmax.f32 %v330_v14, %v695_v16 }
 0x1fd   :  { %v2870_v19 = vmax.f32 %v331_v15, %v696_v18 }
 0x1fe   :  { %709 = vrot.lane.b32.xlu0 %v703_v17, %s2648_s2 }
 0x202   :  { %719 = vrot.lane.b32.xlu0 %v2870_v19, %s2648_s2 }
 0x258   :  { %v361_v21 = vpop.permute.xlu1 %360 }
 0x259   :  { %v366_v24 = vmax.f32 %v354_v50, %v361_v21 }
 0x25c   :  { %v371_v26 = vpop.permute.xlu1 %370 }
 0x25d   :  { %v376_v35 = vmax.f32 %v2855_v56, %v371_v26 }
 0x260   :  { %v708_v20 = vpop.permute.xlu0 %707 }
 0x261   :  { %v718_v30 = vpop.permute.xlu1 %717  ;;  %v713_v46 = vmax.f32 %v2859_v61, %v708_v20 }
 0x262   :  { %v723_v53 = vmax.f32 %v2861_v62, %v718_v30 }
 0x268   :  { %v363_v22 = vpop.permute.xlu0 %362 }
 0x269   :  { %v367_v23 = vmax.f32 %v356_v8, %v363_v22  ;;  %v373_v31 = vpop.permute.xlu1 %372 }
 0x26a   :  { %v377_v32 = vmax.f32 %v357_v9, %v373_v31 }
 0x26b   :  { %v380_v25 = vrot.slane %v367_v23, 7 }
 0x26c   :  { %v395_v33 = vrot.slane %v377_v32, 7 }
 0x26d   :  { %v2875_v27 = vsel %vm613_vm8, %v380_v25, %v366_v24  ;;  %v2882_v28 = vsel %vm539_vm9, %v380_v25, %v366_v24  ;;  %v2885_v29 = vsel %vm464_vm10, %v380_v25, %v366_v24  ;;  %v2904_v34 = vsel %vm381_vm12, %v380_v25, %v366_v24 }
 0x26e   :  { %619 = vrot.lane.b32.xlu1 %v2875_v27, %s2649_s8  ;;  %616 = vrot.lane.b32.xlu0 %v2875_v27, %s2648_s2  ;;  %v625_v36 = vsel %vm613_vm8, %v395_v33, %v376_v35  ;;  %v551_v39 = vsel %vm539_vm9, %v395_v33, %v376_v35  ;;  %v476_v41 = vsel %vm464_vm10, %v395_v33, %v376_v35 }
 0x26f   :  { %v396_v44 = vsel %vm381_vm12, %v395_v33, %v376_v35 }
 0x270   :  { %v710_v42 = vpop.permute.xlu0 %709 }
 0x271   :  { %v714_v43 = vmax.f32 %v703_v17, %v710_v42 }
 0x272   :  { %542 = vrot.lane.b32.xlu1 %v2882_v28, %s2648_s2  ;;  %467 = vrot.lane.b32.xlu0 %v2885_v29, %s2648_s2 }
 0x273   :  { %v727_v45 = vrot.slane %v714_v43, 7 }
 0x274   :  { %v720_v50 = vpop.permute.xlu0 %719 }
 0x275   :  { %v2933_v47 = vsel %vm539_vm9, %v727_v45, %v713_v46  ;;  %v2939_v48 = vsel %vm464_vm10, %v727_v45, %v713_v46  ;;  %v2945_v49 = vsel %vm381_vm12, %v727_v45, %v713_v46  ;;  %v724_v51 = vmax.f32 %v2870_v19, %v720_v50 }
 0x276   :  { %470 = vrot.lane.b32.xlu1 %v2885_v29, %s2649_s8  ;;  %622 = vrot.lane.b32.xlu0 %v2875_v27, %s2646_s29  ;;  %v2980_v57 = vsel %vm613_vm8, %v727_v45, %v713_v46  ;;  %v2653_v19 = vmov 1966171168  }
 0x277   :  { %v741_v52 = vrot.slane %v724_v51, 7  ;;  %v423_v20 = vunpack.c.l.s4 %v2653_v19 }
 0x279   :  { %v814_v54 = vsel %vm464_vm10, %v741_v52, %v723_v53  ;;  %v888_v55 = vsel %vm539_vm9, %v741_v52, %v723_v53  ;;  %v742_v56 = vsel %vm381_vm12, %v741_v52, %v723_v53  ;;  %v961_v58 = vsel %vm613_vm8, %v741_v52, %v723_v53 }
 0x27a   :  { %473 = vrot.lane.b32.xlu1 %v2885_v29, %s2646_s29  ;;  %545 = vrot.lane.b32.xlu0 %v2882_v28, %s2649_s8  ;;  %vm1107_vm8 = vcmask 1044480  }
 0x27e   :  { %387 = vrot.lane.b32.xlu1 %v2904_v34, %s2649_s8  ;;  %384 = vrot.lane.b32.xlu0 %v2904_v34, %s2648_s2 }
 0x282   :  { %548 = vrot.lane.b32.xlu0 %v2882_v28, %s2646_s29  ;;  %626 = vrot.lane.b32.xlu1 %v625_v36, %s2650_s9 }
 0x286   :  { %390 = vrot.lane.b32.xlu0 %v2904_v34, %s2646_s29  ;;  %629 = vrot.lane.b32.xlu1 %v625_v36, %s2651_s10 }
 0x28a   :  { %552 = vrot.lane.b32.xlu1 %v551_v39, %s2650_s9  ;;  %477 = vrot.lane.b32.xlu0 %v476_v41, %s2650_s9 }
 0x28e   :  { %480 = vrot.lane.b32.xlu1 %v476_v41, %s2651_s10  ;;  %632 = vrot.lane.b32.xlu0 %v625_v36, %s2652_s11 }
 0x292   :  { %635 = vrot.lane.b32.xlu1 %v625_v36, %s2641_s12  ;;  %555 = vrot.lane.b32.xlu0 %v551_v39, %s2651_s10 }
 0x296   :  { %483 = vrot.lane.b32.xlu0 %v476_v41, %s2652_s11  ;;  %397 = vrot.lane.b32.xlu1 %v396_v44, %s2650_s9 }
 0x29a   :  { %486 = vrot.lane.b32.xlu0 %v476_v41, %s2641_s12  ;;  %558 = vrot.lane.b32.xlu1 %v551_v39, %s2652_s11 }
 0x29e   :  { %879 = vrot.lane.b32.xlu0 %v2933_v47, %s2648_s2  ;;  %400 = vrot.lane.b32.xlu1 %v396_v44, %s2651_s10 }
 0x2a2   :  { %808 = vrot.lane.b32.xlu0 %v2939_v48, %s2649_s8  ;;  %561 = vrot.lane.b32.xlu1 %v551_v39, %s2641_s12 }
 0x2a6   :  { %730 = vrot.lane.b32.xlu0 %v2945_v49, %s2648_s2  ;;  %403 = vrot.lane.b32.xlu1 %v396_v44, %s2652_s11 }
 0x2aa   :  { %885 = vrot.lane.b32.xlu0 %v2933_v47, %s2646_s29  ;;  %805 = vrot.lane.b32.xlu1 %v2939_v48, %s2648_s2 }
 0x2ae   :  { %736 = vrot.lane.b32.xlu0 %v2945_v49, %s2646_s29  ;;  %882 = vrot.lane.b32.xlu1 %v2933_v47, %s2649_s8 }
 0x2b2   :  { %815 = vrot.lane.b32.xlu0 %v814_v54, %s2650_s9  ;;  %811 = vrot.lane.b32.xlu1 %v2939_v48, %s2646_s29 }
 0x2b6   :  { %892 = vrot.lane.b32.xlu0 %v888_v55, %s2651_s10  ;;  %733 = vrot.lane.b32.xlu1 %v2945_v49, %s2649_s8 }
 0x2ba   :  { %743 = vrot.lane.b32.xlu0 %v742_v56, %s2650_s9  ;;  %889 = vrot.lane.b32.xlu1 %v888_v55, %s2650_s9 }
 0x2be   :  { %895 = vrot.lane.b32.xlu0 %v888_v55, %s2652_s11  ;;  %818 = vrot.lane.b32.xlu1 %v814_v54, %s2651_s10 }
 0x2c2   :  { %746 = vrot.lane.b32.xlu0 %v742_v56, %s2651_s10  ;;  %821 = vrot.lane.b32.xlu1 %v814_v54, %s2652_s11 }
 0x2c6   :  { %898 = vrot.lane.b32.xlu0 %v888_v55, %s2641_s12  ;;  %824 = vrot.lane.b32.xlu1 %v814_v54, %s2641_s12 }
 0x2ca   :  { %749 = vrot.lane.b32.xlu0 %v742_v56, %s2652_s11  ;;  %406 = vrot.lane.b32.xlu1 %v396_v44, %s2641_s12 }
 0x2ce   :  { %752 = vrot.lane.b32.xlu0 %v742_v56, %s2641_s12  ;;  %952 = vrot.lane.b32.xlu1 %v2980_v57, %s2648_s2 }
 0x2d2   :  { %955 = vrot.lane.b32.xlu0 %v2980_v57, %s2649_s8  ;;  %958 = vrot.lane.b32.xlu1 %v2980_v57, %s2646_s29 }
 0x2d6   :  { %962 = vrot.lane.b32.xlu0 %v961_v58, %s2650_s9  ;;  %965 = vrot.lane.b32.xlu1 %v961_v58, %s2651_s10 }
 0x2da   :  { %968 = vrot.lane.b32.xlu0 %v961_v58, %s2652_s11  ;;  %971 = vrot.lane.b32.xlu1 %v961_v58, %s2641_s12 }
 0x2e0   :  { %v617_v59 = vpop.permute.xlu0 %616  ;;  %v620_v60 = vpop.permute.xlu1 %619 }
 0x2e1   :  { %v638_v18 = vsel %vm409_vm13, %v2875_v27, %v617_v59 }
 0x2e2   :  { %v639_v21 = vsel %vm411_vm14, %v638_v18, %v620_v60 }
 0x2e4   :  { %v468_v61 = vpop.permute.xlu0 %467  ;;  %v543_v62 = vpop.permute.xlu1 %542 }
 0x2e5   :  { %v564_v2 = vsel %vm409_vm13, %v2882_v28, %v543_v62  ;;  %v424_v28 = vunpack.c.0.s8 %v423_v20  ;;  %v489_v33 = vsel %vm409_vm13, %v2885_v29, %v468_v61 }
 0x2e8   :  { %v623_v63 = vpop.permute.xlu0 %622  ;;  %v471_v1 = vpop.permute.xlu1 %470 }
 0x2e9   :  { %v640_v24 = vsel %vm413_vm15, %v639_v21, %v623_v63  ;;  %v490_v35 = vsel %vm411_vm14, %v489_v33, %v471_v1 }
 0x2ec   :  { %v546_v3 = vpop.permute.xlu0 %545  ;;  %v474_v4 = vpop.permute.xlu1 %473 }
 0x2ed   :  { %v565_v5 = vsel %vm411_vm14, %v564_v2, %v546_v3  ;;  %v491_v42 = vsel %vm413_vm15, %v490_v35, %v474_v4 }
 0x2f0   :  { %v385_v6 = vpop.permute.xlu0 %384  ;;  %v388_v7 = vpop.permute.xlu1 %387 }
 0x2f1   :  { %v410_v8 = vsel %vm409_vm13, %v2904_v34, %v385_v6  ;;  %v3017_v34 = vsub.s32 %v424_v28, %v2842_v37 }
 0x2f2   :  { %v412_v9 = vsel %vm411_vm14, %v410_v8, %v388_v7 }
 0x2f4   :  { %v549_v10 = vpop.permute.xlu0 %548  ;;  %v627_v11 = vpop.permute.xlu1 %626 }
 0x2f5   :  { %v3001_v12 = vsel %vm413_vm15, %v565_v5, %v549_v10  ;;  %v641_v25 = vsel %vm333_vm11, %v640_v24, %v627_v11 }
 0x2f8   :  { %v391_v13 = vpop.permute.xlu0 %390  ;;  %v630_v14 = vpop.permute.xlu1 %629 }
 0x2f9   :  { %v3004_v15 = vsel %vm413_vm15, %v412_v9, %v391_v13  ;;  %v642_v26 = vsel %vm172_vm6, %v641_v25, %v630_v14 }
 0x2fc   :  { %v478_v16 = vpop.permute.xlu0 %477  ;;  %v553_v17 = vpop.permute.xlu1 %552 }
 0x2fd   :  { %v492_v43 = vsel %vm333_vm11, %v491_v42, %v478_v16  ;;  %v567_v20 = vsel %vm333_vm11, %v3001_v12, %v553_v17 }
 0x300   :  { %v633_v22 = vpop.permute.xlu0 %632  ;;  %v481_v23 = vpop.permute.xlu1 %480 }
 0x301   :  { %v643_v30 = vsel %vm417_vm0, %v642_v26, %v633_v22  ;;  %v493_v44 = vsel %vm172_vm6, %v492_v43, %v481_v23 }
 0x304   :  { %v556_v31 = vpop.permute.xlu0 %555  ;;  %v636_v32 = vpop.permute.xlu1 %635 }
 0x305   :  { %v644_v27 = vsel %vm419_vm1, %v643_v30, %v636_v32  ;;  %v568_v22 = vsel %vm172_vm6, %v567_v20, %v556_v31 }
 0x306   :  { %v646_v36 = vcombine.high %v644_v27, %v644_v27 }
 0x308   :  { %v484_v39 = vpop.permute.xlu0 %483  ;;  %v398_v41 = vpop.permute.xlu1 %397  ;;  %v3024_v45 = vrot.slane %v646_v36, %v3017_v34 }
 0x309   :  { %v494_v46 = vsel %vm417_vm0, %v493_v44, %v484_v39  ;;  %v415_v39 = vsel %vm333_vm11, %v3004_v15, %v398_v41 }
 0x30a   :  { %v661_v53 = vrot.slane %v3024_v45, %v3017_v34 }
 0x30c   :  { %v487_v29 = vpop.permute.xlu0 %486  ;;  %v559_v50 = vpop.permute.xlu1 %558  ;;  %v669_v62 = vcombine.high %v661_v53, %v661_v53 }
 0x30d   :  { %v495_v51 = vsel %vm419_vm1, %v494_v46, %v487_v29  ;;  %v569_v25 = vsel %vm417_vm0, %v568_v22, %v559_v50  ;;  %v654_v46 = vcombine.high %v3024_v45, %v3024_v45 }
 0x30e   :  { %v503_v52 = vrot.slane %v495_v51, %v3017_v34  ;;  %v674_v2 = vrot.slane %v669_v62, %v2845_v38 }
 0x30f   :  { %v668_v62 = vrot.slane %v654_v46, %v3017_v34 }
 0x310   :  { %v511_v54 = vrot.slane %v503_v52, %v3017_v34  ;;  %v880_v55 = vpop.permute.xlu0 %879  ;;  %v401_v56 = vpop.permute.xlu1 %400  ;;  %v504_v12 = vcombine.high %v503_v52, %v503_v52 }
 0x311   :  { %v901_v26 = vsel %vm409_vm13, %v2933_v47, %v880_v55  ;;  %v416_v29 = vsel %vm172_vm6, %v415_v39, %v401_v56 }
 0x312   :  { %v519_v58 = vcombine.high %v511_v54, %v511_v54  ;;  %v518_v15 = vrot.slane %v504_v12, %v3017_v34 }
 0x314   :  { %v809_v59 = vpop.permute.xlu0 %808  ;;  %v562_v60 = vpop.permute.xlu1 %561  ;;  %v524_v61 = vrot.slane %v519_v58, %v2845_v38 }
 0x316   :  { %529 = vrot.lane.b32.xlu1 %v524_v61, %s2652_s11 }
 0x318   :  { %v731_v63 = vpop.permute.xlu0 %730  ;;  %v404_v1 = vpop.permute.xlu1 %403 }
 0x319   :  { %v755_v35 = vsel %vm409_vm13, %v2945_v49, %v731_v63  ;;  %v418_v49 = vsel %vm417_vm0, %v416_v29, %v404_v1 }
 0x31a   :  { %679 = vrot.lane.b32.xlu1 %v674_v2, %s2652_s11 }
 0x31c   :  { %v886_v3 = vpop.permute.xlu0 %885  ;;  %v806_v4 = vpop.permute.xlu1 %805 }
 0x31d   :  { %v827_v14 = vsel %vm409_vm13, %v2939_v48, %v806_v4  ;;  %v570_v48 = vsel %vm419_vm1, %v569_v25, %v562_v60 }
 0x31e   :  { %v828_v19 = vsel %vm411_vm14, %v827_v14, %v809_v59  ;;  %v572_v33 = vcombine.high %v570_v48, %v570_v48 }
 0x320   :  { %v737_v5 = vpop.permute.xlu0 %736  ;;  %v883_v6 = vpop.permute.xlu1 %882  ;;  %v3070_v41 = vrot.slane %v572_v33, %v3017_v34 }
 0x321   :  { %v902_v28 = vsel %vm411_vm14, %v901_v26, %v883_v6 }
 0x322   :  { %v903_v36 = vsel %vm413_vm15, %v902_v28, %v886_v3 }
 0x324   :  { %v816_v7 = vpop.permute.xlu0 %815  ;;  %v812_v8 = vpop.permute.xlu1 %811 }
 0x325   :  { %v829_v21 = vsel %vm413_vm15, %v828_v19, %v812_v8 }
 0x326   :  { %v830_v30 = vsel %vm333_vm11, %v829_v21, %v816_v7 }
 0x328   :  { %v893_v9 = vpop.permute.xlu0 %892  ;;  %v734_v10 = vpop.permute.xlu1 %733 }
 0x329   :  { %v756_v42 = vsel %vm411_vm14, %v755_v35, %v734_v10  ;;  %v587_v10 = vrot.slane %v3070_v41, %v3017_v34 }
 0x32a   :  { %v757_v53 = vsel %vm413_vm15, %v756_v42, %v737_v5  ;;  %v520_v5 = vcombine.high %v518_v15, %v518_v15 }
 0x32b   :  { %v598_v21 = vrot.slane %v587_v10, %v2845_v38  ;;  %v1253_v10 = vld [vmem:[#allocation4 + $0x238] sm:$0xff] }
 0x32c   :  { %v744_v11 = vpop.permute.xlu0 %743  ;;  %v890_v13 = vpop.permute.xlu1 %889  ;;  %v528_v0 = vrot.slane %v520_v5, %v2845_v38 }
 0x32d   :  { %v904_v43 = vsel %vm333_vm11, %v903_v36, %v890_v13  ;;  %v758_v55 = vsel %vm333_vm11, %v757_v53, %v744_v11 }
 0x32e   :  { %v905_v54 = vsel %vm172_vm6, %v904_v43, %v893_v9 }
 0x330   :  { %v896_v16 = vpop.permute.xlu0 %895  ;;  %v819_v18 = vpop.permute.xlu1 %818 }
 0x331   :  { %v831_v32 = vsel %vm172_vm6, %v830_v30, %v819_v18  ;;  %v906_v56 = vsel %vm417_vm0, %v905_v54, %v896_v16  ;;  %v670_v16 = vcombine.high %v668_v62, %v668_v62  ;;  %v1249_v62 = vld [vmem:[#allocation4 + $0x218] sm:$0xff] }
 0x334   :  { %v747_v23 = vpop.permute.xlu0 %746  ;;  %v822_v24 = vpop.permute.xlu1 %821 }
 0x335   :  { %v832_v17 = vsel %vm417_vm0, %v831_v32, %v822_v24  ;;  %v759_v60 = vsel %vm172_vm6, %v758_v55, %v747_v23  ;;  %v678_v24 = vrot.slane %v670_v16, %v2845_v38  ;;  %v1187_v16 = vld [vmem:[#allocation4 + $0x28] sm:$0xff] }
 0x338   :  { %v899_v27 = vpop.permute.xlu0 %898  ;;  %v825_v31 = vpop.permute.xlu1 %824 }
 0x339   :  { %v833_v47 = vsel %vm419_vm1, %v832_v17, %v825_v31  ;;  %v907_v61 = vsel %vm419_vm1, %v906_v56, %v899_v27  ;;  %v580_v27 = vcombine.high %v3070_v41, %v3070_v41 }
 0x33a   :  { %v3060_v44 = vrot.slane %v833_v47, %v3017_v34  ;;  %v909_v7 = vcombine.high %v907_v61, %v907_v61  ;;  %v1247_v61 = vld [vmem:[#allocation4 + $0x208] sm:$0xff] }
 0x33b   :  { %v594_v46 = vrot.slane %v580_v27, %v3017_v34  ;;  %v1259_v27 = vld [vmem:[#allocation4 + $0x268] sm:$0xff] }
 0x33c   :  { %v849_v50 = vrot.slane %v3060_v44, %v3017_v34  ;;  %v750_v51 = vpop.permute.xlu0 %749  ;;  %v407_v52 = vpop.permute.xlu1 %406  ;;  %v916_v19 = vrot.slane %v909_v7, %v3017_v34  ;;  %v842_v36 = vcombine.high %v3060_v44, %v3060_v44  ;;  %v1184_v7 = vld [vmem:[#allocation4 + $0x10] sm:$0xff] }
 0x33d   :  { %v420_v45 = vsel %vm419_vm1, %v418_v49, %v407_v52  ;;  %v760_v63 = vsel %vm417_vm0, %v759_v60, %v750_v51  ;;  %v602_v44 = vrot.slane %v594_v46, %v2845_v38  ;;  %v1194_v46 = vld [vmem:[#allocation4 + $0x60] sm:$0xff] }
 0x33e   :  { %v857_v58 = vcombine.high %v849_v50, %v849_v50  ;;  %v428_v59 = vrot.slane %v420_v45, %v3017_v34  ;;  %v924_v28 = vrot.slane %v916_v19, %v3017_v34  ;;  %v856_v49 = vrot.slane %v842_v36, %v3017_v34 }
 0x33f   :  { %v917_v51 = vcombine.high %v916_v19, %v916_v19  ;;  %v1186_v19 = vld [vmem:[#allocation4 + $0x20] sm:$0xff] }
 0x340   :  { %v436_v1 = vrot.slane %v428_v59, %v3017_v34  ;;  %v753_v2 = vpop.permute.xlu0 %752  ;;  %v953_v3 = vpop.permute.xlu1 %952  ;;  %v862_v4 = vrot.slane %v857_v58, %v2845_v38  ;;  %v429_v26 = vcombine.high %v428_v59, %v428_v59  ;;  %v935_v33 = vrot.slane %v924_v28, %v2845_v38  ;;  %v1193_v28 = vld [vmem:[#allocation4 + $0x58] sm:$0xff] }
 0x341   :  { %v761_v6 = vsel %vm419_vm1, %v760_v63, %v753_v2  ;;  %v974_v11 = vsel %vm409_vm13, %v2980_v57, %v953_v3  ;;  %v858_v53 = vcombine.high %v856_v49, %v856_v49  ;;  %v931_v54 = vrot.slane %v917_v51, %v3017_v34  ;;  %v1183_v2 = vld [vmem:[#allocation4 + $0x8] sm:$0xff]  ;;  %v1185_v3 = vld [vmem:[#allocation4 + $0x18] sm:$0xff] }
 0x342   :  { %v769_v8 = vrot.slane %v761_v6, %v3017_v34  ;;  %867 = vrot.lane.b32.xlu1 %v862_v4, %s2652_s11  ;;  %v447_v9 = vrot.slane %v436_v1, %v2845_v38  ;;  %v443_v35 = vrot.slane %v429_v26, %v3017_v34  ;;  %v2259_v63 = vpack.c.bf16 %v1249_v62, %v1247_v61  ;;  %v1248_v1 = vld [vmem:[#allocation4 + $0x210] sm:$0xff]  ;;  %v1182_v6 = vld [vmem:[#allocation4] sm:$0xff]  ;;  %v1263_v49 = vld [vmem:[#allocation4 + $0x288] sm:$0xff] }
 0x343   :  { %v866_v56 = vrot.slane %v858_v53, %v2845_v38  ;;  %v939_v59 = vrot.slane %v931_v54, %v2845_v38  ;;  %v2195_v5 = vpack.c.bf16 %v1185_v3, %v1183_v2  ;;  %v1256_v26 = vld [vmem:[#allocation4 + $0x250] sm:$0xff]  ;;  %v1262_v53 = vld [vmem:[#allocation4 + $0x280] sm:$0xff]  ;;  %v1205_v61 = vld [vmem:[#allocation4 + $0xb8] sm:$0xff] }
 0x344   :  { %v956_v13 = vpop.permute.xlu0 %955  ;;  %452 = vrot.lane.b32.xlu0 %v447_v9, %s2652_s11  ;;  %v959_v14 = vpop.permute.xlu1 %958  ;;  %v777_v20 = vrot.slane %v769_v8, %v3017_v34  ;;  %v770_v42 = vcombine.high %v769_v8, %v769_v8  ;;  %v451_v43 = vrot.slane %v443_v35, %v2845_v38  ;;  %v1251_v8 = vld [vmem:[#allocation4 + $0x228] sm:$0xff]  ;;  %2260 = vmatprep.subr.bf16.mxu1 %v2259_v63  ;;  %v1264_v54 = vld [vmem:[#allocation4 + $0x290] sm:$0xff]  ;;  %v1202_v3 = vld [vmem:[#allocation4 + $0xa0] sm:$0xff] }
 0x345   :  { %v975_v18 = vsel %vm411_vm14, %v974_v11, %v956_v13  ;;  %v2197_v9 = vpack.c.bf16 %v1184_v7, %v1182_v6  ;;  %v1250_v11 = vld [vmem:[#allocation4 + $0x220] sm:$0xff]  ;;  %v1252_v13 = vld [vmem:[#allocation4 + $0x230] sm:$0xff]  ;;  %2196 = vmatprep.subr.bf16.mxu0 %v2195_v5  ;;  %v2277_v62 = vpack.c.bf16 %v1264_v54, %v1262_v53  ;;  %v1271_v6 = vld [vmem:[#allocation4 + $0x2c8] sm:$0xff] }
 0x346   :  { %531 = vrot.lane.b32.xlu1 %v528_v0, %s2652_s11  ;;  %v976_v22 = vsel %vm413_vm15, %v975_v18, %v959_v14  ;;  %v788_v48 = vrot.slane %v777_v20, %v2845_v38  ;;  %v784_v15 = vrot.slane %v770_v42, %v3017_v34  ;;  %v2263_v14 = vpack.c.bf16 %v1253_v10, %v1251_v8  ;;  %v1189_v18 = vld [vmem:[#allocation4 + $0x38] sm:$0xff]  ;;  %v1268_v2 = vld [vmem:[#allocation4 + $0x2b0] sm:$0xff]  ;;  %v1207_v8 = vld [vmem:[#allocation4 + $0xc8] sm:$0xff] }
 0x347   :  { %v2265_v0 = vpack.c.bf16 %v1252_v13, %v1250_v11  ;;  %2198 = vmatpush1.bf16.msra.mxu0 %v2197_v9  ;;  %v2199_v20 = vpack.c.bf16 %v1189_v18, %v1187_v16  ;;  %v1197_v42 = vld [vmem:[#allocation4 + $0x78] sm:$0xff]  ;;  %v1204_v5 = vld [vmem:[#allocation4 + $0xb0] sm:$0xff]  ;;  %v1206_v16 = vld [vmem:[#allocation4 + $0xc0] sm:$0xff] }
 0x348   :  { %v963_v57 = vpop.permute.xlu0 %962  ;;  %603 = vrot.lane.b32.xlu0 %v598_v21, %s2652_s11  ;;  %v966_v23 = vpop.permute.xlu1 %965  ;;  %v792_v55 = vrot.slane %v784_v15, %v2845_v38  ;;  %v1188_v21 = vld [vmem:[#allocation4 + $0x30] sm:$0xff]  ;;  %v1273_v7 = vld [vmem:[#allocation4 + $0x2d8] sm:$0xff]  ;;  %v2217_v11 = vpack.c.bf16 %v1204_v5, %v1202_v3  ;;  %v1218_v54 = vld [vmem:[#allocation4 + $0x120] sm:$0xff] }
 0x349   :  { %v977_v25 = vsel %vm333_vm11, %v976_v22, %v963_v57  ;;  %v1255_v22 = vld [vmem:[#allocation4 + $0x248] sm:$0xff]  ;;  %v1257_v57 = vld [vmem:[#allocation4 + $0x258] sm:$0xff]  ;;  %2200 = vmatprep.subr.bf16.mxu0 %v2199_v20  ;;  %v2283_v13 = vpack.c.bf16 %v1273_v7, %v1271_v6  ;;  %v1284_v53 = vld [vmem:[#allocation4 + $0x330] sm:$0xff] }
 0x34a   :  { %681 = vrot.lane.b32.xlu1 %v678_v24, %s2652_s11  ;;  %v978_v30 = vsel %vm172_vm6, %v977_v25, %v966_v23  ;;  %v2201_v23 = vpack.c.bf16 %v1188_v21, %v1186_v19  ;;  %v2267_v24 = vpack.c.bf16 %v1257_v57, %v1255_v22  ;;  %v1254_v25 = vld [vmem:[#allocation4 + $0x240] sm:$0xff]  ;;  %v1209_v9 = vld [vmem:[#allocation4 + $0xd8] sm:$0xff]  ;;  %v1208_v19 = vld [vmem:[#allocation4 + $0xd0] sm:$0xff]  ;;  %vm1045_vm6 = vcmask 1046528  }
 0x34b   :  { %v2219_v18 = vpack.c.bf16 %v1209_v9, %v1207_v8  ;;  %v1275_v20 = vld [vmem:[#allocation4 + $0x2e8] sm:$0xff]  ;;  %v1277_v21 = vld [vmem:[#allocation4 + $0x2f8] sm:$0xff]  ;;  %v1222_v3 = vld [vmem:[#allocation4 + $0x140] sm:$0xff] }
 0x34c   :  { %v969_v32 = vpop.permute.xlu0 %968  ;;  %793 = vrot.lane.b32.xlu0 %v788_v48, %s2652_s11  ;;  %v972_v12 = vpop.permute.xlu1 %971  ;;  %v1191_v48 = vld [vmem:[#allocation4 + $0x48] sm:$0xff]  ;;  %2202 = vmatpush1.bf16.msra.mxu0 %v2201_v23  ;;  %v1213_v57 = vld [vmem:[#allocation4 + $0xf8] sm:$0xff]  ;;  %v1224_v5 = vld [vmem:[#allocation4 + $0x150] sm:$0xff] }
 0x34d   :  { %v979_v17 = vsel %vm417_vm0, %v978_v30, %v969_v32  ;;  %v1190_v30 = vld [vmem:[#allocation4 + $0x40] sm:$0xff]  ;;  %v1192_v32 = vld [vmem:[#allocation4 + $0x50] sm:$0xff]  ;;  %v1211_v22 = vld [vmem:[#allocation4 + $0xe8] sm:$0xff] }
 0x34e   :  { %v980_v31 = vsel %vm419_vm1, %v979_v17, %v972_v12  ;;  %v2269_v12 = vpack.c.bf16 %v1256_v26, %v1254_v25  ;;  %v2203_v17 = vpack.c.bf16 %v1193_v28, %v1191_v48  ;;  %v2205_v35 = vpack.c.bf16 %v1192_v32, %v1190_v30  ;;  %v1274_v26 = vld [vmem:[#allocation4 + $0x2e0] sm:$0xff]  ;;  %v1276_v48 = vld [vmem:[#allocation4 + $0x2f0] sm:$0xff]  ;;  %v1291_v6 = vld [vmem:[#allocation4 + $0x368] sm:$0xff] }
 0x34f   :  { %v982_v47 = vcombine.high %v980_v31, %v980_v31  ;;  %v1261_v31 = vld [vmem:[#allocation4 + $0x278] sm:$0xff]  ;;  %v2287_v25 = vpack.c.bf16 %v1277_v21, %v1275_v20  ;;  %v1210_v28 = vld [vmem:[#allocation4 + $0xe0] sm:$0xff]  ;;  %v2223_v30 = vpack.c.bf16 %v1213_v57, %v1211_v22  ;;  %v1212_v32 = vld [vmem:[#allocation4 + $0xf0] sm:$0xff] }
 0x350   :  { %940 = vrot.lane.b32.xlu0 %v935_v33, %s2652_s11  ;;  %v1258_v33 = vld [vmem:[#allocation4 + $0x260] sm:$0xff]  ;;  %v2271_v36 = vpack.c.bf16 %v1261_v31, %v1259_v27  ;;  %2204 = vmatprep.subr.bf16.mxu0 %v2203_v17  ;;  %v1281_v17 = vld [vmem:[#allocation4 + $0x318] sm:$0xff]  ;;  %v1215_v27 = vld [vmem:[#allocation4 + $0x108] sm:$0xff] }
 0x351   :  { %v989_v39 = vrot.slane %v982_v47, %v3017_v34  ;;  %v1260_v47 = vld [vmem:[#allocation4 + $0x270] sm:$0xff]  ;;  %2206 = vmatpush1.bf16.msra.mxu0 %v2205_v35  ;;  %v1217_v31 = vld [vmem:[#allocation4 + $0x118] sm:$0xff]  ;;  %v2225_v35 = vpack.c.bf16 %v1212_v32, %v1210_v28  ;;  %v1227_v8 = vld [vmem:[#allocation4 + $0x168] sm:$0xff] }
 0x352   :  { %v2273_v51 = vpack.c.bf16 %v1260_v47, %v1258_v33  ;;  %v2289_v33 = vpack.c.bf16 %v1276_v48, %v1274_v26  ;;  %v1278_v47 = vld [vmem:[#allocation4 + $0x300] sm:$0xff]  ;;  %v1293_v7 = vld [vmem:[#allocation4 + $0x378] sm:$0xff]  ;;  %v1228_v20 = vld [vmem:[#allocation4 + $0x170] sm:$0xff] }
 0x353   :  { %v997_v29 = vrot.slane %v989_v39, %v3017_v34  ;;  %v990_v52 = vcombine.high %v989_v39, %v989_v39  ;;  %v1195_v39 = vld [vmem:[#allocation4 + $0x68] sm:$0xff]  ;;  %v1229_v9 = vld [vmem:[#allocation4 + $0x178] sm:$0xff]  ;;  %v1294_v48 = vld [vmem:[#allocation4 + $0x380] sm:$0xff] }
 0x354   :  { %454 = vrot.lane.b32.xlu0 %v451_v43, %s2652_s11  ;;  %v2207_v43 = vpack.c.bf16 %v1197_v42, %v1195_v39  ;;  %v1280_v39 = vld [vmem:[#allocation4 + $0x310] sm:$0xff]  ;;  %v1214_v42 = vld [vmem:[#allocation4 + $0x100] sm:$0xff]  ;;  %v1295_v21 = vld [vmem:[#allocation4 + $0x388] sm:$0xff] }
 0x355   :  { %v1005_v50 = vcombine.high %v997_v29, %v997_v29  ;;  %v1004_v45 = vrot.slane %v990_v52, %v3017_v34  ;;  %v1246_v34 = vld [vmem:[#allocation4 + $0x200] sm:$0xff]  ;;  %v1196_v29 = vld [vmem:[#allocation4 + $0x70] sm:$0xff]  ;;  %v1199_v52 = vld [vmem:[#allocation4 + $0x88] sm:$0xff] }
 0x356   :  { %v2261_v4 = vpack.c.bf16 %v1248_v1, %v1246_v34  ;;  %v2209_v15 = vpack.c.bf16 %v1196_v29, %v1194_v46  ;;  %2208 = vmatprep.subr.bf16.mxu0 %v2207_v43  ;;  %v1266_v1 = vld [vmem:[#allocation4 + $0x2a0] sm:$0xff]  ;;  %v2227_v43 = vpack.c.bf16 %v1217_v31, %v1215_v27  ;;  %v1216_v46 = vld [vmem:[#allocation4 + $0x110] sm:$0xff]  ;;  %v1283_v29 = vld [vmem:[#allocation4 + $0x328] sm:$0xff] }
 0x357   :  { %v1010_v41 = vrot.slane %v1005_v50, %v2845_v38  ;;  %v1006_v58 = vcombine.high %v1004_v45, %v1004_v45  ;;  %v1265_v50 = vld [vmem:[#allocation4 + $0x298] sm:$0xff]  ;;  %v1198_v45 = vld [vmem:[#allocation4 + $0x80] sm:$0xff]  ;;  %v2281_v10 = vpack.c.bf16 %v1268_v2, %v1266_v1  ;;  %v1288_v2 = vld [vmem:[#allocation4 + $0x350] sm:$0xff] }
 0x358   :  { %605 = vrot.lane.b32.xlu0 %v602_v44, %s2652_s11  ;;  %2262 = vmatpush1.bf16.msra.mxu1 %v2261_v4  ;;  %v1201_v44 = vld [vmem:[#allocation4 + $0x98] sm:$0xff]  ;;  %v1286_v1 = vld [vmem:[#allocation4 + $0x340] sm:$0xff]  ;;  %v1231_v57 = vld [vmem:[#allocation4 + $0x188] sm:$0xff] }
 0x359   :  { %1015 = vrot.lane.b32.xlu1 %v1010_v41, %s2652_s11  ;;  %v1014_v60 = vrot.slane %v1006_v58, %v2845_v38  ;;  %2264 = vmatprep.subr.bf16.mxu1 %v2263_v14  ;;  %v2275_v41 = vpack.c.bf16 %v1265_v50, %v1263_v49  ;;  %v1267_v58 = vld [vmem:[#allocation4 + $0x2a8] sm:$0xff]  ;;  %v1270_v14 = vld [vmem:[#allocation4 + $0x2c0] sm:$0xff]  ;;  %v1285_v49 = vld [vmem:[#allocation4 + $0x338] sm:$0xff] }
 0x35a   :  { %2210 = vmatpush1.bf16.msra.mxu0 %v2209_v15  ;;  %v1219_v50 = vld [vmem:[#allocation4 + $0x128] sm:$0xff]  ;;  %v2295_v15 = vpack.c.bf16 %v1285_v49, %v1283_v29  ;;  %v1297_v22 = vld [vmem:[#allocation4 + $0x398] sm:$0xff]  ;;  %v1296_v28 = vld [vmem:[#allocation4 + $0x390] sm:$0xff] }
 0x35b   :  { %v2307_v26 = vpack.c.bf16 %v1297_v22, %v1295_v21  ;;  %v1301_v27 = vld [vmem:[#allocation4 + $0x3b8] sm:$0xff]  ;;  %v1235_v31 = vld [vmem:[#allocation4 + $0x1a8] sm:$0xff]  ;;  %v1236_v29 = vld [vmem:[#allocation4 + $0x1b0] sm:$0xff] }
 0x35c   :  { %795 = vrot.lane.b32.xlu0 %v792_v55, %s2652_s11  ;;  %2266 = vmatpush1.bf16.msra.mxu1 %v2265_v0  ;;  %v2211_v55 = vpack.c.bf16 %v1201_v44, %v1199_v52  ;;  %v1272_v0 = vld [vmem:[#allocation4 + $0x2d0] sm:$0xff]  ;;  %v2293_v52 = vpack.c.bf16 %v1280_v39, %v1278_v47  ;;  %v2229_v44 = vpack.c.bf16 %v1216_v46, %v1214_v42  ;;  %v1298_v39 = vld [vmem:[#allocation4 + $0x3a0] sm:$0xff]  ;;  %v1303_v49 = vld [vmem:[#allocation4 + $0x3c8] sm:$0xff] }
 0x35d   :  { %869 = vrot.lane.b32.xlu1 %v866_v56, %s2652_s11  ;;  %2268 = vmatprep.subr.bf16.mxu1 %v2267_v24  ;;  %v1200_v56 = vld [vmem:[#allocation4 + $0x90] sm:$0xff]  ;;  %v2285_v23 = vpack.c.bf16 %v1272_v0, %v1270_v14  ;;  %v2221_v24 = vpack.c.bf16 %v1208_v19, %v1206_v16  ;;  %v2303_v14 = vpack.c.bf16 %v1293_v7, %v1291_v6  ;;  %v1290_v0 = vld [vmem:[#allocation4 + $0x360] sm:$0xff] }
 0x35e   :  { %v2213_v34 = vpack.c.bf16 %v1200_v56, %v1198_v45  ;;  %2212 = vmatprep.subr.bf16.mxu0 %v2211_v55  ;;  %v1220_v55 = vld [vmem:[#allocation4 + $0x130] sm:$0xff]  ;;  %v1287_v56 = vld [vmem:[#allocation4 + $0x348] sm:$0xff]  ;;  %v2239_v19 = vpack.c.bf16 %v1229_v9, %v1227_v8 }
 0x35f   :  { %v1292_v16 = vld [vmem:[#allocation4 + $0x370] sm:$0xff]  ;;  %v1243_v9 = vld [vmem:[#allocation4 + $0x1e8] sm:$0xff] }
 0x360   :  { %942 = vrot.lane.b32.xlu0 %v939_v59, %s2652_s11  ;;  %2270 = vmatpush1.bf16.msra.mxu1 %v2269_v12  ;;  %v1269_v59 = vld [vmem:[#allocation4 + $0x2b8] sm:$0xff]  ;;  %v1279_v12 = vld [vmem:[#allocation4 + $0x308] sm:$0xff]  ;;  %v1300_v42 = vld [vmem:[#allocation4 + $0x3b0] sm:$0xff] }
 0x361   :  { %2272 = vmatprep.subr.bf16.mxu1 %v2271_v36  ;;  %v2279_v63 = vpack.c.bf16 %v1269_v59, %v1267_v58  ;;  %2214 = vmatpush1.bf16.msra.mxu0 %v2213_v34  ;;  %v2291_v36 = vpack.c.bf16 %v1281_v17, %v1279_v12  ;;  %v1289_v58 = vld [vmem:[#allocation4 + $0x358] sm:$0xff]  ;;  %v1223_v59 = vld [vmem:[#allocation4 + $0x148] sm:$0xff]  ;;  %v2233_v34 = vpack.c.bf16 %v1220_v55, %v1218_v54  ;;  %v1232_v12 = vld [vmem:[#allocation4 + $0x190] sm:$0xff] }
 0x362   :  { %v1299_v17 = vld [vmem:[#allocation4 + $0x3a8] sm:$0xff]  ;;  %v1304_v54 = vld [vmem:[#allocation4 + $0x3d0] sm:$0xff] }
 0x363   :  { %v2311_v47 = vpack.c.bf16 %v1301_v27, %v1299_v17 }
 0x364   :  { %1017 = vrot.lane.b32.xlu0 %v1014_v60, %s2652_s11  ;;  %v1203_v60 = vld [vmem:[#allocation4 + $0xa8] sm:$0xff]  ;;  %2274 = vmatpush1.bf16.msra.mxu1 %v2273_v51  ;;  %v1221_v51 = vld [vmem:[#allocation4 + $0x138] sm:$0xff] }
 0x365   :  { %2276 = vmatprep.subr.bf16.mxu1 %v2275_v41  ;;  %v2215_v4 = vpack.c.bf16 %v1205_v61, %v1203_v60  ;;  %v1282_v41 = vld [vmem:[#allocation4 + $0x320] sm:$0xff]  ;;  %v2231_v45 = vpack.c.bf16 %v1221_v51, %v1219_v50  ;;  %v1225_v60 = vld [vmem:[#allocation4 + $0x158] sm:$0xff]  ;;  %v1239_v51 = vld [vmem:[#allocation4 + $0x1c8] sm:$0xff] }
 0x366   :  { %v1305_v50 = vld [vmem:[#allocation4 + $0x3d8] sm:$0xff] }
 0x367   :  { %2216 = vmatprep.subr.bf16.mxu0 %v2215_v4  ;;  %v2235_v4 = vpack.c.bf16 %v1225_v60, %v1223_v59  ;;  %v1309_v59 = vld [vmem:[#allocation4 + $0x3f8] sm:$0xff] }
 0x368   :  { %2278 = vmatpush1.bf16.msra.mxu1 %v2277_v62  ;;  %2218 = vmatpush1.bf16.msra.mxu0 %v2217_v11  ;;  %v2297_v62 = vpack.c.bf16 %v1284_v53, %v1282_v41  ;;  %v2301_v11 = vpack.c.bf16 %v1288_v2, %v1286_v1  ;;  %v2315_v41 = vpack.c.bf16 %v1305_v50, %v1303_v49  ;;  %v1302_v53 = vld [vmem:[#allocation4 + $0x3c0] sm:$0xff] }
 0x369   :  { %2280 = vmatprep.subr.bf16.mxu1 %v2279_v63  ;;  %2220 = vmatprep.subr.bf16.mxu0 %v2219_v18  ;;  %v2299_v63 = vpack.c.bf16 %v1289_v58, %v1287_v56  ;;  %v1226_v18 = vld [vmem:[#allocation4 + $0x160] sm:$0xff]  ;;  %v1240_v56 = vld [vmem:[#allocation4 + $0x1d0] sm:$0xff]  ;;  %v1307_v58 = vld [vmem:[#allocation4 + $0x3e8] sm:$0xff]  ;;  %v2317_v60 = vpack.c.bf16 %v1304_v54, %v1302_v53 }
 0x36c   :  { %2282 = vmatpush1.bf16.msra.mxu1 %v2281_v10  ;;  %2222 = vmatpush1.bf16.msra.mxu0 %v2221_v24  ;;  %v2305_v24 = vpack.c.bf16 %v1292_v16, %v1290_v0  ;;  %v1311_v0 = vld [vmem:[#allocation4 + $0x408] sm:$0xff]  ;;  %v1313_v16 = vld [vmem:[#allocation4 + $0x418] sm:$0xff] }
 0x36d   :  { %2284 = vmatprep.subr.bf16.mxu1 %v2283_v13  ;;  %2224 = vmatprep.subr.bf16.mxu0 %v2223_v30  ;;  %v2237_v13 = vpack.c.bf16 %v1224_v5, %v1222_v3  ;;  %v1230_v30 = vld [vmem:[#allocation4 + $0x180] sm:$0xff] }
 0x370   :  { %2286 = vmatpush1.bf16.msra.mxu1 %v2285_v23  ;;  %2226 = vmatpush1.bf16.msra.mxu0 %v2225_v35  ;;  %v1233_v23 = vld [vmem:[#allocation4 + $0x198] sm:$0xff]  ;;  %v2309_v35 = vpack.c.bf16 %v1296_v28, %v1294_v48 }
 0x371   :  { %2288 = vmatprep.subr.bf16.mxu1 %v2287_v25  ;;  %2228 = vmatprep.subr.bf16.mxu0 %v2227_v43  ;;  %v2241_v25 = vpack.c.bf16 %v1228_v20, %v1226_v18  ;;  %v2243_v32 = vpack.c.bf16 %v1233_v23, %v1231_v57  ;;  %v1234_v43 = vld [vmem:[#allocation4 + $0x1a0] sm:$0xff] }
 0x374   :  { %2290 = vmatpush1.bf16.msra.mxu1 %v2289_v33  ;;  %2230 = vmatpush1.bf16.msra.mxu0 %v2229_v44  ;;  %v1237_v33 = vld [vmem:[#allocation4 + $0x1b8] sm:$0xff]  ;;  %v2313_v44 = vpack.c.bf16 %v1300_v42, %v1298_v39 }
 0x375   :  { %2292 = vmatprep.subr.bf16.mxu1 %v2291_v36  ;;  %2232 = vmatprep.subr.bf16.mxu0 %v2231_v45  ;;  %v2245_v36 = vpack.c.bf16 %v1232_v12, %v1230_v30  ;;  %v2247_v46 = vpack.c.bf16 %v1237_v33, %v1235_v31  ;;  %v1238_v45 = vld [vmem:[#allocation4 + $0x1c0] sm:$0xff] }
 0x378   :  { %2294 = vmatpush1.bf16.msra.mxu1 %v2293_v52  ;;  %2234 = vmatpush1.bf16.msra.mxu0 %v2233_v34  ;;  %v1241_v52 = vld [vmem:[#allocation4 + $0x1d8] sm:$0xff]  ;;  %v1306_v34 = vld [vmem:[#allocation4 + $0x3e0] sm:$0xff] }
 0x379   :  { %2296 = vmatprep.subr.bf16.mxu1 %v2295_v15  ;;  %2236 = vmatprep.subr.bf16.mxu0 %v2235_v4  ;;  %v2249_v15 = vpack.c.bf16 %v1236_v29, %v1234_v43  ;;  %v2251_v55 = vpack.c.bf16 %v1241_v52, %v1239_v51 }
 0x37c   :  { %2298 = vmatpush1.bf16.msra.mxu1 %v2297_v62  ;;  %2238 = vmatpush1.bf16.msra.mxu0 %v2237_v13  ;;  %v2319_v62 = vpack.c.bf16 %v1309_v59, %v1307_v58 }
 0x37d   :  { %2300 = vmatprep.subr.bf16.mxu1 %v2299_v63  ;;  %2240 = vmatprep.subr.bf16.mxu0 %v2239_v19  ;;  %v1308_v63 = vld [vmem:[#allocation4 + $0x3f0] sm:$0xff]  ;;  %v2323_v19 = vpack.c.bf16 %v1313_v16, %v1311_v0 }
 0x37e   :  { %v2321_v1 = vpack.c.bf16 %v1308_v63, %v1306_v34  ;;  %v1312_v0 = vld [vmem:[#allocation4 + $0x410] sm:$0xff] }
 0x380   :  { %2302 = vmatpush1.bf16.msra.mxu1 %v2301_v11  ;;  %2242 = vmatpush1.bf16.msra.mxu0 %v2241_v25  ;;  %v1242_v11 = vld [vmem:[#allocation4 + $0x1e0] sm:$0xff] }
 0x381   :  { %2304 = vmatprep.subr.bf16.mxu1 %v2303_v14  ;;  %2244 = vmatprep.subr.bf16.mxu0 %v2243_v32  ;;  %v1244_v14 = vld [vmem:[#allocation4 + $0x1f0] sm:$0xff] }
 0x382   :  { %v2257_v18 = vpack.c.bf16 %v1244_v14, %v1242_v11  ;;  %v1310_v14 = vld [vmem:[#allocation4 + $0x400] sm:$0xff] }
 0x384   :  { %2306 = vmatpush1.bf16.msra.mxu1 %v2305_v24  ;;  %2246 = vmatpush1.bf16.msra.mxu0 %v2245_v36 }
 0x385   :  { %2308 = vmatprep.subr.bf16.mxu1 %v2307_v26  ;;  %2248 = vmatprep.subr.bf16.mxu0 %v2247_v46 }
 0x388   :  { %v530_v61 = vpop.permute.xlu1 %529  ;;  %2310 = vmatpush1.bf16.msra.mxu1 %v2309_v35  ;;  %2250 = vmatpush1.bf16.msra.mxu0 %v2249_v15 }
 0x389   :  { %535 = vst.msk [vmem:[#allocation3 + $0x3] sm:$0x1] %vm458_vm4, %v530_v61  ;;  %2312 = vmatprep.subr.bf16.mxu1 %v2311_v47  ;;  %2252 = vmatprep.subr.bf16.mxu0 %v2251_v55 }
 0x38a   :  { %536 = vst.msk [vmem:[#allocation3 + $0xb] sm:$0x1] %vm460_vm5, %v530_v61  ;;  %v2253_v61 = vpack.c.bf16 %v1240_v56, %v1238_v45 }
 0x38c   :  { %v680_v10 = vpop.permute.xlu1 %679  ;;  %2314 = vmatpush1.bf16.msra.mxu1 %v2313_v44  ;;  %2254 = vmatpush1.bf16.msra.mxu0 %v2253_v61 }
 0x38d   :  { %685 = vst.msk [vmem:[#allocation3 + $0x5] sm:$0x1] %vm458_vm4, %v680_v10  ;;  %2316 = vmatprep.subr.bf16.mxu1 %v2315_v41 }
 0x38e   :  { %686 = vst.msk [vmem:[#allocation3 + $0xd] sm:$0x1] %vm460_vm5, %v680_v10  ;;  %v1245_v10 = vld [vmem:[#allocation4 + $0x1f8] sm:$0xff] }
 0x38f   :  { %v2255_v13 = vpack.c.bf16 %v1245_v10, %v1243_v9 }
 0x390   :  { %2318 = vmatpush1.bf16.msra.mxu1 %v2317_v60 }
 0x391   :  { %2320 = vmatprep.subr.bf16.mxu1 %v2319_v62  ;;  %2256 = vmatprep.subr.bf16.mxu0 %v2255_v13 }
 0x392   :  { %2258 = vmatpush1.bf16.msra.mxu0 %v2257_v18  ;;  %v1315_v18 = vld [vmem:[#allocation4 + $0x428] sm:$0xff] }
 0x394   :  { %2322 = vmatpush1.bf16.msra.mxu1 %v2321_v1 }
 0x395   :  { %2324 = vmatprep.subr.bf16.mxu1 %v2323_v19  ;;  %v1317_v19 = vld [vmem:[#allocation4 + $0x438] sm:$0xff] }
 0x3b4   :  { %v868_v2 = vpop.permute.xlu1 %867 }
 0x3b5   :  { %873 = vst.msk [vmem:[#allocation3 + $0x7] sm:$0x1] %vm458_vm4, %v868_v2 }
 0x3b6   :  { %874 = vst.msk [vmem:[#allocation3 + $0xf] sm:$0x1] %vm460_vm5, %v868_v2  ;;  %v453_v3 = vpop.permute.xlu0 %452 }
 0x3b7   :  { %459 = vst.msk [vmem:[#allocation3 + $0x2] sm:$0x1] %vm458_vm4, %v453_v3 }
 0x3b8   :  { %461 = vst.msk [vmem:[#allocation3 + $0xa] sm:$0x1] %vm460_vm5, %v453_v3  ;;  %v532_v4 = vpop.permute.xlu1 %531 }
 0x3b9   :  { %537 = vst.msk [vmem:[#allocation3 + $0x23] sm:$0x1] %vm458_vm4, %v532_v4 }
 0x3ba   :  { %538 = vst.msk [vmem:[#allocation3 + $0x2b] sm:$0x1] %vm460_vm5, %v532_v4  ;;  %v604_v5 = vpop.permute.xlu0 %603 }
 0x3bb   :  { %609 = vst.msk [vmem:[#allocation3 + $0x4] sm:$0x1] %vm458_vm4, %v604_v5 }
 0x3bc   :  { %610 = vst.msk [vmem:[#allocation3 + $0xc] sm:$0x1] %vm460_vm5, %v604_v5  ;;  %v682_v6 = vpop.permute.xlu1 %681 }
 0x3bd   :  { %687 = vst.msk [vmem:[#allocation3 + $0x25] sm:$0x1] %vm458_vm4, %v682_v6 }
 0x3be   :  { %688 = vst.msk [vmem:[#allocation3 + $0x2d] sm:$0x1] %vm460_vm5, %v682_v6  ;;  %v794_v7 = vpop.permute.xlu0 %793 }
 0x3bf   :  { %799 = vst.msk [vmem:[#allocation3 + $0x6] sm:$0x1] %vm458_vm4, %v794_v7 }
 0x3c0   :  { %800 = vst.msk [vmem:[#allocation3 + $0xe] sm:$0x1] %vm460_vm5, %v794_v7 }
 0x3c2   :  { %v941_v8 = vpop.permute.xlu0 %940 }
 0x3c3   :  { %946 = vst.msk [vmem:[#allocation3 + $0x10] sm:$0x1] %vm458_vm4, %v941_v8 }
 0x3c4   :  { %947 = vst.msk [vmem:[#allocation3 + $0x18] sm:$0x1] %vm460_vm5, %v941_v8 }
 0x3c6   :  { %v455_v20 = vpop.permute.xlu0 %454  ;;  %v1029_v21 = vld [vmem:[#allocation3] sm:$0xfe] }
 0x3c7   :  { %462 = vst.msk [vmem:[#allocation3 + $0x22] sm:$0x1] %vm458_vm4, %v455_v20  ;;  %v1030_v22 = vld [vmem:[#allocation3 + $0x8] sm:$0xfe]  ;;  %v1046_v26 = vrot.slane %v1029_v21, 1 }
 0x3c8   :  { %463 = vst.msk [vmem:[#allocation3 + $0x2a] sm:$0x1] %vm460_vm5, %v455_v20  ;;  %v1049_v28 = vrot.slane %v1030_v22, 1  ;;  %v1058_v33 = vld [vmem:[#allocation3] sm:$0xfc] }
 0x3c9   :  { %v1091_v35 = vld [vmem:[#allocation3] sm:$0xf8]  ;;  %v1092_v47 = vld [vmem:[#allocation3 + $0x8] sm:$0xf8]  ;;  %v1075_v43 = vrot.slane %v1058_v33, 2 }
 0x3ca   :  { %v606_v57 = vpop.permute.xlu0 %605  ;;  %v1031_v23 = vld [vmem:[#allocation3 + $0x10] sm:$0x1]  ;;  %v1108_v49 = vrot.slane %v1091_v35, 3  ;;  %v1111_v51 = vrot.slane %v1092_v47, 3  ;;  %v1318_v47 = vld [vmem:[#allocation4 + $0x440] sm:$0xff] }
 0x3cb   :  { %v1032_v24 = vld [vmem:[#allocation3 + $0x18] sm:$0x1]  ;;  %611 = vst.msk [vmem:[#allocation3 + $0x24] sm:$0x1] %vm458_vm4, %v606_v57  ;;  %v1016_v25 = vpop.permute.xlu1 %1015  ;;  %v1047_v48 = vrot.slane %v1031_v23, 1  ;;  %v2325_v23 = vpack.c.bf16 %v1312_v0, %v1310_v14  ;;  %v1339_v14 = vld [vmem:[#allocation4 + $0x4e8] sm:$0xff] }
 0x3cc   :  { %612 = vst.msk [vmem:[#allocation3 + $0x2c] sm:$0x1] %vm460_vm5, %v606_v57  ;;  %v1050_v30 = vrot.slane %v1032_v24, 1  ;;  %1022 = vst.msk [vmem:[#allocation3 + $0x19] sm:$0x1] %vm460_vm5, %v1016_v25  ;;  %v1341_v0 = vld [vmem:[#allocation4 + $0x4f8] sm:$0xff] }
 0x3cd   :  { %1021 = vst.msk [vmem:[#allocation3 + $0x11] sm:$0x1] %vm458_vm4, %v1016_v25  ;;  %v1048_v32 = vsel %vm1045_vm6, %v1046_v26, %v1047_v48  ;;  %v1026_v25 = vld [vmem:[#allocation3 + $0x8] sm:$0xff]  ;;  %v2327_v26 = vpack.c.bf16 %v1317_v19, %v1315_v18  ;;  %v1314_v48 = vld [vmem:[#allocation4 + $0x420] sm:$0xff]  ;;  %v2351_v18 = vpack.c.bf16 %v1341_v0, %v1339_v14 }
 0x3ce   :  { %v1051_v12 = vsel %vm1045_vm6, %v1049_v28, %v1050_v30  ;;  %v796_v17 = vpop.permute.xlu0 %795  ;;  %v1316_v28 = vld [vmem:[#allocation4 + $0x430] sm:$0xff]  ;;  %v1338_v19 = vld [vmem:[#allocation4 + $0x4e0] sm:$0xff] }
 0x3cf   :  { %v2531_v27 = vpack.i.bf16 %v1051_v12, %v1048_v32  ;;  %801 = vst.msk [vmem:[#allocation3 + $0x26] sm:$0x1] %vm458_vm4, %v796_v17  ;;  %v870_v31 = vpop.permute.xlu1 %869  ;;  %v2329_v35 = vpack.c.bf16 %v1316_v28, %v1314_v48  ;;  %v1349_v48 = vld [vmem:[#allocation4 + $0x538] sm:$0xff] }
 0x3d0   :  { %802 = vst.msk [vmem:[#allocation3 + $0x2e] sm:$0x1] %vm460_vm5, %v796_v17  ;;  %876 = vst.msk [vmem:[#allocation3 + $0x2f] sm:$0x1] %vm460_vm5, %v870_v31  ;;  %v1319_v17 = vld [vmem:[#allocation4 + $0x448] sm:$0xff] }
 0x3d1   :  { %875 = vst.msk [vmem:[#allocation3 + $0x27] sm:$0x1] %vm458_vm4, %v870_v31  ;;  %2532 = vrot.lane.b32.xlu1 %v2531_v27, %s2650_s9  ;;  %v1321_v27 = vld [vmem:[#allocation4 + $0x458] sm:$0xff]  ;;  %v1025_v31 = vld [vmem:[#allocation3] sm:$0xff] }
 0x3d2   :  { %v943_v36 = vpop.permute.xlu0 %942 }
 0x3d3   :  { %948 = vst.msk [vmem:[#allocation3 + $0x30] sm:$0x1] %vm458_vm4, %v943_v36  ;;  %v1094_v29 = vld [vmem:[#allocation3 + $0x18] sm:$0x7] }
 0x3d4   :  { %949 = vst.msk [vmem:[#allocation3 + $0x38] sm:$0x1] %vm460_vm5, %v943_v36  ;;  %v1060_v39 = vld [vmem:[#allocation3 + $0x10] sm:$0x3]  ;;  %v1112_v52 = vrot.slane %v1094_v29, 3  ;;  %v2331_v36 = vpack.c.bf16 %v1321_v27, %v1319_v17  ;;  %v1351_v17 = vld [vmem:[#allocation4 + $0x548] sm:$0xff] }
 0x3d5   :  { %v1093_v42 = vld [vmem:[#allocation3 + $0x10] sm:$0x7]  ;;  %v1076_v46 = vrot.slane %v1060_v39, 2  ;;  %v1353_v27 = vld [vmem:[#allocation4 + $0x558] sm:$0xff] }
 0x3d6   :  { %v1109_v50 = vrot.slane %v1093_v42, 3  ;;  %v1018_v44 = vpop.permute.xlu0 %1017  ;;  %v1113_v53 = vsel %vm1107_vm8, %v1111_v51, %v1112_v52  ;;  %v1320_v39 = vld [vmem:[#allocation4 + $0x450] sm:$0xff]  ;;  %v1323_v42 = vld [vmem:[#allocation4 + $0x468] sm:$0xff]  ;;  %v1329_v52 = vld [vmem:[#allocation4 + $0x498] sm:$0xff] }
 0x3d7   :  { %v1077_v15 = vsel %vm1074_vm7, %v1075_v43, %v1076_v46  ;;  %1023 = vst.msk [vmem:[#allocation3 + $0x31] sm:$0x1] %vm458_vm4, %v1018_v44  ;;  %v1034_v55 = vld [vmem:[#allocation3 + $0x28] sm:$0xfe]  ;;  %v1325_v43 = vld [vmem:[#allocation4 + $0x478] sm:$0xff]  ;;  %v2333_v46 = vpack.c.bf16 %v1320_v39, %v1318_v47 }
 0x3d8   :  { %v1110_v41 = vsel %vm1107_vm8, %v1108_v49, %v1109_v50  ;;  %1024 = vst.msk [vmem:[#allocation3 + $0x39] sm:$0x1] %vm460_vm5, %v1018_v44  ;;  %1579 = vmatprep.mubr.f32.mxu1 %v1077_v15  ;;  %v1033_v45 = vld [vmem:[#allocation3 + $0x20] sm:$0xfe]  ;;  %v1055_v61 = vrot.slane %v1034_v55, 1  ;;  %v2335_v29 = vpack.c.bf16 %v1325_v43, %v1323_v42  ;;  %v1324_v50 = vld [vmem:[#allocation4 + $0x470] sm:$0xff] }
 0x3d9   :  { %v2541_v54 = vpack.i.bf16 %v1113_v53, %v1110_v41  ;;  %v1052_v59 = vrot.slane %v1033_v45, 1  ;;  %v1095_v34 = vld [vmem:[#allocation3 + $0x20] sm:$0xf8]  ;;  %v1096_v63 = vld [vmem:[#allocation3 + $0x28] sm:$0xf8]  ;;  %v1328_v41 = vld [vmem:[#allocation4 + $0x490] sm:$0xff] }
 0x3da   :  { %v1035_v56 = vld [vmem:[#allocation3 + $0x30] sm:$0x1]  ;;  %v1114_v6 = vrot.slane %v1095_v34, 3  ;;  %v1117_v8 = vrot.slane %v1096_v63, 3  ;;  %v1062_v21 = vld [vmem:[#allocation3 + $0x20] sm:$0xfc] }
 0x3db   :  { %2542 = vrot.lane.b32.xlu0 %v2541_v54, %s2650_s9  ;;  %v1036_v58 = vld [vmem:[#allocation3 + $0x38] sm:$0x1]  ;;  %v1053_v60 = vrot.slane %v1035_v56, 1  ;;  %v1081_v12 = vrot.slane %v1062_v21, 2  ;;  %v1322_v49 = vld [vmem:[#allocation4 + $0x460] sm:$0xff]  ;;  %v1327_v51 = vld [vmem:[#allocation4 + $0x488] sm:$0xff] }
 0x3dc   :  { %v1056_v62 = vrot.slane %v1036_v58, 1  ;;  %v2337_v44 = vpack.c.bf16 %v1324_v50, %v1322_v49  ;;  %v1326_v15 = vld [vmem:[#allocation4 + $0x480] sm:$0xff]  ;;  %v2339_v54 = vpack.c.bf16 %v1329_v52, %v1327_v51  ;;  %v1331_v45 = vld [vmem:[#allocation4 + $0x4a8] sm:$0xff]  ;;  %v1333_v55 = vld [vmem:[#allocation4 + $0x4b8] sm:$0xff] }
 0x3dd   :  { %v1054_v1 = vsel %vm1045_vm6, %v1052_v59, %v1053_v60  ;;  %v2341_v58 = vpack.c.bf16 %v1328_v41, %v1326_v15  ;;  %v1028_v34 = vld [vmem:[#allocation3 + $0x28] sm:$0xff]  ;;  %v2343_v63 = vpack.c.bf16 %v1333_v55, %v1331_v45  ;;  %v1357_v39 = vld [vmem:[#allocation4 + $0x578] sm:$0xff]  ;;  %v1360_v15 = vld [vmem:[#allocation4 + $0x590] sm:$0xff] }
 0x3de   :  { %v1057_v2 = vsel %vm1045_vm6, %v1055_v61, %v1056_v62  ;;  %v1097_v4 = vld [vmem:[#allocation3 + $0x30] sm:$0x7]  ;;  %v1343_v21 = vld [vmem:[#allocation4 + $0x508] sm:$0xff]  ;;  %v1361_v50 = vld [vmem:[#allocation4 + $0x598] sm:$0xff] }
 0x3df   :  { %v2536_v3 = vpack.i.bf16 %v1057_v2, %v1054_v1  ;;  %v1098_v5 = vld [vmem:[#allocation3 + $0x38] sm:$0x7]  ;;  %v1115_v7 = vrot.slane %v1097_v4, 3  ;;  %v1064_v16 = vld [vmem:[#allocation3 + $0x30] sm:$0x3]  ;;  %v1330_v1 = vld [vmem:[#allocation4 + $0x4a0] sm:$0xff] }
 0x3e0   :  { %v1118_v9 = vrot.slane %v1098_v5, 3  ;;  %v1082_v24 = vrot.slane %v1064_v16, 2  ;;  %v1332_v2 = vld [vmem:[#allocation4 + $0x4b0] sm:$0xff]  ;;  %v1335_v5 = vld [vmem:[#allocation4 + $0x4c8] sm:$0xff] }
 0x3e1   :  { %2537 = vrot.lane.b32.xlu1 %v2536_v3, %s2650_s9  ;;  %v1116_v10 = vsel %vm1107_vm8, %v1114_v6, %v1115_v7  ;;  %v1337_v6 = vld [vmem:[#allocation4 + $0x4d8] sm:$0xff]  ;;  %v1027_v7 = vld [vmem:[#allocation3 + $0x20] sm:$0xff]  ;;  %v1355_v47 = vld [vmem:[#allocation4 + $0x568] sm:$0xff] }
 0x3e2   :  { %v1119_v11 = vsel %vm1107_vm8, %v1117_v8, %v1118_v9  ;;  %v1083_v33 = vsel %vm1074_vm7, %v1081_v12, %v1082_v24  ;;  %v2345_v9 = vpack.c.bf16 %v1332_v2, %v1330_v1  ;;  %v1342_v24 = vld [vmem:[#allocation4 + $0x500] sm:$0xff]  ;;  %v1348_v12 = vld [vmem:[#allocation4 + $0x530] sm:$0xff]  ;;  %v2367_v43 = vpack.c.bf16 %v1357_v39, %v1355_v47  ;;  %v1359_v49 = vld [vmem:[#allocation4 + $0x588] sm:$0xff] }
 0x3e3   :  { %v2546_v13 = vpack.i.bf16 %v1119_v11, %v1116_v10  ;;  %v2347_v10 = vpack.c.bf16 %v1337_v6, %v1335_v5  ;;  %v1334_v11 = vld [vmem:[#allocation4 + $0x4c0] sm:$0xff]  ;;  %v2371_v52 = vpack.c.bf16 %v1361_v50, %v1359_v49  ;;  %v1363_v41 = vld [vmem:[#allocation4 + $0x5a8] sm:$0xff]  ;;  %v1368_v1 = vld [vmem:[#allocation4 + $0x5d0] sm:$0xff] }
 0x3e4   :  { %v1371_v2 = vld [vmem:[#allocation4 + $0x5e8] sm:$0xff]  ;;  %v1370_v6 = vld [vmem:[#allocation4 + $0x5e0] sm:$0xff] }
 0x3e5   :  { %2547 = vrot.lane.b32.xlu1 %v2546_v13, %s2650_s9  ;;  %v1336_v13 = vld [vmem:[#allocation4 + $0x4d0] sm:$0xff]  ;;  %v1382_v49 = vld [vmem:[#allocation4 + $0x640] sm:$0xff]  ;;  %v1387_v50 = vld [vmem:[#allocation4 + $0x668] sm:$0xff] }
 0x3e6   :  { %v2349_v16 = vpack.c.bf16 %v1336_v13, %v1334_v11  ;;  %v1059_v11 = vld [vmem:[#allocation3 + $0x8] sm:$0xfc] }
 0x443   :  { %v2533_v20 = vpop.permute.xlu1 %2532 }
 0x444   :  { %v2535_v22 = vunpack.i.h.bf16 %v2533_v20  ;;  %v2534_v57 = vunpack.i.l.bf16 %v2533_v20  ;;  %v1340_v20 = vld [vmem:[#allocation4 + $0x4f0] sm:$0xff] }
 0x446   :  { %v1178_v30 = vsel %vm333_vm11, %v1026_v25, %v2534_v57  ;;  %v1158_v32 = vsel %vm333_vm11, %v2534_v57, %v2535_v22  ;;  %v1345_v22 = vld [vmem:[#allocation4 + $0x518] sm:$0xff]  ;;  %v2353_v57 = vpack.c.bf16 %v1340_v20, %v1338_v19  ;;  %v1344_v25 = vld [vmem:[#allocation4 + $0x510] sm:$0xff] }
 0x447   :  { %1502 = vmatprep.mubr.f32.mxu0 %v1178_v30  ;;  %1580 = vmatmul.mubr.f32.vlgmr.msra.gmra.mrb[0].mxu1 %v1158_v32  ;;  %v2357_v28 = vpack.c.bf16 %v1344_v25, %v1342_v24  ;;  %v1346_v32 = vld [vmem:[#allocation4 + $0x520] sm:$0xff]  ;;  %v1376_v19 = vld [vmem:[#allocation4 + $0x610] sm:$0xff]  ;;  %v1065_v20 = vld [vmem:[#allocation3 + $0x38] sm:$0x3] }
 0x448   :  { %2326 = vmatpush1.bf16.msra.mxu1 %v2325_v23  ;;  %1503 = vmatmul.mubr.f32.vlgmr.msra.gmra.mrb[8].mxu0 %v1025_v31  ;;  %v2355_v23 = vpack.c.bf16 %v1345_v22, %v1343_v21  ;;  %v2361_v31 = vpack.c.bf16 %v1348_v12, %v1346_v32  ;;  %v1379_v21 = vld [vmem:[#allocation4 + $0x628] sm:$0xff]  ;;  %v1381_v22 = vld [vmem:[#allocation4 + $0x638] sm:$0xff]  ;;  %v1378_v12 = vld [vmem:[#allocation4 + $0x620] sm:$0xff] }
 0x449   :  { %1585 = vmatprep.mubr.f32.mxu1 %v1083_v33  ;;  %2328 = vmatprep.subr.bf16.mxu1 %v2327_v26  ;;  %v1347_v26 = vld [vmem:[#allocation4 + $0x528] sm:$0xff]  ;;  %v2363_v33 = vpack.c.bf16 %v1353_v27, %v1351_v17  ;;  %v2391_v32 = vpack.c.bf16 %v1381_v22, %v1379_v21  ;;  %v1380_v17 = vld [vmem:[#allocation4 + $0x630] sm:$0xff]  ;;  %v1406_v22 = vld [vmem:[#allocation4 + $0x700] sm:$0xff] }
 0x44a   :  { %v2359_v30 = vpack.c.bf16 %v1349_v48, %v1347_v26  ;;  %v1063_v26 = vld [vmem:[#allocation3 + $0x28] sm:$0xfc]  ;;  %v1123_v48 = vld [vmem:[#allocation3 + $0x18] sm:$0xf] }
 0x44b   :  { %v1084_v47 = vrot.slane %v1063_v26, 2  ;;  %v1140_v39 = vrot.slane %v1123_v48, 4  ;;  %v1410_v48 = vld [vmem:[#allocation4 + $0x720] sm:$0xff] }
 0x44c   :  { %2330 = vmatpush1.bf16.msra.mxu1 %v2329_v35  ;;  %v1350_v35 = vld [vmem:[#allocation4 + $0x540] sm:$0xff] }
 0x44d   :  { %2332 = vmatprep.subr.bf16.mxu1 %v2331_v36  ;;  %v3188_v53 = vpop.permute.xlu0 %2542  ;;  %v1352_v36 = vld [vmem:[#allocation4 + $0x550] sm:$0xff] }
 0x44e   :  { %v2545_v59 = vunpack.i.h.bf16 %v3188_v53  ;;  %v2544_v60 = vunpack.i.l.bf16 %v3188_v53  ;;  %v2365_v42 = vpack.c.bf16 %v1352_v36, %v1350_v35  ;;  %v1385_v35 = vld [vmem:[#allocation4 + $0x658] sm:$0xff]  ;;  %v1384_v53 = vld [vmem:[#allocation4 + $0x650] sm:$0xff] }
 0x450   :  { %2334 = vmatpush1.bf16.msra.mxu1 %v2333_v46  ;;  %v1172_v8 = vsel %vm333_vm11, %v2544_v60, %v2545_v59  ;;  %v1354_v46 = vld [vmem:[#allocation4 + $0x560] sm:$0xff]  ;;  %v1367_v59 = vld [vmem:[#allocation4 + $0x5c8] sm:$0xff] }
 0x451   :  { %2336 = vmatprep.subr.bf16.mxu1 %v2335_v29  ;;  %v1356_v29 = vld [vmem:[#allocation4 + $0x570] sm:$0xff] }
 0x452   :  { %v2369_v51 = vpack.c.bf16 %v1356_v29, %v1354_v46 }
 0x453   :  { %v2538_v56 = vpop.permute.xlu1 %2537 }
 0x454   :  { %v2540_v61 = vunpack.i.h.bf16 %v2538_v56  ;;  %v2539_v62 = vunpack.i.l.bf16 %v2538_v56  ;;  %2338 = vmatpush1.bf16.msra.mxu1 %v2337_v44  ;;  %v1358_v44 = vld [vmem:[#allocation4 + $0x580] sm:$0xff] }
 0x455   :  { %2340 = vmatprep.subr.bf16.mxu1 %v2339_v54  ;;  %v1365_v54 = vld [vmem:[#allocation4 + $0x5b8] sm:$0xff]  ;;  %v2373_v45 = vpack.c.bf16 %v1360_v15, %v1358_v44  ;;  %v1362_v56 = vld [vmem:[#allocation4 + $0x5a0] sm:$0xff]  ;;  %v2397_v44 = vpack.c.bf16 %v1384_v53, %v1382_v49 }
 0x456   :  { %v1179_v3 = vsel %vm333_vm11, %v1028_v34, %v2539_v62  ;;  %v1159_v4 = vsel %vm333_vm11, %v2539_v62, %v2540_v61  ;;  %v2375_v55 = vpack.c.bf16 %v1365_v54, %v1363_v41  ;;  %v1369_v61 = vld [vmem:[#allocation4 + $0x5d8] sm:$0xff]  ;;  %v1386_v41 = vld [vmem:[#allocation4 + $0x660] sm:$0xff]  ;;  %v1388_v54 = vld [vmem:[#allocation4 + $0x670] sm:$0xff] }
 0x457   :  { %1508 = vmatprep.mubr.f32.mxu0 %v1179_v3  ;;  %1586 = vmatmul.mubr.f32.gmra.mrb[2].mxu1 %v1159_v4  ;;  %v2379_v34 = vpack.c.bf16 %v1369_v61, %v1367_v59  ;;  %v1373_v3 = vld [vmem:[#allocation4 + $0x5f8] sm:$0xff]  ;;  %v2548_v13 = vpop.permute.xlu1 %2547  ;;  %v1390_v59 = vld [vmem:[#allocation4 + $0x680] sm:$0xff]  ;;  %v1392_v61 = vld [vmem:[#allocation4 + $0x690] sm:$0xff] }
 0x458   :  { %2342 = vmatpush1.bf16.msra.mxu1 %v2341_v58  ;;  %1509 = vmatmul.mubr.f32.gmra.mrb[10].mxu0 %v1027_v7  ;;  %v1364_v58 = vld [vmem:[#allocation4 + $0x5b0] sm:$0xff]  ;;  %v2383_v5 = vpack.c.bf16 %v1373_v3, %v1371_v2  ;;  %v2549_v24 = vunpack.i.l.bf16 %v2548_v13  ;;  %v1394_v2 = vld [vmem:[#allocation4 + $0x6a0] sm:$0xff] }
 0x459   :  { %1656 = vmatprep.mubr.f32.mxu1 %v1172_v8  ;;  %2344 = vmatprep.subr.bf16.mxu1 %v2343_v63  ;;  %v2377_v62 = vpack.c.bf16 %v1364_v58, %v1362_v56  ;;  %v1366_v63 = vld [vmem:[#allocation4 + $0x5c0] sm:$0xff]  ;;  %v1372_v7 = vld [vmem:[#allocation4 + $0x5f0] sm:$0xff]  ;;  %v1061_v8 = vld [vmem:[#allocation3 + $0x18] sm:$0x3]  ;;  %v2401_v56 = vpack.c.bf16 %v1388_v54, %v1386_v41 }
 0x45a   :  { %v2381_v4 = vpack.c.bf16 %v1368_v1, %v1366_v63  ;;  %v2385_v14 = vpack.c.bf16 %v1372_v7, %v1370_v6  ;;  %v1079_v0 = vrot.slane %v1061_v8, 2  ;;  %v2405_v63 = vpack.c.bf16 %v1392_v61, %v1390_v59  ;;  %v1396_v3 = vld [vmem:[#allocation4 + $0x6b0] sm:$0xff]  ;;  %v1398_v8 = vld [vmem:[#allocation4 + $0x6c0] sm:$0xff] }
 0x45b   :  { %v2409_v6 = vpack.c.bf16 %v1396_v3, %v1394_v2  ;;  %v1120_v49 = vld [vmem:[#allocation3] sm:$0xf0] }
 0x45c   :  { %2346 = vmatpush1.bf16.msra.mxu1 %v2345_v9  ;;  %v1375_v9 = vld [vmem:[#allocation4 + $0x608] sm:$0xff] }
 0x45d   :  { %2348 = vmatprep.subr.bf16.mxu1 %v2347_v10  ;;  %v1377_v10 = vld [vmem:[#allocation4 + $0x618] sm:$0xff] }
 0x460   :  { %2350 = vmatpush1.bf16.msra.mxu1 %v2349_v16  ;;  %v2387_v16 = vpack.c.bf16 %v1377_v10, %v1375_v9  ;;  %v1400_v9 = vld [vmem:[#allocation4 + $0x6d0] sm:$0xff]  ;;  %v1403_v10 = vld [vmem:[#allocation4 + $0x6e8] sm:$0xff] }
 0x461   :  { %2352 = vmatprep.subr.bf16.mxu1 %v2351_v18  ;;  %v1374_v18 = vld [vmem:[#allocation4 + $0x600] sm:$0xff] }
 0x462   :  { %v2389_v25 = vpack.c.bf16 %v1376_v19, %v1374_v18  ;;  %v1407_v18 = vld [vmem:[#allocation4 + $0x708] sm:$0xff]  ;;  %v1409_v19 = vld [vmem:[#allocation4 + $0x718] sm:$0xff] }
 0x463   :  { %v2419_v21 = vpack.c.bf16 %v1409_v19, %v1407_v18 }
 0x464   :  { %2354 = vmatpush1.bf16.msra.mxu1 %v2353_v57  ;;  %v1078_v57 = vrot.slane %v1059_v11, 2  ;;  %v1405_v11 = vld [vmem:[#allocation4 + $0x6f8] sm:$0xff] }
 0x465   :  { %2356 = vmatprep.subr.bf16.mxu1 %v2355_v23  ;;  %v2550_v23 = vunpack.i.h.bf16 %v2548_v13  ;;  %v2413_v13 = vpack.c.bf16 %v1400_v9, %v1398_v8 }
 0x467   :  { %v1173_v36 = vsel %vm333_vm11, %v2549_v24, %v2550_v23  ;;  %v1411_v23 = vld [vmem:[#allocation4 + $0x728] sm:$0xff] }
 0x468   :  { %2358 = vmatpush1.bf16.msra.mxu1 %v2357_v28  ;;  %v1080_v28 = vsel %vm1074_vm7, %v1078_v57, %v1079_v0  ;;  %v1402_v0 = vld [vmem:[#allocation4 + $0x6e0] sm:$0xff]  ;;  %v1408_v57 = vld [vmem:[#allocation4 + $0x710] sm:$0xff] }
 0x469   :  { %2360 = vmatprep.subr.bf16.mxu1 %v2359_v30  ;;  %v1085_v30 = vrot.slane %v1065_v20, 2  ;;  %v1180_v27 = vsel %vm333_vm11, %v1080_v28, %v2544_v60  ;;  %v1412_v28 = vld [vmem:[#allocation4 + $0x730] sm:$0xff] }
 0x46c   :  { %2362 = vmatpush1.bf16.msra.mxu1 %v2361_v31  ;;  %v1121_v31 = vld [vmem:[#allocation3 + $0x8] sm:$0xf0] }
 0x46d   :  { %2364 = vmatprep.subr.bf16.mxu1 %v2363_v33  ;;  %v1383_v33 = vld [vmem:[#allocation4 + $0x648] sm:$0xff]  ;;  %v1139_v46 = vrot.slane %v1121_v31, 4  ;;  %v1416_v31 = vld [vmem:[#allocation4 + $0x750] sm:$0xff] }
 0x46e   :  { %v2395_v29 = vpack.c.bf16 %v1385_v35, %v1383_v33  ;;  %v1419_v33 = vld [vmem:[#allocation4 + $0x768] sm:$0xff]  ;;  %v1421_v35 = vld [vmem:[#allocation4 + $0x778] sm:$0xff] }
 0x470   :  { %2366 = vmatpush1.bf16.msra.mxu1 %v2365_v42  ;;  %v2393_v42 = vpack.c.bf16 %v1380_v17, %v1378_v12  ;;  %v2425_v12 = vpack.c.bf16 %v1412_v28, %v1410_v48  ;;  %v1881_v48 = vld [vmem:[%s3488_s5 + $0x88] sm:$0xff]  ;;  %v1864_v28 = vld [vmem:[%s3488_s5] sm:$0xff] }
 0x471   :  { %2368 = vmatprep.subr.bf16.mxu1 %v2367_v43  ;;  %v1086_v43 = vsel %vm1074_vm7, %v1084_v47, %v1085_v30  ;;  %v1415_v30 = vld [vmem:[#allocation4 + $0x748] sm:$0xff]  ;;  %v2431_v47 = vpack.c.bf16 %v1421_v35, %v1419_v33  ;;  %v1866_v33 = vld [vmem:[%s3488_s5 + $0x10] sm:$0xff] }
 0x472   :  { %v1181_v60 = vsel %vm333_vm11, %v1086_v43, %v2549_v24  ;;  %v1413_v24 = vld [vmem:[#allocation4 + $0x738] sm:$0xff]  ;;  %v1122_v43 = vld [vmem:[#allocation3 + $0x10] sm:$0xf]  ;;  %v1867_v35 = vld [vmem:[%s3488_s5 + $0x18] sm:$0xff] }
 0x473   :  { %v2423_v26 = vpack.c.bf16 %v1413_v24, %v1411_v23  ;;  %v1137_v53 = vrot.slane %v1122_v43, 4  ;;  %v1868_v43 = vld [vmem:[%s3488_s5 + $0x20] sm:$0xff] }
 0x474   :  { %2370 = vmatpush1.bf16.msra.mxu1 %v2369_v51  ;;  %v1389_v51 = vld [vmem:[#allocation4 + $0x678] sm:$0xff] }
 0x475   :  { %2372 = vmatprep.subr.bf16.mxu1 %v2371_v52  ;;  %v1141_v52 = vsel %vm228_vm3, %v1139_v46, %v1140_v39  ;;  %v2399_v15 = vpack.c.bf16 %v1389_v51, %v1387_v50  ;;  %v1418_v39 = vld [vmem:[#allocation4 + $0x760] sm:$0xff]  ;;  %v1126_v51 = vld [vmem:[#allocation3 + $0x30] sm:$0xf] }
 0x476   :  { %v1143_v54 = vrot.slane %v1126_v51, 4  ;;  %v1871_v51 = vld [vmem:[%s3488_s5 + $0x38] sm:$0xff] }
 0x478   :  { %2374 = vmatpush1.bf16.msra.mxu1 %v2373_v45  ;;  %v1391_v45 = vld [vmem:[#allocation4 + $0x688] sm:$0xff] }
 0x479   :  { %2376 = vmatprep.subr.bf16.mxu1 %v2375_v55  ;;  %v1393_v55 = vld [vmem:[#allocation4 + $0x698] sm:$0xff] }
 0x47a   :  { %v2403_v58 = vpack.c.bf16 %v1393_v55, %v1391_v45 }
 0x47c   :  { %2378 = vmatpush1.bf16.msra.mxu1 %v2377_v62  ;;  %v1395_v62 = vld [vmem:[#allocation4 + $0x6a8] sm:$0xff] }
 0x47d   :  { %2380 = vmatprep.subr.bf16.mxu1 %v2379_v34  ;;  %v1397_v34 = vld [vmem:[#allocation4 + $0x6b8] sm:$0xff] }
 0x47e   :  { %v2407_v1 = vpack.c.bf16 %v1397_v34, %v1395_v62  ;;  %v1422_v34 = vld [vmem:[%s3487_s4] sm:$0x3] }
 0x480   :  { %2382 = vmatpush1.bf16.msra.mxu1 %v2381_v4  ;;  %v1399_v4 = vld [vmem:[#allocation4 + $0x6c8] sm:$0xff] }
 0x481   :  { %2384 = vmatprep.subr.bf16.mxu1 %v2383_v5  ;;  %v1401_v5 = vld [vmem:[#allocation4 + $0x6d8] sm:$0xff] }
 0x482   :  { %v2411_v7 = vpack.c.bf16 %v1401_v5, %v1399_v4 }
 0x484   :  { %2386 = vmatpush1.bf16.msra.mxu1 %v2385_v14  ;;  %v2415_v14 = vpack.c.bf16 %v1405_v11, %v1403_v10 }
 0x485   :  { %2388 = vmatprep.subr.bf16.mxu1 %v2387_v16  ;;  %v1404_v16 = vld [vmem:[#allocation4 + $0x6f0] sm:$0xff] }
 0x486   :  { %v2417_v20 = vpack.c.bf16 %v1404_v16, %v1402_v0 }
 0x487   :  { %1657 = vmatmul.mubr.f32.vlgmr.msra.gmra.mrb[0].mxu1 %v1180_v27  ;;  %v1414_v27 = vld [vmem:[#allocation4 + $0x740] sm:$0xff] }
 0x488   :  { %1662 = vmatprep.mubr.f32.mxu1 %v1173_v36  ;;  %2390 = vmatpush1.bf16.msra.mxu1 %v2389_v25  ;;  %v2421_v25 = vpack.c.bf16 %v1408_v57, %v1406_v22  ;;  %v2429_v36 = vpack.c.bf16 %v1416_v31, %v1414_v27 }
 0x489   :  { %2392 = vmatprep.subr.bf16.mxu1 %v2391_v32  ;;  %v1417_v32 = vld [vmem:[#allocation4 + $0x758] sm:$0xff] }
 0x48a   :  { %v2427_v17 = vpack.c.bf16 %v1417_v32, %v1415_v30  ;;  %v1865_v32 = vld [vmem:[%s3488_s5 + $0x8] sm:$0xff] }
 0x48b   :  { %1663 = vmatmul.mubr.f32.gmra.mrb[2].mxu1 %v1181_v60  ;;  %v1125_v60 = vld [vmem:[#allocation3 + $0x28] sm:$0xf0]  ;;  %v2437_v27 = vpack.c.bf16 %v1865_v32, %v1864_v28 }
 0x48c   :  { %2394 = vmatpush1.bf16.msra.mxu1 %v2393_v42  ;;  %2098 = vmatprep.mubr.msk.f32.mxu1 %vm333_vm11, %v1141_v52  ;;  %v1420_v42 = vld [vmem:[#allocation4 + $0x770] sm:$0xff]  ;;  %v1136_v52 = vrot.slane %v1120_v49, 4  ;;  %v1887_v49 = vld [vmem:[%s3488_s5 + $0xb8] sm:$0xff] }
 0x48d   :  { %2396 = vmatprep.subr.bf16.mxu1 %v2395_v29  ;;  %v2433_v46 = vpack.c.bf16 %v1420_v42, %v1418_v39  ;;  %v1127_v29 = vld [vmem:[#allocation3 + $0x38] sm:$0xf]  ;;  %v2441_v39 = vpack.c.bf16 %v1867_v35, %v1866_v33 }
 0x48e   :  { %v1146_v50 = vrot.slane %v1127_v29, 4  ;;  %v1138_v41 = vsel %vm228_vm3, %v1136_v52, %v1137_v53  ;;  %v1886_v29 = vld [vmem:[%s3488_s5 + $0xb0] sm:$0xff]  ;;  %v1888_v52 = vld [vmem:[%s3488_s5 + $0xc0] sm:$0xff] }
 0x490   :  { %2398 = vmatpush1.bf16.msra.mxu1 %v2397_v44  ;;  %v1145_v44 = vrot.slane %v1125_v60, 4  ;;  %v2447_v60 = vpack.c.bf16 %v1887_v49, %v1886_v29 }
 0x491   :  { %2400 = vmatprep.subr.bf16.mxu1 %v2399_v15  ;;  %v1124_v15 = vld [vmem:[#allocation3 + $0x20] sm:$0xf0] }
 0x492   :  { %v1147_v45 = vsel %vm228_vm3, %v1145_v44, %v1146_v50  ;;  %v1142_v55 = vrot.slane %v1124_v15, 4  ;;  %v1870_v50 = vld [vmem:[%s3488_s5 + $0x30] sm:$0xff]  ;;  %v1889_v44 = vld [vmem:[%s3488_s5 + $0xc8] sm:$0xff] }
 0x493   :  { %v2449_v15 = vpack.c.bf16 %v1871_v51, %v1870_v50 }
 0x494   :  { %2402 = vmatpush1.bf16.msra.mxu1 %v2401_v56  ;;  %v1144_v56 = vsel %vm228_vm3, %v1142_v55, %v1143_v54  ;;  %v1872_v54 = vld [vmem:[%s3488_s5 + $0x40] sm:$0xff]  ;;  %v1890_v55 = vld [vmem:[%s3488_s5 + $0xd0] sm:$0xff]  ;;  %vm2075_vm3 = vcmask 74752  }
 0x495   :  { %2404 = vmatprep.subr.bf16.mxu1 %v2403_v58 }
 0x498   :  { %2406 = vmatpush1.bf16.msra.mxu1 %v2405_v63  ;;  %v1427_v63 = vrot.slane %v1422_v34, %v2845_v38 }
 0x499   :  { %2408 = vmatprep.subr.bf16.mxu1 %v2407_v1  ;;  %v1431_v1 = vrot.slane %v1422_v34, %v211_v40  ;;  %v1892_v34 = vld [vmem:[%s3488_s5 + $0xe0] sm:$0xff] }
 0x49c   :  { %2410 = vmatpush1.bf16.msra.mxu1 %v2409_v6 }
 0x49d   :  { %2412 = vmatprep.subr.bf16.mxu1 %v2411_v7 }
 0x4a0   :  { %2414 = vmatpush1.bf16.msra.mxu1 %v2413_v13 }
 0x4a1   :  { %2416 = vmatprep.subr.bf16.mxu1 %v2415_v14 }
 0x4a4   :  { %2418 = vmatpush1.bf16.msra.mxu1 %v2417_v20 }
 0x4a5   :  { %2420 = vmatprep.subr.bf16.mxu1 %v2419_v21 }
 0x4a8   :  { %2422 = vmatpush1.bf16.msra.mxu1 %v2421_v25 }
 0x4a9   :  { %2424 = vmatprep.subr.bf16.mxu1 %v2423_v26  ;;  %v1880_v26 = vld [vmem:[%s3488_s5 + $0x80] sm:$0xff] }
 0x4aa   :  { %v2435_v30 = vpack.c.bf16 %v1881_v48, %v1880_v26 }
 0x4ac   :  { %2426 = vmatpush1.bf16.msra.mxu1 %v2425_v12  ;;  %v1882_v12 = vld [vmem:[%s3488_s5 + $0x90] sm:$0xff]  ;;  %2436 = vmatprep.subr.bf16.mxu0 %v2435_v30 }
 0x4ad   :  { %2428 = vmatprep.subr.bf16.mxu1 %v2427_v17  ;;  %v1883_v17 = vld [vmem:[%s3488_s5 + $0x98] sm:$0xff]  ;;  %2438 = vmatpush3.bf16.msra.mxu0 %v2437_v27 }
 0x4ae   :  { %v2439_v31 = vpack.c.bf16 %v1883_v17, %v1882_v12 }
 0x4b0   :  { %2430 = vmatpush1.bf16.msra.mxu1 %v2429_v36  ;;  %v1884_v36 = vld [vmem:[%s3488_s5 + $0xa0] sm:$0xff]  ;;  %2440 = vmatprep.subr.bf16.mxu0 %v2439_v31 }
 0x4b1   :  { %2432 = vmatprep.subr.bf16.mxu1 %v2431_v47  ;;  %v1885_v47 = vld [vmem:[%s3488_s5 + $0xa8] sm:$0xff]  ;;  %2442 = vmatpush3.bf16.msra.mxu0 %v2441_v39 }
 0x4b2   :  { %v2443_v42 = vpack.c.bf16 %v1885_v47, %v1884_v36 }
 0x4b4   :  { %2434 = vmatpush1.bf16.msra.mxu1 %v2433_v46  ;;  %v1869_v46 = vld [vmem:[%s3488_s5 + $0x28] sm:$0xff]  ;;  %2444 = vmatprep.subr.bf16.mxu0 %v2443_v42 }
 0x4b5   :  { %v2445_v53 = vpack.c.bf16 %v1869_v46, %v1868_v43 }
 0x4b7   :  { %1734 = vmatmul.mubr.f32.vlgmr.msra.gmra.mrb[0].mxu1 %v1138_v41  ;;  %2446 = vmatpush3.bf16.msra.mxu0 %v2445_v53  ;;  %v2451_v41 = vpack.c.bf16 %v1889_v44, %v1888_v52 }
 0x4b8   :  { %2099 = vmatprep.mubr.msk.f32.mxu1 %vm333_vm11, %v1147_v45  ;;  %2448 = vmatprep.subr.bf16.mxu0 %v2447_v60  ;;  %v1873_v45 = vld [vmem:[%s3488_s5 + $0x48] sm:$0xff] }
 0x4bb   :  { %1740 = vmatmul.mubr.f32.gmra.mrb[2].mxu1 %v1144_v56  ;;  %v1891_v56 = vld [vmem:[%s3488_s5 + $0xd8] sm:$0xff]  ;;  %2450 = vmatpush3.bf16.msra.mxu0 %v2449_v15 }
 0x4bc   :  { %2452 = vmatprep.subr.bf16.mxu0 %v2451_v41 }
 0x51b   :  { %v1504_v58 = vpop.f32.mrb[8].mxu0 }
 0x51c   :  { %v1506_v59 = vpop.f32.mrb[9].mxu0  ;;  %v1505_v2 = vadd.f32 %v1504_v58, %v1427_v63  ;;  %v2453_v58 = vpack.c.bf16 %v1873_v45, %v1872_v54 }
 0x51d   :  { %v1507_v3 = vadd.f32 %v1506_v59, %v1431_v1  ;;  %v2455_v59 = vpack.c.bf16 %v1891_v56, %v1890_v55 }
 0x51e   :  { %2454 = vmatpush3.bf16.msra.mxu0 %v2453_v58  ;;  %v1896_v58 = vld [vmem:[%s3488_s5 + $0x100] sm:$0xff] }
 0x51f   :  { %2456 = vmatprep.subr.bf16.mxu0 %v2455_v59  ;;  %v1897_v59 = vld [vmem:[%s3488_s5 + $0x108] sm:$0xff] }
 0x52b   :  { %v1510_v61 = vpop.f32.mrb[10].mxu0 }
 0x52c   :  { %v1512_v62 = vpop.f32.mrb[11].mxu0  ;;  %v1511_v8 = vadd.f32 %v1510_v61, %v1427_v63  ;;  %v1874_v61 = vld [vmem:[%s3488_s5 + $0x50] sm:$0xff]  ;;  %v1893_v63 = vld [vmem:[%s3488_s5 + $0xe8] sm:$0xff] }
 0x52d   :  { %v1513_v10 = vadd.f32 %v1512_v62, %v1431_v1  ;;  %v1875_v62 = vld [vmem:[%s3488_s5 + $0x58] sm:$0xff] }
 0x52e   :  { %v2457_v1 = vpack.c.bf16 %v1875_v62, %v1874_v61  ;;  %v1914_v62 = vld [vmem:[%s3488_s5 + $0x190] sm:$0xff] }
 0x530   :  { %2458 = vmatpush3.bf16.msra.mxu0 %v2457_v1 }
 0x58a   :  { %v1735_v4 = vpop.f32.mrb[0].mxu1 }
 0x58b   :  { %v2500_v5 = vadd.f32 %v1735_v4, %v1505_v2  ;;  %v1737_v6 = vpop.f32.mrb[1].mxu1  ;;  %v2459_v2 = vpack.c.bf16 %v1893_v63, %v1892_v34  ;;  %v1876_v4 = vld [vmem:[%s3488_s5 + $0x60] sm:$0xff]  ;;  %v1915_v34 = vld [vmem:[%s3488_s5 + $0x198] sm:$0xff] }
 0x58c   :  { %v2502_v7 = vadd.f32 %v1737_v6, %v1507_v3 }
 0x58d   :  { %v1746_v9 = vmax.f32 %v2500_v5, 0.0  ;;  %2460 = vmatprep.subr.bf16.mxu0 %v2459_v2  ;;  %v1877_v5 = vld [vmem:[%s3488_s5 + $0x68] sm:$0xff] }
 0x58e   :  { %v1747_v11 = vmax.f32 %v2502_v7, 0.0  ;;  %v1741_v13 = vpop.f32.mrb[2].mxu1 }
 0x58f   :  { %v2504_v14 = vadd.f32 %v1741_v13, %v1511_v8  ;;  %v1743_v0 = vpop.f32.mrb[3].mxu1  ;;  %v1754_v18 = vrot.slane %v1746_v9, 1 }
 0x590   :  { %v2506_v16 = vadd.f32 %v1743_v0, %v1513_v10  ;;  %v1755_v38 = vrot.slane %v1747_v11, 1  ;;  %v1894_v10 = vld [vmem:[%s3488_s5 + $0xf0] sm:$0xff] }
 0x591   :  { %v1748_v19 = vmax.f32 %v2504_v14, 0.0  ;;  %v3216_v21 = vmax.f32 %v1746_v9, %v1754_v18  ;;  %v2461_v9 = vpack.c.bf16 %v1877_v5, %v1876_v4  ;;  %v1879_v18 = vld [vmem:[%s3488_s5 + $0x78] sm:$0xff] }
 0x592   :  { %v1749_v20 = vmax.f32 %v2506_v16, 0.0  ;;  %v3220_v57 = vmax.f32 %v1747_v11, %v1755_v38  ;;  %v1895_v11 = vld [vmem:[%s3488_s5 + $0xf8] sm:$0xff]  ;;  %v1878_v16 = vld [vmem:[%s3488_s5 + $0x70] sm:$0xff] }
 0x593   :  { %v1756_v37 = vrot.slane %v1748_v19, 1  ;;  %v2463_v0 = vpack.c.bf16 %v1895_v11, %v1894_v10  ;;  %2462 = vmatpush3.bf16.msra.mxu0 %v2461_v9  ;;  %v2471_v9 = vpack.c.bf16 %v1915_v34, %v1914_v62  ;;  %v1898_v10 = vld [vmem:[%s3488_s5 + $0x110] sm:$0xff]  ;;  %v1899_v11 = vld [vmem:[%s3488_s5 + $0x118] sm:$0xff] }
 0x594   :  { %v1757_v40 = vrot.slane %v1749_v20, 1 }
 0x595   :  { %v3218_v22 = vmax.f32 %v1748_v19, %v1756_v37  ;;  %2464 = vmatprep.subr.bf16.mxu0 %v2463_v0  ;;  %v1917_v0 = vld [vmem:[%s3488_s5 + $0x1a8] sm:$0xff] }
 0x596   :  { %v3222_v23 = vmax.f32 %v1749_v20, %v1757_v40  ;;  %v2465_v20 = vpack.c.bf16 %v1879_v18, %v1878_v16 }
 0x597   :  { %v2551_v24 = vpack.i.bf16 %v3218_v22, %v3216_v21 }
 0x598   :  { %v2556_v25 = vpack.i.bf16 %v3222_v23, %v3220_v57  ;;  %2466 = vmatpush3.bf16.msra.mxu0 %v2465_v20 }
 0x599   :  { %2552 = vrot.lane.b32.xlu0 %v2551_v24, %s2649_s8 }
 0x59a   :  { %2557 = vrot.lane.b32.xlu1 %v2556_v25, %s2649_s8 }
 0x60b   :  { %v2553_v3 = vpop.permute.xlu0 %2552 }
 0x60c   :  { %v2555_v6 = vunpack.i.h.bf16 %v2553_v3  ;;  %v2554_v7 = vunpack.i.l.bf16 %v2553_v3  ;;  %v2558_v8 = vpop.permute.xlu1 %2557 }
 0x60d   :  { %v2560_v13 = vunpack.i.h.bf16 %v2558_v8  ;;  %v2559_v14 = vunpack.i.l.bf16 %v2558_v8 }
 0x60e   :  { %v1775_v19 = vmax.f32 %v3218_v22, %v2555_v6  ;;  %v1774_v38 = vmax.f32 %v3216_v21, %v2554_v7  ;;  %v2469_v6 = vpack.c.bf16 %v1897_v59, %v1896_v58 }
 0x60f   :  { %v1785_v37 = vmax.f32 %v3222_v23, %v2560_v13  ;;  %v1784_v40 = vmax.f32 %v3220_v57, %v2559_v14  ;;  %v1912_v57 = vld [vmem:[%s3488_s5 + $0x180] sm:$0xff]  ;;  %v1913_v23 = vld [vmem:[%s3488_s5 + $0x188] sm:$0xff] }
 0x610   :  { %v1788_v24 = vrot.slane %v1775_v19, 7  ;;  %v1805_v25 = vrot.slane %v1775_v19, 1  ;;  %v1821_v26 = vrot.slane %v1775_v19, 3  ;;  %v1837_v48 = vrot.slane %v1775_v19, 5  ;;  %v1916_v14 = vld [vmem:[%s3488_s5 + $0x1a0] sm:$0xff] }
 0x611   :  { %v1804_v28 = vrot.slane %v1774_v38, 2  ;;  %v1796_v30 = vrot.slane %v1785_v37, 7  ;;  %v1820_v32 = vrot.slane %v1774_v38, 4  ;;  %v1836_v12 = vrot.slane %v1774_v38, 6 }
 0x612   :  { %v1812_v17 = vrot.slane %v1785_v37, 1  ;;  %v1811_v27 = vrot.slane %v1784_v40, 2  ;;  %v1789_v21 = vsel %vm381_vm12, %v1788_v24, %v1774_v38  ;;  %v1828_v31 = vrot.slane %v1785_v37, 3  ;;  %v1900_v24 = vld [vmem:[%s3488_s5 + $0x120] sm:$0xff] }
 0x613   :  { %v1806_v22 = vsel %vm381_vm12, %v1805_v25, %v1804_v28  ;;  %v1797_v35 = vsel %vm381_vm12, %v1796_v30, %v1784_v40  ;;  %v1844_v47 = vrot.slane %v1785_v37, 5  ;;  %v1827_v39 = vrot.slane %v1784_v40, 4  ;;  %v1901_v25 = vld [vmem:[%s3488_s5 + $0x128] sm:$0xff]  ;;  %v1919_v28 = vld [vmem:[%s3488_s5 + $0x1b8] sm:$0xff] }
 0x614   :  { %v2561_v33 = vpack.i.bf16 %v1789_v21, %v1806_v22  ;;  %v1813_v36 = vsel %vm381_vm12, %v1812_v17, %v1811_v27  ;;  %v1843_v42 = vrot.slane %v1784_v40, 6  ;;  %v3342_v46 = vsel %vm381_vm12, %v1821_v26, %v1820_v32  ;;  %v1903_v17 = vld [vmem:[%s3488_s5 + $0x138] sm:$0xff]  ;;  %v1920_v27 = vld [vmem:[%s3488_s5 + $0x1c0] sm:$0xff] }
 0x615   :  { %v2566_v43 = vpack.i.bf16 %v1797_v35, %v1813_v36  ;;  %v1838_v29 = vsel %vm381_vm12, %v1837_v48, %v1836_v12  ;;  %v2467_v49 = vpack.c.bf16 %v1913_v23, %v1912_v57  ;;  %v1829_v60 = vsel %vm381_vm12, %v1828_v31, %v1827_v39  ;;  %v1918_v48 = vld [vmem:[%s3488_s5 + $0x1b0] sm:$0xff]  ;;  %v1904_v23 = vld [vmem:[%s3488_s5 + $0x140] sm:$0xff]  ;;  %v1905_v31 = vld [vmem:[%s3488_s5 + $0x148] sm:$0xff] }
 0x616   :  { %2562 = vrot.lane.b32.xlu0 %v2561_v33, %s2649_s8  ;;  %v2576_v53 = vpack.i.bf16 %v3342_v46, %v1838_v29  ;;  %v1845_v50 = vsel %vm381_vm12, %v1844_v47, %v1843_v42  ;;  %v2473_v38 = vpack.c.bf16 %v1899_v11, %v1898_v10  ;;  %v2475_v40 = vpack.c.bf16 %v1917_v0, %v1916_v14  ;;  %v1902_v12 = vld [vmem:[%s3488_s5 + $0x130] sm:$0xff]  ;;  %v1923_v35 = vld [vmem:[%s3488_s5 + $0x1d8] sm:$0xff] }
 0x617   :  { %2567 = vrot.lane.b32.xlu1 %v2566_v43, %s2650_s9  ;;  %2468 = vmatprep.subr.bf16.mxu0 %v2467_v49  ;;  %v2581_v51 = vpack.i.bf16 %v1829_v60, %v1845_v50  ;;  %v2477_v30 = vpack.c.bf16 %v1901_v25, %v1900_v24  ;;  %v2479_v32 = vpack.c.bf16 %v1919_v28, %v1918_v48  ;;  %v1922_v33 = vld [vmem:[%s3488_s5 + $0x1d0] sm:$0xff]  ;;  %v1907_v42 = vld [vmem:[%s3488_s5 + $0x158] sm:$0xff]  ;;  %v1908_v60 = vld [vmem:[%s3488_s5 + $0x160] sm:$0xff] }
 0x618   :  { %v2485_v36 = vpack.c.bf16 %v1905_v31, %v1904_v23  ;;  %v2487_v47 = vpack.c.bf16 %v1923_v35, %v1922_v33  ;;  %v1906_v39 = vld [vmem:[%s3488_s5 + $0x150] sm:$0xff]  ;;  %v1909_v50 = vld [vmem:[%s3488_s5 + $0x168] sm:$0xff] }
 0x619   :  { %v2489_v49 = vpack.c.bf16 %v1907_v42, %v1906_v39 }
 0x61a   :  { %2572 = vrot.lane.b32.xlu0 %v2566_v43, %s2652_s11  ;;  %v1924_v43 = vld [vmem:[%s3488_s5 + $0x1e0] sm:$0xff] }
 0x61b   :  { %2577 = vrot.lane.b32.xlu1 %v2576_v53, %s2649_s8 }
 0x61e   :  { %2582 = vrot.lane.b32.xlu0 %v2581_v51, %s2650_s9 }
 0x61f   :  { %2587 = vrot.lane.b32.xlu1 %v2581_v51, %s2652_s11  ;;  %v1926_v51 = vld [vmem:[%s3488_s5 + $0x1f0] sm:$0xff]  ;;  %s2654_s11 = smov [#allocation7]  }
 0x620   :  { %s2083_s2 = sshll.u32 %s2654_s11, 4  ;;  %s2084_s2 = int_to_ptr.vmem [resolvable:$true] %s2083_s2 }
 0x621   :  { %s2613_s10 = scalar_lea.vmem %s2084_s2, 32  ;;  %p2618_p9 = scmp.lt.s32.totalorder %s2084_s2, %s2084_s2 }
 0x622   :  { %p2614_p8 = scmp.ne.s32.totalorder %s2084_s2, %s2613_s10  ;;  %p2619_p10 = scmp.lt.s32.totalorder %s2613_s10, %s2613_s10 }
 0x624   :  { %p2620_p11 = por %p2619_p10, %p2618_p9 }
 0x626   :  { %p2621_p12 = pnand %p2620_p11, %p2614_p8 }
 0x688   :  { %v2563_v52 = vpop.permute.xlu0 %2562 }
 0x689   :  { %v2565_v44 = vunpack.i.h.bf16 %v2563_v52  ;;  %v2564_v15 = vunpack.i.l.bf16 %v2563_v52  ;;  %v2568_v41 = vpop.permute.xlu1 %2567  ;;  %v1927_v52 = vld [vmem:[%s3488_s5 + $0x1f8] sm:$0xff] }
 0x68a   :  { %v2570_v54 = vunpack.i.h.bf16 %v2568_v41  ;;  %v2569_v45 = vunpack.i.l.bf16 %v2568_v41  ;;  %v1910_v41 = vld [vmem:[%s3488_s5 + $0x170] sm:$0xff] }
 0x68b   :  { %v1852_v55 = vsel %vm411_vm14, %v1789_v21, %v2565_v44  ;;  %v1855_v56 = vsel %vm411_vm14, %v1806_v22, %v2564_v15  ;;  %v1921_v21 = vld [vmem:[%s3488_s5 + $0x1c8] sm:$0xff]  ;;  %v2481_v22 = vpack.c.bf16 %v1903_v17, %v1902_v12  ;;  %v2493_v44 = vpack.c.bf16 %v1909_v50, %v1908_v60 }
 0x68c   :  { %v2573_v61 = vpop.permute.xlu0 %2572  ;;  %v1853_v3 = vsel %vm333_vm11, %v1852_v55, %v2570_v54  ;;  %v1856_v5 = vsel %vm333_vm11, %v1855_v56, %v2569_v45  ;;  %v2483_v57 = vpack.c.bf16 %v1921_v21, %v1920_v27  ;;  %v2495_v15 = vpack.c.bf16 %v1927_v52, %v1926_v51  ;;  %v1911_v54 = vld [vmem:[%s3488_s5 + $0x178] sm:$0xff] }
 0x68d   :  { %v2575_v63 = vunpack.i.h.bf16 %v2573_v61  ;;  %v2574_v1 = vunpack.i.l.bf16 %v2573_v61  ;;  %v3367_v2 = vpop.permute.xlu1 %2577  ;;  %v2497_v56 = vpack.c.bf16 %v1911_v54, %v1910_v41 }
 0x68e   :  { %v2579_v4 = vunpack.i.l.bf16 %v3367_v2  ;;  %v2580_v45 = vunpack.i.h.bf16 %v3367_v2  ;;  %v2100_v2 = vld [vmem:[%s3489_s6] ss:$0 sm:$0xff] }
 0x68f   :  { %v1857_v7 = vsel %vm417_vm0, %v1856_v5, %v2574_v1  ;;  %v1854_v8 = vsel %vm417_vm0, %v1853_v3, %v2575_v63 }
 0x690   :  { %v3380_v13 = vpop.permute.xlu0 %2582  ;;  %1999 = vmatprep.mubr.f32.mxu0 %v1857_v7  ;;  %v1861_v20 = vsel %vm411_vm14, %v1838_v29, %v2579_v4  ;;  %v1925_v29 = vld [vmem:[%s3488_s5 + $0x1e8] sm:$0xff]  ;;  %v1858_v58 = vsel %vm411_vm14, %v3342_v46, %v2580_v45 }
 0x691   :  { %v2584_v16 = vunpack.i.l.bf16 %v3380_v13  ;;  %v3389_v18 = vpop.permute.xlu1 %2587  ;;  %2000 = vmatmul.mubr.f32.vlgmr.msra.gmra.mrb[12].mxu0 %v1854_v8  ;;  %v2491_v53 = vpack.c.bf16 %v1925_v29, %v1924_v43  ;;  %v2585_v55 = vunpack.i.h.bf16 %v3380_v13 }
 0x692   :  { %v2589_v19 = vunpack.i.l.bf16 %v3389_v18  ;;  %2470 = vmatpush3.bf16.msra.mxu0 %v2469_v6  ;;  %v2590_v59 = vunpack.i.h.bf16 %v3389_v18 }
 0x693   :  { %2472 = vmatprep.subr.bf16.mxu0 %v2471_v9  ;;  %v1862_v37 = vsel %vm333_vm11, %v1861_v20, %v2584_v16  ;;  %v1859_v61 = vsel %vm333_vm11, %v1858_v58, %v2585_v55 }
 0x694   :  { %v1863_v26 = vsel %vm417_vm0, %v1862_v37, %v2589_v19  ;;  %v1860_v62 = vsel %vm417_vm0, %v1859_v61, %v2590_v59 }
 0x695   :  { %2069 = vmatprep.mubr.f32.mxu0 %v1863_v26 }
 0x696   :  { %2474 = vmatpush3.bf16.msra.mxu0 %v2473_v38 }
 0x697   :  { %2476 = vmatprep.subr.bf16.mxu0 %v2475_v40 }
 0x69a   :  { %2478 = vmatpush3.bf16.msra.mxu0 %v2477_v30 }
 0x69b   :  { %2480 = vmatprep.subr.bf16.mxu0 %v2479_v32 }
 0x69e   :  { %2482 = vmatpush3.bf16.msra.mxu0 %v2481_v22 }
 0x69f   :  { %2484 = vmatprep.subr.bf16.mxu0 %v2483_v57 }
 0x6a2   :  { %2486 = vmatpush3.bf16.msra.mxu0 %v2485_v36 }
 0x6a3   :  { %2488 = vmatprep.subr.bf16.mxu0 %v2487_v47 }
 0x6a6   :  { %2490 = vmatpush3.bf16.msra.mxu0 %v2489_v49 }
 0x6a7   :  { %2492 = vmatprep.subr.bf16.mxu0 %v2491_v53 }
 0x6aa   :  { %2494 = vmatpush3.bf16.msra.mxu0 %v2493_v44 }
 0x6ab   :  { %2496 = vmatprep.subr.bf16.mxu0 %v2495_v15 }
 0x6ae   :  { %2498 = vmatpush3.bf16.msra.mxu0 %v2497_v56 }
 0x6b1   :  { %2070 = vmatmul.mubr.f32.vlgmr.msra.gmra.mrb[14].mxu0 %v1860_v62 }
 0x764   :  { %v2133_v34 = vpop.f32.mrb[12].mxu0 }
 0x765   :  { %v2134_v63 = vpop.f32.mrb[13].mxu0 }
 0x766   :  { %v2135_v1 = vadd.f32 %v2134_v63, %v2133_v34 }
 0x768   :  { %v2002_v46 = vadd.f32 %v2135_v1, %v2100_v2 }
 0x784   :  { %v2168_v3 = vpop.f32.mrb[14].mxu0 }
 0x785   :  { %v2169_v4 = vpop.f32.mrb[15].mxu0 }
 0x786   :  { %v2170_v5 = vadd.f32 %v2169_v4, %v2168_v3 }
 0x788   :  { %v2072_v6 = vadd.f32 %v2170_v5, %v2002_v46 }
 0x78a   :  { %2076 = vst.msk [vmem:[#allocation7] sm:$0x3] %vm2075_vm3, %v2072_v6 }
 0x78b   :  { %2624 = shalt.err (!%p2621_p12)
}
 0x78c   :  { %s2625_s6 = scalar_lea.hbm %s3490_s7, 32 }
 0x78d   :  { %p2626_p13 = scmp.ne.s32.totalorder %s3490_s7, %s2625_s6  ;;  %p2629_p0 = scmp.lt.u32.totalorder %s2625_s6, %s3490_s7 }
 0x78f   :  { %p2631_p1 = pnand %p2629_p0, %p2626_p13 }
 0x791   :  { %2634 = shalt.err (!%p2631_p1)
}
 0x792   :  { %2086 = dma.vmem_to_hbm [thread:$0]  %s2084_s2, 32, %s3490_s7, [#allocation6]  }
 0x793   :  { %2637 = dma.done.wait [#allocation6], 32  }
 0x794   :  { %2638 = vsyncadd [#allocation6], 4294967264 }
 0x795   :  { %2090 = vsyncpa [#allocation5], 1 }
 0x796   :  { %2091 = vsyncpa [#allocation6], 1 }

</bundles_post_ra>
